<compile_context>
chip_gen: v6e
topology: v6e:2x2x1
jax: 0.10.0
libtpu: 0.0.40
codegen_flags: <defaults>
</compile_context>

<pallas_src>
import math

import jax
import jax.numpy as jnp
from jax.experimental import pallas as pl
from jax.experimental.pallas import tpu as pltpu

# ----- model dimensions (small, synthetic) -----
VOCAB = 100
MAX_SEQ = 16
HIDDEN = 32
NUM_HEADS = 4
HEAD_DIM = HIDDEN // NUM_HEADS
FFN = 64
BATCH_BLOCK = 8          # sequences per grid step (fills the 8-sublane axis)


def _layernorm(x, g, b, eps=1e-12):
    mu = jnp.mean(x, axis=-1, keepdims=True)
    var = jnp.mean(jnp.square(x - mu), axis=-1, keepdims=True)
    return (x - mu) * jax.lax.rsqrt(var + eps) * g + b


def _encoder_pool_kernel(x_ref, mask_ref, wqkv_ref, bqkv_ref, wo_ref,
                         w1_ref, w2_ref, vecs_ref, b1_ref, out_ref):
    Bt, S, H = x_ref.shape
    N = Bt * S
    x = x_ref[...].reshape(N, H)              # (Bt*S, H) token-parallel activations
    m = mask_ref[...]                         # (Bt, S) float {0, 1}
    neg = ((1.0 - m) * (-1e9))[:, None, :]    # (Bt, 1, S) additive attention mask

    vecs = vecs_ref[...]                      # (6, H) packed small params, single DMA
    bo, g1, be1, b2, g2, be2 = (vecs[i:i + 1] for i in range(6))

    scale = 1.0 / math.sqrt(HEAD_DIM)
    attn = jnp.zeros((N, H), jnp.float32)
    # Static unroll over heads; weights are pre-split per head so there is no lane
    # slicing, no k^T transpose and no concatenate inside the kernel.
    for h in range(NUM_HEADS):
        qh = jnp.dot(x, wqkv_ref[0, h], preferred_element_type=jnp.float32) + bqkv_ref[0, h]
        kh = jnp.dot(x, wqkv_ref[1, h], preferred_element_type=jnp.float32) + bqkv_ref[1, h]
        vh = jnp.dot(x, wqkv_ref[2, h], preferred_element_type=jnp.float32) + bqkv_ref[2, h]
        q3 = qh.reshape(Bt, S, HEAD_DIM)
        k3 = kh.reshape(Bt, S, HEAD_DIM)
        v3 = vh.reshape(Bt, S, HEAD_DIM)
        # batched over the Bt sequences; contract the last dim (no transpose needed)
        s = jnp.einsum('bqd,bkd->bqk', q3, k3,
                       preferred_element_type=jnp.float32) * scale + neg
        s = s - jnp.max(s, axis=-1, keepdims=True)
        p = jnp.exp(s)
        p = p * pl.reciprocal(jnp.sum(p, axis=-1, keepdims=True), approx=True)
        ctx = jnp.einsum('bqk,bkd->bqd', p, v3, preferred_element_type=jnp.float32)
        # ctx @ wo[h*D:(h+1)*D, :] accumulated over heads == concat(heads) @ wo
        attn = attn + jnp.dot(ctx.reshape(N, HEAD_DIM), wo_ref[h],
                              preferred_element_type=jnp.float32)
    attn = attn + bo

    h1 = _layernorm(x + attn, g1, be1)

    # --- feed forward ---
    ff = jnp.dot(h1, w1_ref[...], preferred_element_type=jnp.float32) + b1_ref[...]
    ff = jax.nn.gelu(ff, approximate=True)
    ff = jnp.dot(ff, w2_ref[...], preferred_element_type=jnp.float32) + b2
    h2 = _layernorm(h1 + ff, g2, be2)

    # --- masked mean pooling: VPU/XLU masked reduce over tokens (no 1xSxH matmul) ---
    h2b = h2.reshape(Bt, S, H)
    pooled = jnp.sum(h2b * m[:, :, None], axis=1)                   # (Bt, H)
    denom = jnp.maximum(jnp.sum(m, axis=1, keepdims=True), 1e-9)    # (Bt, 1)
    emb = pooled * pl.reciprocal(denom, approx=True)

    # --- L2 normalize (sentence-transformers Normalize module) ---
    inv = jax.lax.rsqrt(jnp.maximum(jnp.sum(emb * emb, axis=-1, keepdims=True), 1e-12))
    out_ref[...] = emb * inv                                        # dense (Bt, H) store


def sentence_transformer_forward(input_ids, attention_mask, params,
                                 batch_block=BATCH_BLOCK):
    B, S = input_ids.shape
    H, F, NH, D = HIDDEN, FFN, NUM_HEADS, HEAD_DIM

    # glue: embedding lookup + positional embedding (plain JAX gather)
    x = (params["tok_emb"][input_ids] + params["pos_emb"][None, :S, :]).astype(jnp.float32)
    mask_f = attention_mask.astype(jnp.float32)                     # (B, S)

    # pad batch so every grid step gets a full sublane-dense block
    Bt = batch_block
    Bp = pl.cdiv(B, Bt) * Bt
    if Bp != B:
        x = jnp.pad(x, ((0, Bp - B), (0, 0), (0, 0)))
        mask_f = jnp.pad(mask_f, ((0, Bp - B), (0, 0)))

    # pre-split attention weights per head (pure JAX, outside the kernel)
    wq_h = params["wq"].reshape(H, NH, D).transpose(1, 0, 2)         # (NH, H, D)
    wk_h = params["wk"].reshape(H, NH, D).transpose(1, 0, 2)
    wv_h = params["wv"].reshape(H, NH, D).transpose(1, 0, 2)
    wqkv = jnp.stack([wq_h, wk_h, wv_h], axis=0)                     # (3, NH, H, D)
    bqkv = jnp.stack([params["bq"].reshape(NH, 1, D),
                      params["bk"].reshape(NH, 1, D),
                      params["bv"].reshape(NH, 1, D)], axis=0)       # (3, NH, 1, D)
    wo_h = params["wo"].reshape(NH, D, H)                            # (NH, D, H)
    # pack all remaining (1, H) params into a single (6, H) tile -> one DMA
    vecs = jnp.concatenate([params["bo"], params["ln1_g"], params["ln1_b"],
                            params["b2"], params["ln2_g"], params["ln2_b"]], axis=0)

    grid = (Bp // Bt,)
    in_specs = [
        pl.BlockSpec((Bt, S, H), lambda b: (b, 0, 0)),               # activations block
        pl.BlockSpec((Bt, S), lambda b: (b, 0)),                     # mask block
        pl.BlockSpec((3, NH, H, D), lambda b: (0, 0, 0, 0)),         # per-head qkv weights
        pl.BlockSpec((3, NH, 1, D), lambda b: (0, 0, 0, 0)),         # per-head qkv biases
        pl.BlockSpec((NH, D, H), lambda b: (0, 0, 0)),               # per-head output proj
        pl.BlockSpec((H, F), lambda b: (0, 0)),                      # ffn w1
        pl.BlockSpec((F, H), lambda b: (0, 0)),                      # ffn w2
        pl.BlockSpec((6, H), lambda b: (0, 0)),                      # packed bias/LN params
        pl.BlockSpec((1, F), lambda b: (0, 0)),                      # ffn b1
    ]

    out = pl.pallas_call(
        _encoder_pool_kernel,
        out_shape=jax.ShapeDtypeStruct((Bp, H), jnp.float32),
        grid_spec=pltpu.PrefetchScalarGridSpec(
            num_scalar_prefetch=0,
            grid=grid,
            in_specs=in_specs,
            out_specs=pl.BlockSpec((Bt, H), lambda b: (b, 0)),       # lane/sublane-dense
        ),
        compiler_params=pltpu.CompilerParams(dimension_semantics=("parallel",)),
    )(x, mask_f, wqkv, bqkv, wo_h, params["w1"], params["w2"], vecs, params["b1"])
    return out[:B]


# ----- pure-JAX reference (same math, no Pallas) -----
def reference_forward(input_ids, attention_mask, params):
    B, S = input_ids.shape
    outs = []
    for b in range(B):
        x = (params["tok_emb"][input_ids[b]] + params["pos_emb"][:S, :]).astype(jnp.float32)
        m = attention_mask[b].astype(jnp.float32).reshape(1, S)
        neg = (1.0 - m) * (-1e9)
        q = x @ params["wq"] + params["bq"]
        k = x @ params["wk"] + params["bk"]
        v = x @ params["wv"] + params["bv"]
        scale = 1.0 / math.sqrt(HEAD_DIM)
        heads = []
        for h in range(NUM_HEADS):
            sl = slice(h * HEAD_DIM, (h + 1) * HEAD_DIM)
            s = q[:, sl] @ k[:, sl].T * scale + neg
            s = s - jnp.max(s, axis=-1, keepdims=True)
            p = jnp.exp(s)
            p = p / jnp.sum(p, axis=-1, keepdims=True)
            heads.append(p @ v[:, sl])
        ctx = jnp.concatenate(heads, axis=-1)
        attn = ctx @ params["wo"] + params["bo"]
        h1 = _layernorm(x + attn, params["ln1_g"], params["ln1_b"])
        ff = jax.nn.gelu(h1 @ params["w1"] + params["b1"], approximate=True)
        ff = ff @ params["w2"] + params["b2"]
        h2 = _layernorm(h1 + ff, params["ln2_g"], params["ln2_b"])
        pooled = (m @ h2) / jnp.maximum(jnp.sum(m), 1e-9)
        emb = pooled * jax.lax.rsqrt(jnp.maximum(jnp.sum(pooled * pooled), 1e-12))
        outs.append(emb[0])
    return jnp.stack(outs)


def init_params(key):
    ks = jax.random.split(key, 8)

    def nrm(k, shape, scale=0.05):
        return (scale * jax.random.normal(k, shape)).astype(jnp.float32)

    H, F = HIDDEN, FFN
    return {
        "tok_emb": nrm(ks[0], (VOCAB, H)),
        "pos_emb": nrm(ks[1], (MAX_SEQ, H)),
        "wq": nrm(ks[2], (H, H)), "bq": jnp.zeros((1, H), jnp.float32),
        "wk": nrm(ks[3], (H, H)), "bk": jnp.zeros((1, H), jnp.float32),
        "wv": nrm(ks[4], (H, H)), "bv": jnp.zeros((1, H), jnp.float32),
        "wo": nrm(ks[5], (H, H)), "bo": jnp.zeros((1, H), jnp.float32),
        "ln1_g": jnp.ones((1, H), jnp.float32), "ln1_b": jnp.zeros((1, H), jnp.float32),
        "w1": nrm(ks[6], (H, F)), "b1": jnp.zeros((1, F), jnp.float32),
        "w2": nrm(ks[7], (F, H)), "b2": jnp.zeros((1, H), jnp.float32),
        "ln2_g": jnp.ones((1, H), jnp.float32), "ln2_b": jnp.zeros((1, H), jnp.float32),
    }


if __name__ == "__main__":
    B, S = 2, 8
    key = jax.random.PRNGKey(0)
    pkey, ikey = jax.random.split(key)
    params = init_params(pkey)

    input_ids = jax.random.randint(ikey, (B, S), 0, VOCAB, dtype=jnp.int32)
    attention_mask = jnp.array([[1, 1, 1, 1, 1, 1, 1, 1],
                                [1, 1, 1, 1, 1, 0, 0, 0]], dtype=jnp.int32)

    emb = sentence_transformer_forward(input_ids, attention_mask, params)
    emb = jax.block_until_ready(emb)

    ref = reference_forward(input_ids, attention_mask, params)
    assert emb.shape == (B, HIDDEN), emb.shape
    assert bool(jnp.all(jnp.isfinite(emb)))
    assert bool(jnp.allclose(emb, ref, atol=2e-2, rtol=2e-2)), (emb, ref)
    print("KERNEL_OK")
</pallas_src>

<mosaic_0001>
module attributes {stable_mosaic.version = 11 : i64} {
  func.func @_encoder_pool_kernel(%arg0: i32, %arg1: memref<8x8x32xf32, #tpu.memory_space<vmem>>, %arg2: memref<8x8xf32, #tpu.memory_space<vmem>>, %arg3: memref<3x4x32x8xf32, #tpu.memory_space<vmem>>, %arg4: memref<3x4x1x8xf32, #tpu.memory_space<vmem>>, %arg5: memref<4x8x32xf32, #tpu.memory_space<vmem>>, %arg6: memref<32x64xf32, #tpu.memory_space<vmem>>, %arg7: memref<64x32xf32, #tpu.memory_space<vmem>>, %arg8: memref<6x32xf32, #tpu.memory_space<vmem>>, %arg9: memref<1x64xf32, #tpu.memory_space<vmem>>, %arg10: memref<8x32xf32, #tpu.memory_space<vmem>>) attributes {dimension_semantics = [#tpu.dimension_semantics<parallel>], iteration_bounds = array<i64: 1>, scalar_prefetch = 0 : i64, scratch_operands = 0 : i64, tpu.core_type = #tpu.core_type<tc>, window_params = [{transform_indices = @transform_0, window_bounds = array<i64: 8, 8, 32>}, {transform_indices = @transform_1, window_bounds = array<i64: 8, 8>}, {pipeline_mode = #tpu.pipeline_mode<synchronous>, transform_indices = @transform_2, window_bounds = array<i64: 3, 4, 32, 8>}, {pipeline_mode = #tpu.pipeline_mode<synchronous>, transform_indices = @transform_3, window_bounds = array<i64: 3, 4, 1, 8>}, {pipeline_mode = #tpu.pipeline_mode<synchronous>, transform_indices = @transform_4, window_bounds = array<i64: 4, 8, 32>}, {pipeline_mode = #tpu.pipeline_mode<synchronous>, transform_indices = @transform_5, window_bounds = array<i64: 32, 64>}, {pipeline_mode = #tpu.pipeline_mode<synchronous>, transform_indices = @transform_6, window_bounds = array<i64: 64, 32>}, {pipeline_mode = #tpu.pipeline_mode<synchronous>, transform_indices = @transform_7, window_bounds = array<i64: 6, 32>}, {pipeline_mode = #tpu.pipeline_mode<synchronous>, transform_indices = @transform_8, window_bounds = array<i64: 1, 64>}, {transform_indices = @transform_9, window_bounds = array<i64: 8, 32>}]} {
    %c0 = arith.constant 0 : index
    %c0_0 = arith.constant 0 : index
    %c0_1 = arith.constant 0 : index
    %0 = vector.load %arg1[%c0, %c0_0, %c0_1] : memref<8x8x32xf32, #tpu.memory_space<vmem>>, vector<8x8x32xf32>
    %1 = vector.shape_cast %0 : vector<8x8x32xf32> to vector<64x32xf32>
    %c0_2 = arith.constant 0 : index
    %c0_3 = arith.constant 0 : index
    %2 = vector.load %arg2[%c0_2, %c0_3] : memref<8x8xf32, #tpu.memory_space<vmem>>, vector<8x8xf32>
    %cst = arith.constant 1.000000e+00 : f32
    %3 = vector.broadcast %cst : f32 to vector<8x8xf32>
    %4 = arith.subf %3, %2 : vector<8x8xf32>
    %cst_4 = arith.constant -1.000000e+09 : f32
    %5 = vector.broadcast %cst_4 : f32 to vector<8x8xf32>
    %6 = arith.mulf %4, %5 : vector<8x8xf32>
    %7 = vector.shape_cast %6 : vector<8x8xf32> to vector<8x1x8xf32>
    %c0_5 = arith.constant 0 : index
    %c0_6 = arith.constant 0 : index
    %8 = vector.load %arg8[%c0_5, %c0_6] : memref<6x32xf32, #tpu.memory_space<vmem>>, vector<6x32xf32>
    %9 = vector.extract_strided_slice %8 {offsets = [0, 0], sizes = [1, 32], strides = [1, 1]} : vector<6x32xf32> to vector<1x32xf32>
    %10 = vector.extract_strided_slice %8 {offsets = [1, 0], sizes = [1, 32], strides = [1, 1]} : vector<6x32xf32> to vector<1x32xf32>
    %11 = vector.extract_strided_slice %8 {offsets = [2, 0], sizes = [1, 32], strides = [1, 1]} : vector<6x32xf32> to vector<1x32xf32>
    %12 = vector.extract_strided_slice %8 {offsets = [3, 0], sizes = [1, 32], strides = [1, 1]} : vector<6x32xf32> to vector<1x32xf32>
    %13 = vector.extract_strided_slice %8 {offsets = [4, 0], sizes = [1, 32], strides = [1, 1]} : vector<6x32xf32> to vector<1x32xf32>
    %14 = vector.extract_strided_slice %8 {offsets = [5, 0], sizes = [1, 32], strides = [1, 1]} : vector<6x32xf32> to vector<1x32xf32>
    %cst_7 = arith.constant 0.000000e+00 : f32
    %15 = vector.broadcast %cst_7 : f32 to vector<64x32xf32>
    %c0_8 = arith.constant 0 : index
    %c0_9 = arith.constant 0 : index
    %c0_10 = arith.constant 0 : index
    %c0_11 = arith.constant 0 : index
    %16 = vector.load %arg3[%c0_8, %c0_9, %c0_10, %c0_11] : memref<3x4x32x8xf32, #tpu.memory_space<vmem>>, vector<1x1x32x8xf32>
    %17 = vector.shape_cast %16 : vector<1x1x32x8xf32> to vector<32x8xf32>
    %cst_12 = arith.constant dense<0.000000e+00> : vector<64x8xf32>
    %18 = tpu.matmul %1, %17, %cst_12 {dimension_numbers = #tpu.dot_dimension_numbers<[1], [0], [0], [1], [0, 0, 1, 1], [], []>} : vector<64x32xf32>, vector<32x8xf32>, vector<64x8xf32> -> vector<64x8xf32>
    %c0_13 = arith.constant 0 : index
    %c0_14 = arith.constant 0 : index
    %c0_15 = arith.constant 0 : index
    %c0_16 = arith.constant 0 : index
    %19 = vector.load %arg4[%c0_13, %c0_14, %c0_15, %c0_16] : memref<3x4x1x8xf32, #tpu.memory_space<vmem>>, vector<1x1x1x8xf32>
    %20 = vector.shape_cast %19 : vector<1x1x1x8xf32> to vector<1x8xf32>
    %21 = vector.broadcast %20 : vector<1x8xf32> to vector<64x8xf32>
    %22 = arith.addf %18, %21 : vector<64x8xf32>
    %c1 = arith.constant 1 : index
    %c0_17 = arith.constant 0 : index
    %c0_18 = arith.constant 0 : index
    %c0_19 = arith.constant 0 : index
    %23 = vector.load %arg3[%c1, %c0_17, %c0_18, %c0_19] : memref<3x4x32x8xf32, #tpu.memory_space<vmem>>, vector<1x1x32x8xf32>
    %24 = vector.shape_cast %23 : vector<1x1x32x8xf32> to vector<32x8xf32>
    %cst_20 = arith.constant dense<0.000000e+00> : vector<64x8xf32>
    %25 = tpu.matmul %1, %24, %cst_20 {dimension_numbers = #tpu.dot_dimension_numbers<[1], [0], [0], [1], [0, 0, 1, 1], [], []>} : vector<64x32xf32>, vector<32x8xf32>, vector<64x8xf32> -> vector<64x8xf32>
    %c1_21 = arith.constant 1 : index
    %c0_22 = arith.constant 0 : index
    %c0_23 = arith.constant 0 : index
    %c0_24 = arith.constant 0 : index
    %26 = vector.load %arg4[%c1_21, %c0_22, %c0_23, %c0_24] : memref<3x4x1x8xf32, #tpu.memory_space<vmem>>, vector<1x1x1x8xf32>
    %27 = vector.shape_cast %26 : vector<1x1x1x8xf32> to vector<1x8xf32>
    %28 = vector.broadcast %27 : vector<1x8xf32> to vector<64x8xf32>
    %29 = arith.addf %25, %28 : vector<64x8xf32>
    %c2 = arith.constant 2 : index
    %c0_25 = arith.constant 0 : index
    %c0_26 = arith.constant 0 : index
    %c0_27 = arith.constant 0 : index
    %30 = vector.load %arg3[%c2, %c0_25, %c0_26, %c0_27] : memref<3x4x32x8xf32, #tpu.memory_space<vmem>>, vector<1x1x32x8xf32>
    %31 = vector.shape_cast %30 : vector<1x1x32x8xf32> to vector<32x8xf32>
    %cst_28 = arith.constant dense<0.000000e+00> : vector<64x8xf32>
    %32 = tpu.matmul %1, %31, %cst_28 {dimension_numbers = #tpu.dot_dimension_numbers<[1], [0], [0], [1], [0, 0, 1, 1], [], []>} : vector<64x32xf32>, vector<32x8xf32>, vector<64x8xf32> -> vector<64x8xf32>
    %c2_29 = arith.constant 2 : index
    %c0_30 = arith.constant 0 : index
    %c0_31 = arith.constant 0 : index
    %c0_32 = arith.constant 0 : index
    %33 = vector.load %arg4[%c2_29, %c0_30, %c0_31, %c0_32] : memref<3x4x1x8xf32, #tpu.memory_space<vmem>>, vector<1x1x1x8xf32>
    %34 = vector.shape_cast %33 : vector<1x1x1x8xf32> to vector<1x8xf32>
    %35 = vector.broadcast %34 : vector<1x8xf32> to vector<64x8xf32>
    %36 = arith.addf %32, %35 : vector<64x8xf32>
    %37 = vector.shape_cast %22 : vector<64x8xf32> to vector<8x8x8xf32>
    %38 = vector.shape_cast %29 : vector<64x8xf32> to vector<8x8x8xf32>
    %39 = vector.shape_cast %36 : vector<64x8xf32> to vector<8x8x8xf32>
    "tpu.trace_start"() <{level = 10 : i32, message = "bqd,bkd->bqk"}> : () -> ()
    %cst_33 = arith.constant dense<0.000000e+00> : vector<8x8x8xf32>
    %40 = tpu.matmul %37, %38, %cst_33 {dimension_numbers = #tpu.dot_dimension_numbers<[2], [2], [1], [1], [0, 0, 0, 1, 1, 1], [0], [0]>} : vector<8x8x8xf32>, vector<8x8x8xf32>, vector<8x8x8xf32> -> vector<8x8x8xf32>
    "tpu.trace_stop"() : () -> ()
    %cst_34 = arith.constant 0.353553385 : f32
    %41 = vector.broadcast %cst_34 : f32 to vector<8x8x8xf32>
    %42 = arith.mulf %40, %41 : vector<8x8x8xf32>
    %43 = vector.broadcast %7 : vector<8x1x8xf32> to vector<8x8x8xf32>
    %44 = arith.addf %42, %43 : vector<8x8x8xf32>
    %cst_35 = arith.constant dense<0xFF800000> : vector<8x8xf32>
    %45 = vector.multi_reduction <maximumf>, %44, %cst_35 [2] : vector<8x8x8xf32> to vector<8x8xf32>
    %46 = vector.shape_cast %45 : vector<8x8xf32> to vector<8x8x1xf32>
    %47 = vector.broadcast %46 : vector<8x8x1xf32> to vector<8x8x8xf32>
    %48 = arith.subf %44, %47 : vector<8x8x8xf32>
    %49 = math.exp %48 : vector<8x8x8xf32>
    %cst_36 = arith.constant dense<0.000000e+00> : vector<8x8xf32>
    %50 = vector.multi_reduction <add>, %49, %cst_36 [2] : vector<8x8x8xf32> to vector<8x8xf32>
    %51 = vector.shape_cast %50 : vector<8x8xf32> to vector<8x8x1xf32>
    %52 = tpu.reciprocal %51 {approx = true} : vector<8x8x1xf32> -> vector<8x8x1xf32>
    %53 = vector.broadcast %52 : vector<8x8x1xf32> to vector<8x8x8xf32>
    %54 = arith.mulf %49, %53 : vector<8x8x8xf32>
    "tpu.trace_start"() <{level = 10 : i32, message = "bqk,bkd->bqd"}> : () -> ()
    %cst_37 = arith.constant dense<0.000000e+00> : vector<8x8x8xf32>
    %55 = tpu.matmul %54, %39, %cst_37 {dimension_numbers = #tpu.dot_dimension_numbers<[2], [1], [1], [2], [0, 0, 0, 1, 1, 2], [0], [0]>} : vector<8x8x8xf32>, vector<8x8x8xf32>, vector<8x8x8xf32> -> vector<8x8x8xf32>
    "tpu.trace_stop"() : () -> ()
    %56 = vector.shape_cast %55 : vector<8x8x8xf32> to vector<64x8xf32>
    %c0_38 = arith.constant 0 : index
    %c0_39 = arith.constant 0 : index
    %c0_40 = arith.constant 0 : index
    %57 = vector.load %arg5[%c0_38, %c0_39, %c0_40] : memref<4x8x32xf32, #tpu.memory_space<vmem>>, vector<1x8x32xf32>
    %58 = vector.shape_cast %57 : vector<1x8x32xf32> to vector<8x32xf32>
    %cst_41 = arith.constant dense<0.000000e+00> : vector<64x32xf32>
    %59 = tpu.matmul %56, %58, %cst_41 {dimension_numbers = #tpu.dot_dimension_numbers<[1], [0], [0], [1], [0, 0, 1, 1], [], []>} : vector<64x8xf32>, vector<8x32xf32>, vector<64x32xf32> -> vector<64x32xf32>
    %60 = arith.addf %15, %59 : vector<64x32xf32>
    %c0_42 = arith.constant 0 : index
    %c1_43 = arith.constant 1 : index
    %c0_44 = arith.constant 0 : index
    %c0_45 = arith.constant 0 : index
    %61 = vector.load %arg3[%c0_42, %c1_43, %c0_44, %c0_45] : memref<3x4x32x8xf32, #tpu.memory_space<vmem>>, vector<1x1x32x8xf32>
    %62 = vector.shape_cast %61 : vector<1x1x32x8xf32> to vector<32x8xf32>
    %cst_46 = arith.constant dense<0.000000e+00> : vector<64x8xf32>
    %63 = tpu.matmul %1, %62, %cst_46 {dimension_numbers = #tpu.dot_dimension_numbers<[1], [0], [0], [1], [0, 0, 1, 1], [], []>} : vector<64x32xf32>, vector<32x8xf32>, vector<64x8xf32> -> vector<64x8xf32>
    %c0_47 = arith.constant 0 : index
    %c1_48 = arith.constant 1 : index
    %c0_49 = arith.constant 0 : index
    %c0_50 = arith.constant 0 : index
    %64 = vector.load %arg4[%c0_47, %c1_48, %c0_49, %c0_50] : memref<3x4x1x8xf32, #tpu.memory_space<vmem>>, vector<1x1x1x8xf32>
    %65 = vector.shape_cast %64 : vector<1x1x1x8xf32> to vector<1x8xf32>
    %66 = vector.broadcast %65 : vector<1x8xf32> to vector<64x8xf32>
    %67 = arith.addf %63, %66 : vector<64x8xf32>
    %c1_51 = arith.constant 1 : index
    %c1_52 = arith.constant 1 : index
    %c0_53 = arith.constant 0 : index
    %c0_54 = arith.constant 0 : index
    %68 = vector.load %arg3[%c1_51, %c1_52, %c0_53, %c0_54] : memref<3x4x32x8xf32, #tpu.memory_space<vmem>>, vector<1x1x32x8xf32>
    %69 = vector.shape_cast %68 : vector<1x1x32x8xf32> to vector<32x8xf32>
    %cst_55 = arith.constant dense<0.000000e+00> : vector<64x8xf32>
    %70 = tpu.matmul %1, %69, %cst_55 {dimension_numbers = #tpu.dot_dimension_numbers<[1], [0], [0], [1], [0, 0, 1, 1], [], []>} : vector<64x32xf32>, vector<32x8xf32>, vector<64x8xf32> -> vector<64x8xf32>
    %c1_56 = arith.constant 1 : index
    %c1_57 = arith.constant 1 : index
    %c0_58 = arith.constant 0 : index
    %c0_59 = arith.constant 0 : index
    %71 = vector.load %arg4[%c1_56, %c1_57, %c0_58, %c0_59] : memref<3x4x1x8xf32, #tpu.memory_space<vmem>>, vector<1x1x1x8xf32>
    %72 = vector.shape_cast %71 : vector<1x1x1x8xf32> to vector<1x8xf32>
    %73 = vector.broadcast %72 : vector<1x8xf32> to vector<64x8xf32>
    %74 = arith.addf %70, %73 : vector<64x8xf32>
    %c2_60 = arith.constant 2 : index
    %c1_61 = arith.constant 1 : index
    %c0_62 = arith.constant 0 : index
    %c0_63 = arith.constant 0 : index
    %75 = vector.load %arg3[%c2_60, %c1_61, %c0_62, %c0_63] : memref<3x4x32x8xf32, #tpu.memory_space<vmem>>, vector<1x1x32x8xf32>
    %76 = vector.shape_cast %75 : vector<1x1x32x8xf32> to vector<32x8xf32>
    %cst_64 = arith.constant dense<0.000000e+00> : vector<64x8xf32>
    %77 = tpu.matmul %1, %76, %cst_64 {dimension_numbers = #tpu.dot_dimension_numbers<[1], [0], [0], [1], [0, 0, 1, 1], [], []>} : vector<64x32xf32>, vector<32x8xf32>, vector<64x8xf32> -> vector<64x8xf32>
    %c2_65 = arith.constant 2 : index
    %c1_66 = arith.constant 1 : index
    %c0_67 = arith.constant 0 : index
    %c0_68 = arith.constant 0 : index
    %78 = vector.load %arg4[%c2_65, %c1_66, %c0_67, %c0_68] : memref<3x4x1x8xf32, #tpu.memory_space<vmem>>, vector<1x1x1x8xf32>
    %79 = vector.shape_cast %78 : vector<1x1x1x8xf32> to vector<1x8xf32>
    %80 = vector.broadcast %79 : vector<1x8xf32> to vector<64x8xf32>
    %81 = arith.addf %77, %80 : vector<64x8xf32>
    %82 = vector.shape_cast %67 : vector<64x8xf32> to vector<8x8x8xf32>
    %83 = vector.shape_cast %74 : vector<64x8xf32> to vector<8x8x8xf32>
    %84 = vector.shape_cast %81 : vector<64x8xf32> to vector<8x8x8xf32>
    "tpu.trace_start"() <{level = 10 : i32, message = "bqd,bkd->bqk"}> : () -> ()
    %cst_69 = arith.constant dense<0.000000e+00> : vector<8x8x8xf32>
    %85 = tpu.matmul %82, %83, %cst_69 {dimension_numbers = #tpu.dot_dimension_numbers<[2], [2], [1], [1], [0, 0, 0, 1, 1, 1], [0], [0]>} : vector<8x8x8xf32>, vector<8x8x8xf32>, vector<8x8x8xf32> -> vector<8x8x8xf32>
    "tpu.trace_stop"() : () -> ()
    %cst_70 = arith.constant 0.353553385 : f32
    %86 = vector.broadcast %cst_70 : f32 to vector<8x8x8xf32>
    %87 = arith.mulf %85, %86 : vector<8x8x8xf32>
    %88 = vector.broadcast %7 : vector<8x1x8xf32> to vector<8x8x8xf32>
    %89 = arith.addf %87, %88 : vector<8x8x8xf32>
    %cst_71 = arith.constant dense<0xFF800000> : vector<8x8xf32>
    %90 = vector.multi_reduction <maximumf>, %89, %cst_71 [2] : vector<8x8x8xf32> to vector<8x8xf32>
    %91 = vector.shape_cast %90 : vector<8x8xf32> to vector<8x8x1xf32>
    %92 = vector.broadcast %91 : vector<8x8x1xf32> to vector<8x8x8xf32>
    %93 = arith.subf %89, %92 : vector<8x8x8xf32>
    %94 = math.exp %93 : vector<8x8x8xf32>
    %cst_72 = arith.constant dense<0.000000e+00> : vector<8x8xf32>
    %95 = vector.multi_reduction <add>, %94, %cst_72 [2] : vector<8x8x8xf32> to vector<8x8xf32>
    %96 = vector.shape_cast %95 : vector<8x8xf32> to vector<8x8x1xf32>
    %97 = tpu.reciprocal %96 {approx = true} : vector<8x8x1xf32> -> vector<8x8x1xf32>
    %98 = vector.broadcast %97 : vector<8x8x1xf32> to vector<8x8x8xf32>
    %99 = arith.mulf %94, %98 : vector<8x8x8xf32>
    "tpu.trace_start"() <{level = 10 : i32, message = "bqk,bkd->bqd"}> : () -> ()
    %cst_73 = arith.constant dense<0.000000e+00> : vector<8x8x8xf32>
    %100 = tpu.matmul %99, %84, %cst_73 {dimension_numbers = #tpu.dot_dimension_numbers<[2], [1], [1], [2], [0, 0, 0, 1, 1, 2], [0], [0]>} : vector<8x8x8xf32>, vector<8x8x8xf32>, vector<8x8x8xf32> -> vector<8x8x8xf32>
    "tpu.trace_stop"() : () -> ()
    %101 = vector.shape_cast %100 : vector<8x8x8xf32> to vector<64x8xf32>
    %c1_74 = arith.constant 1 : index
    %c0_75 = arith.constant 0 : index
    %c0_76 = arith.constant 0 : index
    %102 = vector.load %arg5[%c1_74, %c0_75, %c0_76] : memref<4x8x32xf32, #tpu.memory_space<vmem>>, vector<1x8x32xf32>
    %103 = vector.shape_cast %102 : vector<1x8x32xf32> to vector<8x32xf32>
    %cst_77 = arith.constant dense<0.000000e+00> : vector<64x32xf32>
    %104 = tpu.matmul %101, %103, %cst_77 {dimension_numbers = #tpu.dot_dimension_numbers<[1], [0], [0], [1], [0, 0, 1, 1], [], []>} : vector<64x8xf32>, vector<8x32xf32>, vector<64x32xf32> -> vector<64x32xf32>
    %105 = arith.addf %60, %104 : vector<64x32xf32>
    %c0_78 = arith.constant 0 : index
    %c2_79 = arith.constant 2 : index
    %c0_80 = arith.constant 0 : index
    %c0_81 = arith.constant 0 : index
    %106 = vector.load %arg3[%c0_78, %c2_79, %c0_80, %c0_81] : memref<3x4x32x8xf32, #tpu.memory_space<vmem>>, vector<1x1x32x8xf32>
    %107 = vector.shape_cast %106 : vector<1x1x32x8xf32> to vector<32x8xf32>
    %cst_82 = arith.constant dense<0.000000e+00> : vector<64x8xf32>
    %108 = tpu.matmul %1, %107, %cst_82 {dimension_numbers = #tpu.dot_dimension_numbers<[1], [0], [0], [1], [0, 0, 1, 1], [], []>} : vector<64x32xf32>, vector<32x8xf32>, vector<64x8xf32> -> vector<64x8xf32>
    %c0_83 = arith.constant 0 : index
    %c2_84 = arith.constant 2 : index
    %c0_85 = arith.constant 0 : index
    %c0_86 = arith.constant 0 : index
    %109 = vector.load %arg4[%c0_83, %c2_84, %c0_85, %c0_86] : memref<3x4x1x8xf32, #tpu.memory_space<vmem>>, vector<1x1x1x8xf32>
    %110 = vector.shape_cast %109 : vector<1x1x1x8xf32> to vector<1x8xf32>
    %111 = vector.broadcast %110 : vector<1x8xf32> to vector<64x8xf32>
    %112 = arith.addf %108, %111 : vector<64x8xf32>
    %c1_87 = arith.constant 1 : index
    %c2_88 = arith.constant 2 : index
    %c0_89 = arith.constant 0 : index
    %c0_90 = arith.constant 0 : index
    %113 = vector.load %arg3[%c1_87, %c2_88, %c0_89, %c0_90] : memref<3x4x32x8xf32, #tpu.memory_space<vmem>>, vector<1x1x32x8xf32>
    %114 = vector.shape_cast %113 : vector<1x1x32x8xf32> to vector<32x8xf32>
    %cst_91 = arith.constant dense<0.000000e+00> : vector<64x8xf32>
    %115 = tpu.matmul %1, %114, %cst_91 {dimension_numbers = #tpu.dot_dimension_numbers<[1], [0], [0], [1], [0, 0, 1, 1], [], []>} : vector<64x32xf32>, vector<32x8xf32>, vector<64x8xf32> -> vector<64x8xf32>
    %c1_92 = arith.constant 1 : index
    %c2_93 = arith.constant 2 : index
    %c0_94 = arith.constant 0 : index
    %c0_95 = arith.constant 0 : index
    %116 = vector.load %arg4[%c1_92, %c2_93, %c0_94, %c0_95] : memref<3x4x1x8xf32, #tpu.memory_space<vmem>>, vector<1x1x1x8xf32>
    %117 = vector.shape_cast %116 : vector<1x1x1x8xf32> to vector<1x8xf32>
    %118 = vector.broadcast %117 : vector<1x8xf32> to vector<64x8xf32>
    %119 = arith.addf %115, %118 : vector<64x8xf32>
    %c2_96 = arith.constant 2 : index
    %c2_97 = arith.constant 2 : index
    %c0_98 = arith.constant 0 : index
    %c0_99 = arith.constant 0 : index
    %120 = vector.load %arg3[%c2_96, %c2_97, %c0_98, %c0_99] : memref<3x4x32x8xf32, #tpu.memory_space<vmem>>, vector<1x1x32x8xf32>
    %121 = vector.shape_cast %120 : vector<1x1x32x8xf32> to vector<32x8xf32>
    %cst_100 = arith.constant dense<0.000000e+00> : vector<64x8xf32>
    %122 = tpu.matmul %1, %121, %cst_100 {dimension_numbers = #tpu.dot_dimension_numbers<[1], [0], [0], [1], [0, 0, 1, 1], [], []>} : vector<64x32xf32>, vector<32x8xf32>, vector<64x8xf32> -> vector<64x8xf32>
    %c2_101 = arith.constant 2 : index
    %c2_102 = arith.constant 2 : index
    %c0_103 = arith.constant 0 : index
    %c0_104 = arith.constant 0 : index
    %123 = vector.load %arg4[%c2_101, %c2_102, %c0_103, %c0_104] : memref<3x4x1x8xf32, #tpu.memory_space<vmem>>, vector<1x1x1x8xf32>
    %124 = vector.shape_cast %123 : vector<1x1x1x8xf32> to vector<1x8xf32>
    %125 = vector.broadcast %124 : vector<1x8xf32> to vector<64x8xf32>
    %126 = arith.addf %122, %125 : vector<64x8xf32>
    %127 = vector.shape_cast %112 : vector<64x8xf32> to vector<8x8x8xf32>
    %128 = vector.shape_cast %119 : vector<64x8xf32> to vector<8x8x8xf32>
    %129 = vector.shape_cast %126 : vector<64x8xf32> to vector<8x8x8xf32>
    "tpu.trace_start"() <{level = 10 : i32, message = "bqd,bkd->bqk"}> : () -> ()
    %cst_105 = arith.constant dense<0.000000e+00> : vector<8x8x8xf32>
    %130 = tpu.matmul %127, %128, %cst_105 {dimension_numbers = #tpu.dot_dimension_numbers<[2], [2], [1], [1], [0, 0, 0, 1, 1, 1], [0], [0]>} : vector<8x8x8xf32>, vector<8x8x8xf32>, vector<8x8x8xf32> -> vector<8x8x8xf32>
    "tpu.trace_stop"() : () -> ()
    %cst_106 = arith.constant 0.353553385 : f32
    %131 = vector.broadcast %cst_106 : f32 to vector<8x8x8xf32>
    %132 = arith.mulf %130, %131 : vector<8x8x8xf32>
    %133 = vector.broadcast %7 : vector<8x1x8xf32> to vector<8x8x8xf32>
    %134 = arith.addf %132, %133 : vector<8x8x8xf32>
    %cst_107 = arith.constant dense<0xFF800000> : vector<8x8xf32>
    %135 = vector.multi_reduction <maximumf>, %134, %cst_107 [2] : vector<8x8x8xf32> to vector<8x8xf32>
    %136 = vector.shape_cast %135 : vector<8x8xf32> to vector<8x8x1xf32>
    %137 = vector.broadcast %136 : vector<8x8x1xf32> to vector<8x8x8xf32>
    %138 = arith.subf %134, %137 : vector<8x8x8xf32>
    %139 = math.exp %138 : vector<8x8x8xf32>
    %cst_108 = arith.constant dense<0.000000e+00> : vector<8x8xf32>
    %140 = vector.multi_reduction <add>, %139, %cst_108 [2] : vector<8x8x8xf32> to vector<8x8xf32>
    %141 = vector.shape_cast %140 : vector<8x8xf32> to vector<8x8x1xf32>
    %142 = tpu.reciprocal %141 {approx = true} : vector<8x8x1xf32> -> vector<8x8x1xf32>
    %143 = vector.broadcast %142 : vector<8x8x1xf32> to vector<8x8x8xf32>
    %144 = arith.mulf %139, %143 : vector<8x8x8xf32>
    "tpu.trace_start"() <{level = 10 : i32, message = "bqk,bkd->bqd"}> : () -> ()
    %cst_109 = arith.constant dense<0.000000e+00> : vector<8x8x8xf32>
    %145 = tpu.matmul %144, %129, %cst_109 {dimension_numbers = #tpu.dot_dimension_numbers<[2], [1], [1], [2], [0, 0, 0, 1, 1, 2], [0], [0]>} : vector<8x8x8xf32>, vector<8x8x8xf32>, vector<8x8x8xf32> -> vector<8x8x8xf32>
    "tpu.trace_stop"() : () -> ()
    %146 = vector.shape_cast %145 : vector<8x8x8xf32> to vector<64x8xf32>
    %c2_110 = arith.constant 2 : index
    %c0_111 = arith.constant 0 : index
    %c0_112 = arith.constant 0 : index
    %147 = vector.load %arg5[%c2_110, %c0_111, %c0_112] : memref<4x8x32xf32, #tpu.memory_space<vmem>>, vector<1x8x32xf32>
    %148 = vector.shape_cast %147 : vector<1x8x32xf32> to vector<8x32xf32>
    %cst_113 = arith.constant dense<0.000000e+00> : vector<64x32xf32>
    %149 = tpu.matmul %146, %148, %cst_113 {dimension_numbers = #tpu.dot_dimension_numbers<[1], [0], [0], [1], [0, 0, 1, 1], [], []>} : vector<64x8xf32>, vector<8x32xf32>, vector<64x32xf32> -> vector<64x32xf32>
    %150 = arith.addf %105, %149 : vector<64x32xf32>
    %c0_114 = arith.constant 0 : index
    %c3 = arith.constant 3 : index
    %c0_115 = arith.constant 0 : index
    %c0_116 = arith.constant 0 : index
    %151 = vector.load %arg3[%c0_114, %c3, %c0_115, %c0_116] : memref<3x4x32x8xf32, #tpu.memory_space<vmem>>, vector<1x1x32x8xf32>
    %152 = vector.shape_cast %151 : vector<1x1x32x8xf32> to vector<32x8xf32>
    %cst_117 = arith.constant dense<0.000000e+00> : vector<64x8xf32>
    %153 = tpu.matmul %1, %152, %cst_117 {dimension_numbers = #tpu.dot_dimension_numbers<[1], [0], [0], [1], [0, 0, 1, 1], [], []>} : vector<64x32xf32>, vector<32x8xf32>, vector<64x8xf32> -> vector<64x8xf32>
    %c0_118 = arith.constant 0 : index
    %c3_119 = arith.constant 3 : index
    %c0_120 = arith.constant 0 : index
    %c0_121 = arith.constant 0 : index
    %154 = vector.load %arg4[%c0_118, %c3_119, %c0_120, %c0_121] : memref<3x4x1x8xf32, #tpu.memory_space<vmem>>, vector<1x1x1x8xf32>
    %155 = vector.shape_cast %154 : vector<1x1x1x8xf32> to vector<1x8xf32>
    %156 = vector.broadcast %155 : vector<1x8xf32> to vector<64x8xf32>
    %157 = arith.addf %153, %156 : vector<64x8xf32>
    %c1_122 = arith.constant 1 : index
    %c3_123 = arith.constant 3 : index
    %c0_124 = arith.constant 0 : index
    %c0_125 = arith.constant 0 : index
    %158 = vector.load %arg3[%c1_122, %c3_123, %c0_124, %c0_125] : memref<3x4x32x8xf32, #tpu.memory_space<vmem>>, vector<1x1x32x8xf32>
    %159 = vector.shape_cast %158 : vector<1x1x32x8xf32> to vector<32x8xf32>
    %cst_126 = arith.constant dense<0.000000e+00> : vector<64x8xf32>
    %160 = tpu.matmul %1, %159, %cst_126 {dimension_numbers = #tpu.dot_dimension_numbers<[1], [0], [0], [1], [0, 0, 1, 1], [], []>} : vector<64x32xf32>, vector<32x8xf32>, vector<64x8xf32> -> vector<64x8xf32>
    %c1_127 = arith.constant 1 : index
    %c3_128 = arith.constant 3 : index
    %c0_129 = arith.constant 0 : index
    %c0_130 = arith.constant 0 : index
    %161 = vector.load %arg4[%c1_127, %c3_128, %c0_129, %c0_130] : memref<3x4x1x8xf32, #tpu.memory_space<vmem>>, vector<1x1x1x8xf32>
    %162 = vector.shape_cast %161 : vector<1x1x1x8xf32> to vector<1x8xf32>
    %163 = vector.broadcast %162 : vector<1x8xf32> to vector<64x8xf32>
    %164 = arith.addf %160, %163 : vector<64x8xf32>
    %c2_131 = arith.constant 2 : index
    %c3_132 = arith.constant 3 : index
    %c0_133 = arith.constant 0 : index
    %c0_134 = arith.constant 0 : index
    %165 = vector.load %arg3[%c2_131, %c3_132, %c0_133, %c0_134] : memref<3x4x32x8xf32, #tpu.memory_space<vmem>>, vector<1x1x32x8xf32>
    %166 = vector.shape_cast %165 : vector<1x1x32x8xf32> to vector<32x8xf32>
    %cst_135 = arith.constant dense<0.000000e+00> : vector<64x8xf32>
    %167 = tpu.matmul %1, %166, %cst_135 {dimension_numbers = #tpu.dot_dimension_numbers<[1], [0], [0], [1], [0, 0, 1, 1], [], []>} : vector<64x32xf32>, vector<32x8xf32>, vector<64x8xf32> -> vector<64x8xf32>
    %c2_136 = arith.constant 2 : index
    %c3_137 = arith.constant 3 : index
    %c0_138 = arith.constant 0 : index
    %c0_139 = arith.constant 0 : index
    %168 = vector.load %arg4[%c2_136, %c3_137, %c0_138, %c0_139] : memref<3x4x1x8xf32, #tpu.memory_space<vmem>>, vector<1x1x1x8xf32>
    %169 = vector.shape_cast %168 : vector<1x1x1x8xf32> to vector<1x8xf32>
    %170 = vector.broadcast %169 : vector<1x8xf32> to vector<64x8xf32>
    %171 = arith.addf %167, %170 : vector<64x8xf32>
    %172 = vector.shape_cast %157 : vector<64x8xf32> to vector<8x8x8xf32>
    %173 = vector.shape_cast %164 : vector<64x8xf32> to vector<8x8x8xf32>
    %174 = vector.shape_cast %171 : vector<64x8xf32> to vector<8x8x8xf32>
    "tpu.trace_start"() <{level = 10 : i32, message = "bqd,bkd->bqk"}> : () -> ()
    %cst_140 = arith.constant dense<0.000000e+00> : vector<8x8x8xf32>
    %175 = tpu.matmul %172, %173, %cst_140 {dimension_numbers = #tpu.dot_dimension_numbers<[2], [2], [1], [1], [0, 0, 0, 1, 1, 1], [0], [0]>} : vector<8x8x8xf32>, vector<8x8x8xf32>, vector<8x8x8xf32> -> vector<8x8x8xf32>
    "tpu.trace_stop"() : () -> ()
    %cst_141 = arith.constant 0.353553385 : f32
    %176 = vector.broadcast %cst_141 : f32 to vector<8x8x8xf32>
    %177 = arith.mulf %175, %176 : vector<8x8x8xf32>
    %178 = vector.broadcast %7 : vector<8x1x8xf32> to vector<8x8x8xf32>
    %179 = arith.addf %177, %178 : vector<8x8x8xf32>
    %cst_142 = arith.constant dense<0xFF800000> : vector<8x8xf32>
    %180 = vector.multi_reduction <maximumf>, %179, %cst_142 [2] : vector<8x8x8xf32> to vector<8x8xf32>
    %181 = vector.shape_cast %180 : vector<8x8xf32> to vector<8x8x1xf32>
    %182 = vector.broadcast %181 : vector<8x8x1xf32> to vector<8x8x8xf32>
    %183 = arith.subf %179, %182 : vector<8x8x8xf32>
    %184 = math.exp %183 : vector<8x8x8xf32>
    %cst_143 = arith.constant dense<0.000000e+00> : vector<8x8xf32>
    %185 = vector.multi_reduction <add>, %184, %cst_143 [2] : vector<8x8x8xf32> to vector<8x8xf32>
    %186 = vector.shape_cast %185 : vector<8x8xf32> to vector<8x8x1xf32>
    %187 = tpu.reciprocal %186 {approx = true} : vector<8x8x1xf32> -> vector<8x8x1xf32>
    %188 = vector.broadcast %187 : vector<8x8x1xf32> to vector<8x8x8xf32>
    %189 = arith.mulf %184, %188 : vector<8x8x8xf32>
    "tpu.trace_start"() <{level = 10 : i32, message = "bqk,bkd->bqd"}> : () -> ()
    %cst_144 = arith.constant dense<0.000000e+00> : vector<8x8x8xf32>
    %190 = tpu.matmul %189, %174, %cst_144 {dimension_numbers = #tpu.dot_dimension_numbers<[2], [1], [1], [2], [0, 0, 0, 1, 1, 2], [0], [0]>} : vector<8x8x8xf32>, vector<8x8x8xf32>, vector<8x8x8xf32> -> vector<8x8x8xf32>
    "tpu.trace_stop"() : () -> ()
    %191 = vector.shape_cast %190 : vector<8x8x8xf32> to vector<64x8xf32>
    %c3_145 = arith.constant 3 : index
    %c0_146 = arith.constant 0 : index
    %c0_147 = arith.constant 0 : index
    %192 = vector.load %arg5[%c3_145, %c0_146, %c0_147] : memref<4x8x32xf32, #tpu.memory_space<vmem>>, vector<1x8x32xf32>
    %193 = vector.shape_cast %192 : vector<1x8x32xf32> to vector<8x32xf32>
    %cst_148 = arith.constant dense<0.000000e+00> : vector<64x32xf32>
    %194 = tpu.matmul %191, %193, %cst_148 {dimension_numbers = #tpu.dot_dimension_numbers<[1], [0], [0], [1], [0, 0, 1, 1], [], []>} : vector<64x8xf32>, vector<8x32xf32>, vector<64x32xf32> -> vector<64x32xf32>
    %195 = arith.addf %150, %194 : vector<64x32xf32>
    %196 = vector.broadcast %9 : vector<1x32xf32> to vector<64x32xf32>
    %197 = arith.addf %195, %196 : vector<64x32xf32>
    %198 = arith.addf %1, %197 : vector<64x32xf32>
    %cst_149 = arith.constant dense<0.000000e+00> : vector<64xf32>
    %199 = vector.multi_reduction <add>, %198, %cst_149 [1] : vector<64x32xf32> to vector<64xf32>
    %200 = vector.shape_cast %199 : vector<64xf32> to vector<64x1xf32>
    %cst_150 = arith.constant 3.200000e+01 : f32
    %201 = vector.broadcast %cst_150 : f32 to vector<64x1xf32>
    %202 = arith.divf %200, %201 : vector<64x1xf32>
    %203 = vector.broadcast %202 : vector<64x1xf32> to vector<64x32xf32>
    %204 = arith.subf %198, %203 : vector<64x32xf32>
    %205 = arith.mulf %204, %204 : vector<64x32xf32>
    %cst_151 = arith.constant dense<0.000000e+00> : vector<64xf32>
    %206 = vector.multi_reduction <add>, %205, %cst_151 [1] : vector<64x32xf32> to vector<64xf32>
    %207 = vector.shape_cast %206 : vector<64xf32> to vector<64x1xf32>
    %cst_152 = arith.constant 3.200000e+01 : f32
    %208 = vector.broadcast %cst_152 : f32 to vector<64x1xf32>
    %209 = arith.divf %207, %208 : vector<64x1xf32>
    %210 = vector.broadcast %202 : vector<64x1xf32> to vector<64x32xf32>
    %211 = arith.subf %198, %210 : vector<64x32xf32>
    %cst_153 = arith.constant 9.99999996E-13 : f32
    %212 = vector.broadcast %cst_153 : f32 to vector<64x1xf32>
    %213 = arith.addf %209, %212 : vector<64x1xf32>
    %214 = math.rsqrt %213 : vector<64x1xf32>
    %215 = vector.broadcast %214 : vector<64x1xf32> to vector<64x32xf32>
    %216 = arith.mulf %211, %215 : vector<64x32xf32>
    %217 = vector.broadcast %10 : vector<1x32xf32> to vector<64x32xf32>
    %218 = arith.mulf %216, %217 : vector<64x32xf32>
    %219 = vector.broadcast %11 : vector<1x32xf32> to vector<64x32xf32>
    %220 = arith.addf %218, %219 : vector<64x32xf32>
    %c0_154 = arith.constant 0 : index
    %c0_155 = arith.constant 0 : index
    %221 = vector.load %arg6[%c0_154, %c0_155] : memref<32x64xf32, #tpu.memory_space<vmem>>, vector<32x64xf32>
    %cst_156 = arith.constant dense<0.000000e+00> : vector<64x64xf32>
    %222 = tpu.matmul %220, %221, %cst_156 {dimension_numbers = #tpu.dot_dimension_numbers<[1], [0], [0], [1], [0, 0, 1, 1], [], []>} : vector<64x32xf32>, vector<32x64xf32>, vector<64x64xf32> -> vector<64x64xf32>
    %c0_157 = arith.constant 0 : index
    %c0_158 = arith.constant 0 : index
    %223 = vector.load %arg9[%c0_157, %c0_158] : memref<1x64xf32, #tpu.memory_space<vmem>>, vector<1x64xf32>
    %224 = vector.broadcast %223 : vector<1x64xf32> to vector<64x64xf32>
    %225 = arith.addf %222, %224 : vector<64x64xf32>
    %226 = arith.mulf %225, %225 : vector<64x64xf32>
    %227 = arith.mulf %225, %226 : vector<64x64xf32>
    %cst_159 = arith.constant 4.471500e-02 : f32
    %228 = vector.broadcast %cst_159 : f32 to vector<64x64xf32>
    %229 = arith.mulf %228, %227 : vector<64x64xf32>
    %230 = arith.addf %225, %229 : vector<64x64xf32>
    %cst_160 = arith.constant 0.797884583 : f32
    %231 = vector.broadcast %cst_160 : f32 to vector<64x64xf32>
    %232 = arith.mulf %231, %230 : vector<64x64xf32>
    %233 = math.tanh %232 : vector<64x64xf32>
    %cst_161 = arith.constant 1.000000e+00 : f32
    %234 = vector.broadcast %cst_161 : f32 to vector<64x64xf32>
    %235 = arith.addf %234, %233 : vector<64x64xf32>
    %cst_162 = arith.constant 5.000000e-01 : f32
    %236 = vector.broadcast %cst_162 : f32 to vector<64x64xf32>
    %237 = arith.mulf %236, %235 : vector<64x64xf32>
    %238 = arith.mulf %225, %237 : vector<64x64xf32>
    %c0_163 = arith.constant 0 : index
    %c0_164 = arith.constant 0 : index
    %239 = vector.load %arg7[%c0_163, %c0_164] : memref<64x32xf32, #tpu.memory_space<vmem>>, vector<64x32xf32>
    %cst_165 = arith.constant dense<0.000000e+00> : vector<64x32xf32>
    %240 = tpu.matmul %238, %239, %cst_165 {dimension_numbers = #tpu.dot_dimension_numbers<[1], [0], [0], [1], [0, 0, 1, 1], [], []>} : vector<64x64xf32>, vector<64x32xf32>, vector<64x32xf32> -> vector<64x32xf32>
    %241 = vector.broadcast %12 : vector<1x32xf32> to vector<64x32xf32>
    %242 = arith.addf %240, %241 : vector<64x32xf32>
    %243 = arith.addf %220, %242 : vector<64x32xf32>
    %cst_166 = arith.constant dense<0.000000e+00> : vector<64xf32>
    %244 = vector.multi_reduction <add>, %243, %cst_166 [1] : vector<64x32xf32> to vector<64xf32>
    %245 = vector.shape_cast %244 : vector<64xf32> to vector<64x1xf32>
    %cst_167 = arith.constant 3.200000e+01 : f32
    %246 = vector.broadcast %cst_167 : f32 to vector<64x1xf32>
    %247 = arith.divf %245, %246 : vector<64x1xf32>
    %248 = vector.broadcast %247 : vector<64x1xf32> to vector<64x32xf32>
    %249 = arith.subf %243, %248 : vector<64x32xf32>
    %250 = arith.mulf %249, %249 : vector<64x32xf32>
    %cst_168 = arith.constant dense<0.000000e+00> : vector<64xf32>
    %251 = vector.multi_reduction <add>, %250, %cst_168 [1] : vector<64x32xf32> to vector<64xf32>
    %252 = vector.shape_cast %251 : vector<64xf32> to vector<64x1xf32>
    %cst_169 = arith.constant 3.200000e+01 : f32
    %253 = vector.broadcast %cst_169 : f32 to vector<64x1xf32>
    %254 = arith.divf %252, %253 : vector<64x1xf32>
    %255 = vector.broadcast %247 : vector<64x1xf32> to vector<64x32xf32>
    %256 = arith.subf %243, %255 : vector<64x32xf32>
    %cst_170 = arith.constant 9.99999996E-13 : f32
    %257 = vector.broadcast %cst_170 : f32 to vector<64x1xf32>
    %258 = arith.addf %254, %257 : vector<64x1xf32>
    %259 = math.rsqrt %258 : vector<64x1xf32>
    %260 = vector.broadcast %259 : vector<64x1xf32> to vector<64x32xf32>
    %261 = arith.mulf %256, %260 : vector<64x32xf32>
    %262 = vector.broadcast %13 : vector<1x32xf32> to vector<64x32xf32>
    %263 = arith.mulf %261, %262 : vector<64x32xf32>
    %264 = vector.broadcast %14 : vector<1x32xf32> to vector<64x32xf32>
    %265 = arith.addf %263, %264 : vector<64x32xf32>
    %266 = vector.shape_cast %265 : vector<64x32xf32> to vector<8x8x32xf32>
    %267 = vector.shape_cast %2 : vector<8x8xf32> to vector<8x8x1xf32>
    %268 = vector.broadcast %267 : vector<8x8x1xf32> to vector<8x8x32xf32>
    %269 = arith.mulf %266, %268 : vector<8x8x32xf32>
    %cst_171 = arith.constant dense<0.000000e+00> : vector<8x32xf32>
    %270 = vector.multi_reduction <add>, %269, %cst_171 [1] : vector<8x8x32xf32> to vector<8x32xf32>
    %cst_172 = arith.constant dense<0.000000e+00> : vector<8xf32>
    %271 = vector.multi_reduction <add>, %2, %cst_172 [1] : vector<8x8xf32> to vector<8xf32>
    %272 = vector.shape_cast %271 : vector<8xf32> to vector<8x1xf32>
    %cst_173 = arith.constant 9.99999971E-10 : f32
    %273 = vector.broadcast %cst_173 : f32 to vector<8x1xf32>
    %274 = arith.maximumf %272, %273 : vector<8x1xf32>
    %275 = tpu.reciprocal %274 {approx = true} : vector<8x1xf32> -> vector<8x1xf32>
    %276 = vector.broadcast %275 : vector<8x1xf32> to vector<8x32xf32>
    %277 = arith.mulf %270, %276 : vector<8x32xf32>
    %278 = arith.mulf %277, %277 : vector<8x32xf32>
    %cst_174 = arith.constant dense<0.000000e+00> : vector<8xf32>
    %279 = vector.multi_reduction <add>, %278, %cst_174 [1] : vector<8x32xf32> to vector<8xf32>
    %280 = vector.shape_cast %279 : vector<8xf32> to vector<8x1xf32>
    %cst_175 = arith.constant 9.99999996E-13 : f32
    %281 = vector.broadcast %cst_175 : f32 to vector<8x1xf32>
    %282 = arith.maximumf %280, %281 : vector<8x1xf32>
    %283 = math.rsqrt %282 : vector<8x1xf32>
    %284 = vector.broadcast %283 : vector<8x1xf32> to vector<8x32xf32>
    %285 = arith.mulf %277, %284 : vector<8x32xf32>
    %c0_176 = arith.constant 0 : index
    %c0_177 = arith.constant 0 : index
    %286 = vector.load %arg10[%c0_176, %c0_177] : memref<8x32xf32, #tpu.memory_space<vmem>>, vector<8x32xf32>
    tpu.vector_store %arg10[%c0_176, %c0_177], %285 {strides = array<i32>} : memref<8x32xf32, #tpu.memory_space<vmem>>, vector<8x32xf32>,
    return
  }
  func.func @transform_0(%arg0: i32) -> (i32, i32, i32) {
    %c0_i32 = arith.constant 0 : i32
    %c0_i32_0 = arith.constant 0 : i32
    %c0_i32_1 = arith.constant 0 : i32
    return %arg0, %c0_i32, %c0_i32_0 : i32, i32, i32
  }
  func.func @transform_1(%arg0: i32) -> (i32, i32) {
    %c0_i32 = arith.constant 0 : i32
    %c0_i32_0 = arith.constant 0 : i32
    return %arg0, %c0_i32 : i32, i32
  }
  func.func @transform_2(%arg0: i32) -> (i32, i32, i32, i32) {
    %c0_i32 = arith.constant 0 : i32
    %c0_i32_0 = arith.constant 0 : i32
    %c0_i32_1 = arith.constant 0 : i32
    %c0_i32_2 = arith.constant 0 : i32
    %c0_i32_3 = arith.constant 0 : i32
    return %c0_i32, %c0_i32_0, %c0_i32_1, %c0_i32_2 : i32, i32, i32, i32
  }
  func.func @transform_3(%arg0: i32) -> (i32, i32, i32, i32) {
    %c0_i32 = arith.constant 0 : i32
    %c0_i32_0 = arith.constant 0 : i32
    %c0_i32_1 = arith.constant 0 : i32
    %c0_i32_2 = arith.constant 0 : i32
    %c0_i32_3 = arith.constant 0 : i32
    return %c0_i32, %c0_i32_0, %c0_i32_1, %c0_i32_2 : i32, i32, i32, i32
  }
  func.func @transform_4(%arg0: i32) -> (i32, i32, i32) {
    %c0_i32 = arith.constant 0 : i32
    %c0_i32_0 = arith.constant 0 : i32
    %c0_i32_1 = arith.constant 0 : i32
    %c0_i32_2 = arith.constant 0 : i32
    return %c0_i32, %c0_i32_0, %c0_i32_1 : i32, i32, i32
  }
  func.func @transform_5(%arg0: i32) -> (i32, i32) {
    %c0_i32 = arith.constant 0 : i32
    %c0_i32_0 = arith.constant 0 : i32
    %c0_i32_1 = arith.constant 0 : i32
    return %c0_i32, %c0_i32_0 : i32, i32
  }
  func.func @transform_6(%arg0: i32) -> (i32, i32) {
    %c0_i32 = arith.constant 0 : i32
    %c0_i32_0 = arith.constant 0 : i32
    %c0_i32_1 = arith.constant 0 : i32
    return %c0_i32, %c0_i32_0 : i32, i32
  }
  func.func @transform_7(%arg0: i32) -> (i32, i32) {
    %c0_i32 = arith.constant 0 : i32
    %c0_i32_0 = arith.constant 0 : i32
    %c0_i32_1 = arith.constant 0 : i32
    return %c0_i32, %c0_i32_0 : i32, i32
  }
  func.func @transform_8(%arg0: i32) -> (i32, i32) {
    %c0_i32 = arith.constant 0 : i32
    %c0_i32_0 = arith.constant 0 : i32
    %c0_i32_1 = arith.constant 0 : i32
    return %c0_i32, %c0_i32_0 : i32, i32
  }
  func.func @transform_9(%arg0: i32) -> (i32, i32) {
    %c0_i32 = arith.constant 0 : i32
    %c0_i32_0 = arith.constant 0 : i32
    return %arg0, %c0_i32 : i32, i32
  }
}

</mosaic_0001>

<bundles_post_ra>
// kernel: tpu_custom_call.1
= control target key start
LH: loop header
LB: loop body
LE: loop exit
PB: predicated region body
PF: predicated region fallthrough
CT: control target
= control target key end

     0   :  { %vm106_vm0 = vcmask 261120   ;;  %s11305_s0 = inlined_call_operand.vmem [shape: f32[8,8,32], index: 0, kind: input, shape index: {}]   ;;  %s11306_s1 = inlined_call_operand.vmem [shape: f32[8,8], index: 1, kind: input, shape index: {}]   ;;  %s11307_s2 = inlined_call_operand.vmem [shape: f32[3,4,32,8], index: 2, kind: input, shape index: {}]   ;;  %s11308_s3 = inlined_call_operand.vmem [shape: f32[3,4,1,8], index: 3, kind: input, shape index: {}]   ;;  %s11309_s4 = inlined_call_operand.vmem [shape: f32[4,8,32], index: 4, kind: input, shape index: {}]   ;;  %s11310_s5 = inlined_call_operand.vmem [shape: f32[32,64], index: 5, kind: input, shape index: {}]   ;;  %s11311_s6 = inlined_call_operand.vmem [shape: f32[64,32], index: 6, kind: input, shape index: {}]   ;;  %s11312_s7 = inlined_call_operand.vmem [shape: f32[6,32], index: 7, kind: input, shape index: {}]   ;;  %s11313_s8 = inlined_call_operand.vmem [shape: f32[1,64], index: 8, kind: input, shape index: {}]   ;;  %s11314_s9 = inlined_call_operand.hbm [shape: f32[8,32], index: 9, kind: output, shape index: {}]  }
   0x1   :  { %v8203_v0 = vld [vmem:[%s11307_s2 + $0x98] sm:$0xff]  ;;  %v8202_v2 = vld [vmem:[%s11307_s2 + $0x90] sm:$0xff]  ;;  %v8201_v4 = vld [vmem:[%s11307_s2 + $0x88] sm:$0xff] }
   0x2   :  { %v98_v1 = vld [vmem:[%s11307_s2 + $0x18] sm:$0xff]  ;;  %8858 = vmatprep.subr.mxu1 %v8203_v0  ;;  %v97_v3 = vld [vmem:[%s11307_s2 + $0x10] sm:$0xff]  ;;  %v96_v5 = vld [vmem:[%s11307_s2 + $0x8] sm:$0xff] }
   0x3   :  { %8838 = vmatprep.subr.mxu0 %v98_v1  ;;  %8859 = vmatpush3.msra.mxu1 %v8203_v0  ;;  %v8200_v6 = vld [vmem:[%s11307_s2 + $0x80] sm:$0xff] }
   0x4   :  { %8839 = vmatpush3.msra.mxu0 %v98_v1  ;;  %8860 = vmatprep.subr.mxu1 %v8202_v2  ;;  %v95_v7 = vld [vmem:[%s11307_s2] sm:$0xff] }
   0x5   :  { %8840 = vmatprep.subr.mxu0 %v97_v3  ;;  %8861 = vmatpush3.msra.mxu1 %v8202_v2  ;;  %v9806_v8 = vld [vmem:[%s11305_s0] sm:$0xff] }
   0x6   :  { %8841 = vmatpush3.msra.mxu0 %v97_v3  ;;  %8862 = vmatprep.subr.mxu1 %v8201_v4 }
   0x7   :  { %8842 = vmatprep.subr.mxu0 %v96_v5  ;;  %8863 = vmatpush3.msra.mxu1 %v8201_v4 }
   0x8   :  { %8843 = vmatpush3.msra.mxu0 %v96_v5 }
   0x9   :  { %14 = vsyncpa [#allocation3], 0  ;;  %8864 = vmatprep.subr.mxu1 %v8200_v6  ;;  %8844 = vmatprep.subr.mxu0 %v95_v7  ;;  %v9811_v9 = vld [vmem:[%s11305_s0 + $0x8] sm:$0xff]  ;;  %v9818_v10 = vld [vmem:[%s11305_s0 + $0x10] sm:$0xff]  ;;  %v11315_v20 = vmov 0.0   ;;  %vm9726_vm1 = vmmov 0  }
   0xa   :  { %8865 = vmatpush3.msra.mxu1 %v8200_v6  ;;  %8866 = vmatprep.mubr.msk.f32.mxu1 %vm106_vm0, %v9806_v8  ;;  %v8217_v11 = vld [vmem:[%s11307_s2 + $0x118] sm:$0xff]  ;;  %v9841_v13 = vld [vmem:[%s11305_s0 + $0x20] sm:$0xff]  ;;  %v8216_v14 = vld [vmem:[%s11307_s2 + $0x110] sm:$0xff]  ;;  %vm472_vm2 = vcmask 64512   ;;  %v9727_v4 = vmov 1966171168   ;;  %v49_v6 = vlaneseq }
   0xb   :  { %8845 = vmatpush3.msra.mxu0 %v95_v7  ;;  %8846 = vmatprep.mubr.msk.f32.mxu0 %vm106_vm0, %v9806_v8  ;;  %v9836_v12 = vld [vmem:[%s11305_s0 + $0x18] sm:$0xff]  ;;  %v9855_v15 = vld [vmem:[%s11305_s0 + $0x28] sm:$0xff]  ;;  %v9862_v16 = vld [vmem:[%s11305_s0 + $0x30] sm:$0xff]  ;;  %v47_v5 = vunpack.c.l.s4 %v9727_v4  ;;  %vm7671_vm3 = vcmask 523264   ;;  %vm8103_vm4 = vcmask 1041409   ;;  %vm8106_vm5 = vcmask 1042434  }
   0xc   :  { %8867 = vmatmul.mubr.msk.f32.vlgmr.msra.gmra.mxu1 %vm106_vm0, %v9811_v9  ;;  %8847 = vmatmul.mubr.msk.f32.vlgmr.msra.gmra.mxu0 %vm106_vm0, %v9811_v9  ;;  %v8215_v17 = vld [vmem:[%s11307_s2 + $0x108] sm:$0xff]  ;;  %v9876_v18 = vld [vmem:[%s11305_s0 + $0x38] sm:$0xff]  ;;  %v8214_v19 = vld [vmem:[%s11307_s2 + $0x100] sm:$0xff]  ;;  %vm8109_vm6 = vcmask 1043459   ;;  %vm8112_vm7 = vcmask 1044484   ;;  %vm8115_vm8 = vcmask 1045509  }
   0xd   :  { %8869 = vmatprep.mubr.msk.f32.mxu1 %vm106_vm0, %v9818_v10  ;;  %8849 = vmatprep.mubr.msk.f32.mxu0 %vm106_vm0, %v9818_v10  ;;  %v8205_v21 = vld [vmem:[%s11308_s3 + $0x4] ss:$0 sm:$0xff]  ;;  %v8191_v22 = vld [vmem:[%s11308_s3] ss:$0 sm:$0xff]  ;;  %v9938_v53 = vld [vmem:[%s11308_s3 + $0x8] ss:$0 sm:$0xff] }
   0xe   :  { %8878 = vmatprep.subr.mxu0 %v8217_v11  ;;  %8903 = vmatprep.subr.mxu1 %v11315_v20  ;;  %v41_v7 = vld [vmem:[%s11306_s1] sm:$0xff]  ;;  %vm8118_vm9 = vcmask 1046534   ;;  %vm8121_vm10 = vcmask 1047559  }
   0xf   :  { %8879 = vmatpush3.msra.mxu0 %v8217_v11  ;;  %v42_v11 = vsub.f32 1.0, %v41_v7 }
  0x10   :  { %8870 = vmatmul.mubr.msk.f32.gmra.mxu1 %vm106_vm0, %v9836_v12  ;;  %8850 = vmatmul.mubr.msk.f32.gmra.mxu0 %vm106_vm0, %v9836_v12 }
  0x11   :  { %8872 = vmatprep.mubr.msk.f32.mxu1 %vm106_vm0, %v9841_v13  ;;  %8852 = vmatprep.mubr.msk.f32.mxu0 %vm106_vm0, %v9841_v13 }
  0x12   :  { %8880 = vmatprep.subr.mxu0 %v8216_v14 }
  0x13   :  { %8881 = vmatpush3.msra.mxu0 %v8216_v14  ;;  %v48_v14 = vunpack.c.0.s8 %v47_v5 }
  0x14   :  { %8873 = vmatmul.mubr.msk.f32.gmra.mxu1 %vm106_vm0, %v9855_v15  ;;  %8853 = vmatmul.mubr.msk.f32.gmra.mxu0 %vm106_vm0, %v9855_v15 }
  0x15   :  { %8875 = vmatprep.mubr.msk.f32.mxu1 %vm106_vm0, %v9862_v16  ;;  %8855 = vmatprep.mubr.msk.f32.mxu0 %vm106_vm0, %v9862_v16 }
  0x16   :  { %8882 = vmatprep.subr.mxu0 %v8215_v17 }
  0x17   :  { %8883 = vmatpush3.msra.mxu0 %v8215_v17  ;;  %v9980_v17 = vshrl.u32 %v49_v6, 7 }
  0x18   :  { %8876 = vmatmul.mubr.msk.f32.gmra.mxu1 %vm106_vm0, %v9876_v18  ;;  %8856 = vmatmul.mubr.msk.f32.gmra.mxu0 %vm106_vm0, %v9876_v18 }
  0x19   :  { %8884 = vmatprep.subr.mxu0 %v8214_v19  ;;  %8886 = vmatprep.mubr.msk.f32.mxu0 %vm106_vm0, %v9806_v8  ;;  %11321 = vst [vmem:[#allocation5_spill] sm:$0xff] %v9980_v17 }
  0x1a   :  { %8885 = vmatpush3.msra.mxu0 %v8214_v19  ;;  %8905 = vmatprep.mubr.msk.f32.mxu1 %vm9726_vm1, %v11315_v20  ;;  %v43_v19 = vmul.f32 -1e+09, %v42_v11 }
  0x1b   :  { %8898 = vmatprep.subr.mxu0 %v11315_v20 }
  0x1c   :  { %8887 = vmatmul.mubr.msk.f32.vlgmr.msra.gmra.mxu0 %vm106_vm0, %v9811_v9 }
  0x1d   :  { %8889 = vmatprep.mubr.msk.f32.mxu0 %vm106_vm0, %v9818_v10 }
  0x20   :  { %8890 = vmatmul.mubr.msk.f32.gmra.mxu0 %vm106_vm0, %v9836_v12 }
  0x21   :  { %8892 = vmatprep.mubr.msk.f32.mxu0 %vm106_vm0, %v9841_v13 }
  0x24   :  { %8893 = vmatmul.mubr.msk.f32.gmra.mxu0 %vm106_vm0, %v9855_v15 }
  0x25   :  { %8895 = vmatprep.mubr.msk.f32.mxu0 %vm106_vm0, %v9862_v16 }
  0x28   :  { %8896 = vmatmul.mubr.msk.f32.gmra.mxu0 %vm106_vm0, %v9876_v18 }
  0x29   :  { %8900 = vmatprep.mubr.msk.f32.mxu0 %vm9726_vm1, %v11315_v20 }
  0xcc   :  { %v8868_v23 = vpop.f32.mrf.mxu1  ;;  %v8848_v24 = vpop.f32.mrf.mxu0 }
  0xcd   :  { %v321_v25 = vadd.f32 %v8868_v23, %v8205_v21  ;;  %v203_v26 = vadd.f32 %v8848_v24, %v8191_v22 }
  0xce   :  { %v315_v27 = vpop.f32.mrf.mxu1  ;;  %v197_v28 = vpop.f32.mrf.mxu0 }
  0xcf   :  { %v316_v29 = vadd.f32 %v8205_v21, %v315_v27  ;;  %8904 = vmatpush3.xpose.msk.msra.mxu1 %vm472_vm2, %v321_v25  ;;  %v198_v32 = vadd.f32 %v8191_v22, %v197_v28  ;;  %v9984_v25 = vsub.s32 0, %v9980_v17  ;;  %v45_v27 = vcombine.high %v43_v19, %v43_v19 }
  0xd0   :  { %v8871_v30 = vpop.f32.mrf.mxu1  ;;  %v8851_v31 = vpop.f32.mrf.mxu0  ;;  %8908 = vmatprep.subr.mxu1 %v11315_v20 }
  0xd1   :  { %8899 = vmatpush3.xpose.msk.msra.mxu0 %vm472_vm2, %v316_v29  ;;  %v331_v41 = vadd.f32 %v8871_v30, %v8205_v21  ;;  %v213_v47 = vadd.f32 %v8851_v31, %v8191_v22  ;;  %11322 = vst [vmem:[#allocation6_spill] sm:$0xff] %v9984_v25 }
  0xd2   :  { %v325_v33 = vpop.f32.mrf.mxu1  ;;  %8906 = vmatmul.mubr.msk.f32.vlgmr.msra.gmra.mxu1 %vm472_vm2, %v203_v26  ;;  %v207_v34 = vpop.f32.mrf.mxu0  ;;  %8918 = vmatprep.subr.mxu0 %v11315_v20 }
  0xd3   :  { %v326_v35 = vadd.f32 %v8205_v21, %v325_v33  ;;  %8910 = vmatprep.mubr.msk.f32.mxu1 %vm9726_vm1, %v11315_v20  ;;  %v208_v38 = vadd.f32 %v8191_v22, %v207_v34 }
  0xd4   :  { %8901 = vmatmul.mubr.msk.f32.vlgmr.msra.gmra.mxu0 %vm472_vm2, %v198_v32  ;;  %v8874_v36 = vpop.f32.mrf.mxu1  ;;  %v8854_v37 = vpop.f32.mrf.mxu0 }
  0xd5   :  { %8909 = vmatpush3.xpose.msk.msra.mxu1 %vm472_vm2, %v326_v35  ;;  %8920 = vmatprep.mubr.msk.f32.mxu0 %vm9726_vm1, %v11315_v20  ;;  %v341_v45 = vadd.f32 %v8874_v36, %v8205_v21  ;;  %v223_v51 = vadd.f32 %v8854_v37, %v8191_v22 }
  0xd6   :  { %8913 = vmatprep.subr.mxu1 %v11315_v20  ;;  %v335_v39 = vpop.f32.mrf.mxu1  ;;  %v217_v40 = vpop.f32.mrf.mxu0 }
  0xd7   :  { %v336_v42 = vadd.f32 %v8205_v21, %v335_v39  ;;  %v218_v46 = vadd.f32 %v8191_v22, %v217_v40 }
  0xd8   :  { %8911 = vmatmul.mubr.msk.f32.vlgmr.msra.gmra.mxu1 %vm472_vm2, %v208_v38  ;;  %v8877_v43 = vpop.f32.mrf.mxu1  ;;  %v8857_v44 = vpop.f32.mrf.mxu0 }
  0xd9   :  { %8914 = vmatpush3.xpose.msk.msra.mxu1 %vm472_vm2, %v331_v41  ;;  %8915 = vmatprep.mubr.msk.f32.mxu1 %vm9726_vm1, %v11315_v20  ;;  %v351_v54 = vadd.f32 %v8877_v43, %v8205_v21  ;;  %v233_v58 = vadd.f32 %v8857_v44, %v8191_v22 }
  0xda   :  { %8919 = vmatpush3.xpose.msk.msra.mxu0 %vm472_vm2, %v336_v42  ;;  %8923 = vmatprep.subr.mxu1 %v11315_v20  ;;  %v345_v48 = vpop.f32.mrf.mxu1  ;;  %v227_v49 = vpop.f32.mrf.mxu0 }
  0xdb   :  { %v346_v50 = vadd.f32 %v8205_v21, %v345_v48  ;;  %8928 = vmatprep.subr.mxu0 %v11315_v20  ;;  %v228_v55 = vadd.f32 %v8191_v22, %v227_v49  ;;  %v51_v21 = vsub.s32 %v48_v14, %v9980_v17 }
  0xdc   :  { %8916 = vmatmul.mubr.msk.f32.vlgmr.msra.gmra.mxu1 %vm472_vm2, %v213_v47  ;;  %v8888_v52 = vpop.f32.mrf.mxu0 }
  0xdd   :  { %8924 = vmatpush3.xpose.msk.msra.mxu1 %vm472_vm2, %v341_v45  ;;  %8921 = vmatmul.mubr.msk.f32.vlgmr.msra.gmra.mxu0 %vm472_vm2, %v218_v46  ;;  %v439_v60 = vadd.f32 %v8888_v52, %v9938_v53  ;;  %v52_v22 = vrot.slane %v43_v19, %v51_v21  ;;  %v59_v33 = vrot.slane %v45_v27, %v51_v21 }
  0xde   :  { %8925 = vmatprep.mubr.msk.f32.mxu1 %vm9726_vm1, %v11315_v20  ;;  %8929 = vmatpush3.xpose.msk.msra.mxu0 %vm472_vm2, %v346_v50  ;;  %v433_v56 = vpop.f32.mrf.mxu0 }
  0xdf   :  { %8933 = vmatprep.subr.mxu1 %v11315_v20  ;;  %8930 = vmatprep.mubr.msk.f32.mxu0 %vm9726_vm1, %v11315_v20  ;;  %v434_v57 = vadd.f32 %v9938_v53, %v433_v56  ;;  %v60_v23 = vcombine.high %v52_v22, %v52_v22  ;;  %v68_v26 = vrot.slane %v52_v22, %v51_v21 }
  0xe0   :  { %8926 = vmatmul.mubr.msk.f32.vlgmr.msra.gmra.mxu1 %vm472_vm2, %v223_v51  ;;  %v8891_v59 = vpop.f32.mrf.mxu0  ;;  %8938 = vmatprep.subr.mxu0 %v11315_v20  ;;  %v61_v42 = vcombine.high %v59_v33, %v59_v33 }
  0xe1   :  { %8934 = vmatpush3.xpose.msk.msra.mxu1 %vm472_vm2, %v351_v54  ;;  %8931 = vmatmul.mubr.msk.f32.vlgmr.msra.gmra.mxu0 %vm472_vm2, %v228_v55  ;;  %v9955_v61 = vadd.f32 %v8891_v59, %v9938_v53  ;;  %v82_v24 = vrot.slane %v60_v23, %v51_v21  ;;  %v9992_v32 = vrot.slane %v68_v26, %v9984_v25 }
  0xe2   :  { %8935 = vmatprep.mubr.msk.f32.mxu1 %vm9726_vm1, %v11315_v20  ;;  %v9959_v62 = vpop.f32.mrf.mxu0  ;;  %8943 = vmatprep.subr.mxu1 %v11315_v20  ;;  %v90_v44 = vcombine.high %v68_v26, %v68_v26  ;;  %v89_v48 = vrot.slane %v61_v42, %v51_v21  ;;  %v75_v55 = vrot.slane %v59_v33, %v51_v21 }
  0xe3   :  { %8939 = vmatpush3.msra.mxu0 %v434_v57  ;;  %8940 = vmatprep.mubr.msk.f32.mxu0 %vm9726_vm1, %v11315_v20  ;;  %v9989_v29 = vrot.slane %v82_v24, %v9984_v25  ;;  %v92_v41 = vcombine.high %v82_v24, %v82_v24 }
  0xe4   :  { %8936 = vmatmul.mubr.msk.f32.vlgmr.msra.gmra.mxu1 %vm472_vm2, %v233_v58  ;;  %v8894_v63 = vpop.f32.mrf.mxu0  ;;  %8948 = vmatprep.subr.mxu0 %v11315_v20  ;;  %v10002_v51 = vrot.slane %v90_v44, %v9984_v25  ;;  %v10006_v59 = vrot.slane %v89_v48, %v9984_v25  ;;  %v91_v4 = vcombine.high %v75_v55, %v75_v55 }
  0xe5   :  { %v9967_v0 = vadd.f32 %v8894_v63, %v9938_v53  ;;  %8944 = vmatpush3.msra.mxu1 %v439_v60  ;;  %8945 = vmatprep.mubr.msk.f32.mxu1 %vm9726_vm1, %v11315_v20  ;;  %v9999_v47 = vrot.slane %v92_v41, %v9984_v25  ;;  %v93_v60 = vcombine.high %v89_v48, %v89_v48 }
  0xe6   :  { %v9971_v1 = vpop.f32.mrf.mxu0  ;;  %8953 = vmatprep.subr.mxu1 %v11315_v20  ;;  %v10011_v14 = vrot.slane %v75_v55, %v9984_v25  ;;  %v10019_v27 = vrot.slane %v91_v4, %v9984_v25 }
  0xe7   :  { %v10015_v23 = vrot.slane %v93_v60, %v9984_v25 }
  0xe8   :  { %v8897_v2 = vpop.f32.mrf.mxu0 }
  0xe9   :  { %v9975_v3 = vadd.f32 %v8897_v2, %v9938_v53 }
  0xea   :  { %v9986_v28 = vpop.f32.mrf.mxu0 }
 0x192   :  { %v621_v30 = vpop.f32.mrf.mxu1 }
 0x193   :  { %v1082_v31 = vmul.f32 0.35355338, %v621_v30 }
 0x194   :  { %v545_v34 = vpop.f32.mrf.mxu0  ;;  %v8907_v35 = vpop.f32.mrf.mxu1 }
 0x195   :  { %v1081_v36 = vmul.f32 0.35355338, %v545_v34  ;;  %v1130_v37 = vadd.f32 %v9989_v29, %v1082_v31 }
 0x196   :  { %v8902_v38 = vpop.f32.mrf.mxu0 }
 0x197   :  { %v1140_v39 = vsel %vm472_vm2, %v1130_v37, -inf  ;;  %v1129_v40 = vadd.f32 %v9992_v32, %v1081_v36 }
 0x198   :  { %1141 = vmax.xlane.f32.xlu0 %v1140_v39  ;;  %v697_v43 = vpop.f32.mrf.mxu1 }
 0x199   :  { %v1137_v46 = vsel %vm472_vm2, %v1129_v40, -inf  ;;  %v1083_v49 = vmul.f32 0.35355338, %v697_v43 }
 0x19a   :  { %v8912_v45 = vpop.f32.mrf.mxu1 }
 0x19b   :  { %v1131_v2 = vadd.f32 %v10002_v51, %v1083_v49 }
 0x19c   :  { %v773_v50 = vpop.f32.mrf.mxu1  ;;  %1138 = vmax.xlane.f32.xlu0 %v1137_v46 }
 0x19d   :  { %v1084_v52 = vmul.f32 0.35355338, %v773_v50  ;;  %v849_v54 = vpop.f32.mrf.mxu0  ;;  %v1143_v26 = vsel %vm472_vm2, %v1131_v2, -inf }
 0x19e   :  { %v8917_v56 = vpop.f32.mrf.mxu1  ;;  %v1085_v5 = vmul.f32 0.35355338, %v849_v54 }
 0x19f   :  { %v8922_v57 = vpop.f32.mrf.mxu0  ;;  %v1132_v58 = vadd.f32 %v9999_v47, %v1084_v52 }
 0x1a0   :  { %v925_v63 = vpop.f32.mrf.mxu1  ;;  %v1133_v34 = vadd.f32 %v10011_v14, %v1085_v5 }
 0x1a1   :  { %v1086_v6 = vmul.f32 0.35355338, %v925_v63  ;;  %v1146_v7 = vsel %vm472_vm2, %v1132_v58, -inf  ;;  %v1001_v11 = vpop.f32.mrf.mxu0 }
 0x1a2   :  { %1147 = vmax.xlane.f32.xlu1 %v1146_v7  ;;  %v8927_v19 = vpop.f32.mrf.mxu1  ;;  %v1087_v30 = vmul.f32 0.35355338, %v1001_v11  ;;  %v1149_v39 = vsel %vm472_vm2, %v1133_v34, -inf }
 0x1a3   :  { %v8932_v21 = vpop.f32.mrf.mxu0  ;;  %v1134_v22 = vadd.f32 %v10006_v59, %v1086_v6 }
 0x1a4   :  { %v1077_v24 = vpop.f32.mrf.mxu1  ;;  %v1135_v41 = vadd.f32 %v10019_v27, %v1087_v30 }
 0x1a5   :  { %v1088_v31 = vmul.f32 0.35355338, %v1077_v24  ;;  %v1152_v33 = vsel %vm472_vm2, %v1134_v22, -inf }
 0x1a6   :  { %1144 = vmax.xlane.f32.xlu1 %v1143_v26  ;;  %v8937_v35 = vpop.f32.mrf.mxu1  ;;  %1153 = vmax.xlane.f32.xlu0 %v1152_v33  ;;  %v1155_v42 = vsel %vm472_vm2, %v1135_v41, -inf }
 0x1a7   :  { %v1136_v36 = vadd.f32 %v10015_v23, %v1088_v31 }
 0x1a9   :  { %v1158_v38 = vsel %vm472_vm2, %v1136_v36, -inf }
 0x1aa   :  { %1159 = vmax.xlane.f32.xlu0 %v1158_v38  ;;  %1150 = vmax.xlane.f32.xlu1 %v1149_v39 }
 0x1ae   :  { %1156 = vmax.xlane.f32.xlu1 %v1155_v42 }
 0x221   :  { %v1142_v43 = vpop.xlane.xlu0 %1141 }
 0x222   :  { %v1162_v44 = vsub.f32 %v1130_v37, %v1142_v43 }
 0x224   :  { %v1171_v45 = vmul.f32 1.442695, %v1162_v44 }
 0x225   :  { %v1139_v46 = vpop.xlane.xlu0 %1138 }
 0x226   :  { %9506 = vpow2.f32 %v1171_v45  ;;  %v1161_v48 = vsub.f32 %v1129_v40, %v1139_v46 }
 0x228   :  { %v1169_v49 = vmul.f32 1.442695, %v1161_v48 }
 0x22a   :  { %9508 = vpow2.f32 %v1169_v49 }
 0x22b   :  { %v1148_v50 = vpop.xlane.xlu1 %1147 }
 0x22c   :  { %v1164_v52 = vsub.f32 %v1132_v58, %v1148_v50 }
 0x22e   :  { %v1175_v54 = vmul.f32 1.442695, %v1164_v52 }
 0x22f   :  { %v1145_v55 = vpop.xlane.xlu1 %1144  ;;  %v1154_v56 = vpop.xlane.xlu0 %1153 }
 0x230   :  { %9510 = vpow2.f32 %v1175_v54  ;;  %v1163_v57 = vsub.f32 %v1131_v2, %v1145_v55  ;;  %v1166_v60 = vsub.f32 %v1134_v22, %v1154_v56 }
 0x232   :  { %v1173_v63 = vmul.f32 1.442695, %v1163_v57  ;;  %v1179_v4 = vmul.f32 1.442695, %v1166_v60 }
 0x233   :  { %v9507_v5 = vpop.eup %9506  ;;  %v1160_v6 = vpop.xlane.xlu0 %1159 }
 0x234   :  { %v1151_v7 = vpop.xlane.xlu1 %1150  ;;  %9512 = vpow2.f32 %v1173_v63  ;;  %v1168_v37 = vsub.f32 %v1136_v36, %v1160_v6  ;;  %v1188_v40 = vsel %vm472_vm2, %v9507_v5, 0.0  ;;  %v444_v63 = vadd.f32 %v9938_v53, %v9959_v62 }
 0x235   :  { %v1165_v11 = vsub.f32 %v1133_v34, %v1151_v7  ;;  %9514 = vpow2.f32 %v1179_v4  ;;  %1189 = vadd.xlane.f32.xlu0 %v1188_v40 }
 0x236   :  { %v1183_v19 = vmul.f32 1.442695, %v1168_v37  ;;  %v454_v37 = vadd.f32 %v9938_v53, %v9971_v1 }
 0x237   :  { %v1177_v58 = vmul.f32 1.442695, %v1165_v11  ;;  %v9509_v21 = vpop.eup %9508 }
 0x238   :  { %v1157_v24 = vpop.xlane.xlu1 %1156  ;;  %9516 = vpow2.f32 %v1183_v19  ;;  %v1185_v2 = vsel %vm472_vm2, %v9509_v21, 0.0 }
 0x239   :  { %v1167_v26 = vsub.f32 %v1135_v41, %v1157_v24  ;;  %9518 = vpow2.f32 %v1177_v58  ;;  %1186 = vadd.xlane.f32.xlu1 %v1185_v2  ;;  %v464_v24 = vadd.f32 %v9938_v53, %v9986_v28  ;;  %v8267_v2 = vld [vmem:[%s11307_s2 + $0xa8] sm:$0xff]  ;;  %v8266_v53 = vld [vmem:[%s11307_s2 + $0xa0] sm:$0xff]  ;;  %v8254_v28 = vld [vmem:[%s11307_s2 + $0x30] sm:$0xff] }
 0x23b   :  { %v1181_v22 = vmul.f32 1.442695, %v1167_v26  ;;  %v8255_v26 = vld [vmem:[%s11307_s2 + $0x38] sm:$0xff] }
 0x23d   :  { %9520 = vpow2.f32 %v1181_v22  ;;  %v9511_v30 = vpop.eup %9510 }
 0x23e   :  { %v1194_v31 = vsel %vm472_vm2, %v9511_v30, 0.0 }
 0x23f   :  { %1195 = vadd.xlane.f32.xlu0 %v1194_v31  ;;  %v8252_v31 = vld [vmem:[%s11307_s2 + $0x20] sm:$0xff] }
 0x241   :  { %v9513_v33 = vpop.eup %9512 }
 0x242   :  { %v9515_v34 = vpop.eup %9514  ;;  %v1191_v35 = vsel %vm472_vm2, %v9513_v33, 0.0 }
 0x243   :  { %v1200_v36 = vsel %vm472_vm2, %v9515_v34, 0.0  ;;  %1192 = vadd.xlane.f32.xlu1 %v1191_v35  ;;  %v8281_v35 = vld [vmem:[%s11307_s2 + $0x128] sm:$0xff] }
 0x244   :  { %1201 = vadd.xlane.f32.xlu0 %v1200_v36 }
 0x245   :  { %v9517_v38 = vpop.eup %9516 }
 0x246   :  { %v9519_v39 = vpop.eup %9518  ;;  %v1206_v41 = vsel %vm472_vm2, %v9517_v38, 0.0 }
 0x247   :  { %v1197_v42 = vsel %vm472_vm2, %v9519_v39, 0.0 }
 0x248   :  { %1207 = vadd.xlane.f32.xlu0 %v1206_v41  ;;  %1198 = vadd.xlane.f32.xlu1 %v1197_v42 }
 0x24a   :  { %v10035_v43 = vpop.eup %9520 }
 0x24b   :  { %v1203_v44 = vsel %vm472_vm2, %v10035_v43, 0.0 }
 0x24c   :  { %1204 = vadd.xlane.f32.xlu1 %v1203_v44 }
 0x2be   :  { %v1190_v45 = vpop.xlane.xlu0 %1189 }
 0x2bf   :  { %9522 = vrcp.f32 %v1190_v45 }
 0x2c2   :  { %v1187_v46 = vpop.xlane.xlu1 %1186 }
 0x2c3   :  { %9524 = vrcp.f32 %v1187_v46 }
 0x2c8   :  { %v1196_v48 = vpop.xlane.xlu0 %1195 }
 0x2c9   :  { %9526 = vrcp.f32 %v1196_v48 }
 0x2cc   :  { %v9523_v49 = vpop.eup %9522  ;;  %v1193_v50 = vpop.xlane.xlu1 %1192 }
 0x2cd   :  { %v1202_v52 = vpop.xlane.xlu0 %1201  ;;  %9528 = vrcp.f32 %v1193_v50  ;;  %v1218_v54 = vmul.f32 %v9523_v49, %v9507_v5  ;;  %v8271_v49 = vld [vmem:[%s11308_s3 + $0x5] ss:$0 sm:$0xff] }
 0x2ce   :  { %9530 = vrcp.f32 %v1202_v52 }
 0x2cf   :  { %8946 = vmatmul.mubr.msk.f32.vlgmr.msra.gmra.mxu1 %vm472_vm2, %v1218_v54 }
 0x2d0   :  { %v9525_v55 = vpop.eup %9524  ;;  %8954 = vmatpush3.msra.mxu1 %v9955_v61  ;;  %8955 = vmatprep.mubr.msk.f32.mxu1 %vm9726_vm1, %v11315_v20 }
 0x2d1   :  { %v1208_v56 = vpop.xlane.xlu0 %1207  ;;  %v1199_v57 = vpop.xlane.xlu1 %1198  ;;  %v1217_v60 = vmul.f32 %v9525_v55, %v9509_v21  ;;  %8963 = vmatprep.subr.mxu1 %v11315_v20  ;;  %v8268_v21 = vld [vmem:[%s11307_s2 + $0xb0] sm:$0xff] }
 0x2d2   :  { %9532 = vrcp.f32 %v1208_v56  ;;  %v8257_v56 = vld [vmem:[%s11308_s3 + $0x1] ss:$0 sm:$0xff] }
 0x2d3   :  { %9534 = vrcp.f32 %v1199_v57  ;;  %8941 = vmatmul.mubr.msk.f32.vlgmr.msra.gmra.mxu0 %vm472_vm2, %v1217_v60 }
 0x2d4   :  { %8949 = vmatpush3.msra.mxu0 %v444_v63  ;;  %8950 = vmatprep.mubr.msk.f32.mxu0 %vm9726_vm1, %v11315_v20 }
 0x2d5   :  { %v1205_v61 = vpop.xlane.xlu1 %1204  ;;  %8958 = vmatprep.subr.mxu0 %v11315_v20 }
 0x2d6   :  { %v9527_v4 = vpop.eup %9526  ;;  %9536 = vrcp.f32 %v1205_v61 }
 0x2d7   :  { %v1220_v5 = vmul.f32 %v9527_v4, %v9511_v30  ;;  %v8253_v30 = vld [vmem:[%s11307_s2 + $0x28] sm:$0xff] }
 0x2d9   :  { %8956 = vmatmul.mubr.msk.f32.vlgmr.msra.gmra.mxu1 %vm472_vm2, %v1220_v5 }
 0x2da   :  { %v9529_v6 = vpop.eup %9528  ;;  %8964 = vmatpush3.msra.mxu1 %v9967_v0  ;;  %8965 = vmatprep.mubr.msk.f32.mxu1 %vm9726_vm1, %v11315_v20  ;;  %v8269_v0 = vld [vmem:[%s11307_s2 + $0xb8] sm:$0xff] }
 0x2db   :  { %v9531_v62 = vpop.eup %9530  ;;  %8973 = vmatprep.subr.mxu1 %v11315_v20  ;;  %v1219_v7 = vmul.f32 %v9529_v6, %v9513_v33  ;;  %v8283_v33 = vld [vmem:[%s11307_s2 + $0x138] sm:$0xff] }
 0x2dc   :  { %v1222_v11 = vmul.f32 %v9531_v62, %v9515_v34  ;;  %v8282_v34 = vld [vmem:[%s11307_s2 + $0x130] sm:$0xff] }
 0x2dd   :  { %8951 = vmatmul.mubr.msk.f32.vlgmr.msra.gmra.mxu0 %vm472_vm2, %v1219_v7 }
 0x2de   :  { %8959 = vmatpush3.msra.mxu0 %v454_v37  ;;  %8966 = vmatmul.mubr.msk.f32.vlgmr.msra.gmra.mxu1 %vm472_vm2, %v1222_v11 }
 0x2df   :  { %v9533_v40 = vpop.eup %9532  ;;  %8974 = vmatpush3.msra.mxu1 %v9975_v3  ;;  %8960 = vmatprep.mubr.msk.f32.mxu0 %vm9726_vm1, %v11315_v20 }
 0x2e0   :  { %v9535_v19 = vpop.eup %9534  ;;  %8968 = vmatprep.subr.mxu0 %v11315_v20  ;;  %8975 = vmatprep.mubr.msk.f32.mxu1 %vm9726_vm1, %v11315_v20  ;;  %v1224_v1 = vmul.f32 %v9533_v40, %v9517_v38 }
 0x2e1   :  { %8998 = vmatprep.subr.mxu1 %v8269_v0  ;;  %v1221_v58 = vmul.f32 %v9535_v19, %v9519_v39 }
 0x2e2   :  { %8976 = vmatmul.mubr.msk.f32.vlgmr.msra.gmra.mxu1 %vm472_vm2, %v1224_v1 }
 0x2e3   :  { %v9537_v3 = vpop.eup %9536  ;;  %8961 = vmatmul.mubr.msk.f32.vlgmr.msra.gmra.mxu0 %vm472_vm2, %v1221_v58  ;;  %8999 = vmatpush3.msra.mxu1 %v8269_v0 }
 0x2e4   :  { %8969 = vmatpush3.msra.mxu0 %v464_v24  ;;  %9000 = vmatprep.subr.mxu1 %v8268_v21  ;;  %v1223_v22 = vmul.f32 %v9537_v3, %v10035_v43 }
 0x2e5   :  { %9001 = vmatpush3.msra.mxu1 %v8268_v21  ;;  %8970 = vmatprep.mubr.msk.f32.mxu0 %vm9726_vm1, %v11315_v20 }
 0x2e6   :  { %8978 = vmatprep.subr.mxu0 %v8255_v26  ;;  %9002 = vmatprep.subr.mxu1 %v8267_v2 }
 0x2e7   :  { %8971 = vmatmul.mubr.msk.f32.vlgmr.msra.gmra.mxu0 %vm472_vm2, %v1223_v22  ;;  %9003 = vmatpush3.msra.mxu1 %v8267_v2 }
 0x2e8   :  { %8979 = vmatpush3.msra.mxu0 %v8255_v26  ;;  %9004 = vmatprep.subr.mxu1 %v8266_v53 }
 0x2e9   :  { %8980 = vmatprep.subr.mxu0 %v8254_v28  ;;  %9005 = vmatpush3.msra.mxu1 %v8266_v53 }
 0x2ea   :  { %8981 = vmatpush3.msra.mxu0 %v8254_v28  ;;  %9006 = vmatprep.mubr.msk.f32.mxu1 %vm106_vm0, %v9806_v8 }
 0x2eb   :  { %8982 = vmatprep.subr.mxu0 %v8253_v30  ;;  %9007 = vmatmul.mubr.msk.f32.vlgmr.msra.gmra.mxu1 %vm106_vm0, %v9811_v9 }
 0x2ec   :  { %8983 = vmatpush3.msra.mxu0 %v8253_v30  ;;  %8986 = vmatprep.mubr.msk.f32.mxu0 %vm106_vm0, %v9806_v8 }
 0x2ed   :  { %8984 = vmatprep.subr.mxu0 %v8252_v31  ;;  %9009 = vmatprep.mubr.msk.f32.mxu1 %vm106_vm0, %v9818_v10 }
 0x2ee   :  { %8985 = vmatpush3.msra.mxu0 %v8252_v31  ;;  %9038 = vmatprep.subr.mxu1 %v11315_v20 }
 0x2ef   :  { %8987 = vmatmul.mubr.msk.f32.vlgmr.msra.gmra.mxu0 %vm106_vm0, %v9811_v9  ;;  %9010 = vmatmul.mubr.msk.f32.gmra.mxu1 %vm106_vm0, %v9836_v12 }
 0x2f0   :  { %8989 = vmatprep.mubr.msk.f32.mxu0 %vm106_vm0, %v9818_v10  ;;  %9012 = vmatprep.mubr.msk.f32.mxu1 %vm106_vm0, %v9841_v13 }
 0x2f1   :  { %9018 = vmatprep.subr.mxu0 %v8283_v33 }
 0x2f2   :  { %9019 = vmatpush3.msra.mxu0 %v8283_v33 }
 0x2f3   :  { %8990 = vmatmul.mubr.msk.f32.gmra.mxu0 %vm106_vm0, %v9836_v12  ;;  %9013 = vmatmul.mubr.msk.f32.gmra.mxu1 %vm106_vm0, %v9855_v15 }
 0x2f4   :  { %8992 = vmatprep.mubr.msk.f32.mxu0 %vm106_vm0, %v9841_v13  ;;  %9015 = vmatprep.mubr.msk.f32.mxu1 %vm106_vm0, %v9862_v16 }
 0x2f5   :  { %9020 = vmatprep.subr.mxu0 %v8282_v34 }
 0x2f6   :  { %9021 = vmatpush3.msra.mxu0 %v8282_v34  ;;  %v10228_v34 = vld [vmem:[%s11308_s3 + $0x9] ss:$0 sm:$0xff] }
 0x2f7   :  { %8993 = vmatmul.mubr.msk.f32.gmra.mxu0 %vm106_vm0, %v9855_v15  ;;  %9016 = vmatmul.mubr.msk.f32.gmra.mxu1 %vm106_vm0, %v9876_v18 }
 0x2f8   :  { %8995 = vmatprep.mubr.msk.f32.mxu0 %vm106_vm0, %v9862_v16  ;;  %9040 = vmatprep.mubr.msk.f32.mxu1 %vm9726_vm1, %v11315_v20 }
 0x2f9   :  { %9022 = vmatprep.subr.mxu0 %v8281_v35 }
 0x2fa   :  { %9023 = vmatpush3.msra.mxu0 %v8281_v35 }
 0x2fb   :  { %8996 = vmatmul.mubr.msk.f32.gmra.mxu0 %vm106_vm0, %v9876_v18 }
 0x2fc   :  { %9026 = vmatprep.mubr.msk.f32.mxu0 %vm106_vm0, %v9806_v8  ;;  %v8280_v8 = vld [vmem:[%s11307_s2 + $0x120] sm:$0xff] }
 0x2fd   :  { %9024 = vmatprep.subr.mxu0 %v8280_v8 }
 0x2fe   :  { %9025 = vmatpush3.msra.mxu0 %v8280_v8 }
 0x2ff   :  { %9027 = vmatmul.mubr.msk.f32.vlgmr.msra.gmra.mxu0 %vm106_vm0, %v9811_v9  ;;  %9058 = vmatprep.subr.mxu0 %v11315_v20 }
 0x300   :  { %9029 = vmatprep.mubr.msk.f32.mxu0 %vm106_vm0, %v9818_v10 }
 0x303   :  { %9030 = vmatmul.mubr.msk.f32.gmra.mxu0 %vm106_vm0, %v9836_v12 }
 0x304   :  { %9032 = vmatprep.mubr.msk.f32.mxu0 %vm106_vm0, %v9841_v13 }
 0x307   :  { %9033 = vmatmul.mubr.msk.f32.gmra.mxu0 %vm106_vm0, %v9855_v15 }
 0x308   :  { %9035 = vmatprep.mubr.msk.f32.mxu0 %vm106_vm0, %v9862_v16 }
 0x30b   :  { %9036 = vmatmul.mubr.msk.f32.gmra.mxu0 %vm106_vm0, %v9876_v18 }
 0x30c   :  { %9060 = vmatprep.mubr.msk.f32.mxu0 %vm9726_vm1, %v11315_v20 }
 0x38f   :  { %v10163_v9 = vpop.f32.mrf.mxu1 }
 0x391   :  { %v8947_v10 = vpop.f32.mrf.mxu1 }
 0x393   :  { %v10165_v36 = vpop.f32.mrf.mxu0 }
 0x395   :  { %v8942_v12 = vpop.f32.mrf.mxu0 }
 0x399   :  { %v10167_v38 = vpop.f32.mrf.mxu1 }
 0x39b   :  { %v8957_v13 = vpop.f32.mrf.mxu1 }
 0x39d   :  { %v10169_v39 = vpop.f32.mrf.mxu0 }
 0x39e   :  { %v10171_v15 = vpop.f32.mrf.mxu1 }
 0x39f   :  { %v8952_v16 = vpop.f32.mrf.mxu0 }
 0x3a0   :  { %v8967_v41 = vpop.f32.mrf.mxu1 }
 0x3a2   :  { %v10173_v42 = vpop.f32.mrf.mxu1 }
 0x3a3   :  { %v10175_v18 = vpop.f32.mrf.mxu0 }
 0x3a4   :  { %v8977_v43 = vpop.f32.mrf.mxu1 }
 0x3a5   :  { %v8962_v44 = vpop.f32.mrf.mxu0 }
 0x3a7   :  { %v10177_v45 = vpop.f32.mrf.mxu0 }
 0x3a9   :  { %v8972_v46 = vpop.f32.mrf.mxu0 }
 0x3ab   :  { %v9008_v48 = vpop.f32.mrf.mxu1 }
 0x3ac   :  { %v2013_v61 = vadd.f32 %v9008_v48, %v8271_v49 }
 0x3ad   :  { %v2007_v50 = vpop.f32.mrf.mxu1 }
 0x3ae   :  { %v2008_v52 = vadd.f32 %v8271_v49, %v2007_v50 }
 0x3af   :  { %v8988_v54 = vpop.f32.mrf.mxu0  ;;  %v9011_v55 = vpop.f32.mrf.mxu1 }
 0x3b0   :  { %9039 = vmatpush3.xpose.msk.msra.mxu1 %vm472_vm2, %v2008_v52  ;;  %v1895_v37 = vadd.f32 %v8988_v54, %v8257_v56  ;;  %v2023_v3 = vadd.f32 %v9011_v55, %v8271_v49 }
 0x3b1   :  { %v1889_v57 = vpop.f32.mrf.mxu0  ;;  %9043 = vmatprep.subr.mxu1 %v11315_v20  ;;  %v2017_v60 = vpop.f32.mrf.mxu1 }
 0x3b2   :  { %v1890_v63 = vadd.f32 %v8257_v56, %v1889_v57  ;;  %v2018_v6 = vadd.f32 %v8271_v49, %v2017_v60 }
 0x3b3   :  { %v8991_v4 = vpop.f32.mrf.mxu0  ;;  %v9014_v5 = vpop.f32.mrf.mxu1 }
 0x3b4   :  { %9041 = vmatmul.mubr.msk.f32.vlgmr.msra.gmra.mxu1 %vm472_vm2, %v1890_v63  ;;  %v1905_v22 = vadd.f32 %v8991_v4, %v8257_v56  ;;  %v2033_v28 = vadd.f32 %v9014_v5, %v8271_v49 }
 0x3b5   :  { %9044 = vmatpush3.xpose.msk.msra.mxu1 %vm472_vm2, %v2013_v61  ;;  %v1899_v62 = vpop.f32.mrf.mxu0  ;;  %9045 = vmatprep.mubr.msk.f32.mxu1 %vm9726_vm1, %v11315_v20  ;;  %v2027_v7 = vpop.f32.mrf.mxu1 }
 0x3b6   :  { %9048 = vmatprep.subr.mxu1 %v11315_v20  ;;  %v2028_v11 = vadd.f32 %v8271_v49, %v2027_v7  ;;  %v1900_v58 = vadd.f32 %v8257_v56, %v1899_v62 }
 0x3b7   :  { %v8994_v0 = vpop.f32.mrf.mxu0  ;;  %v9017_v40 = vpop.f32.mrf.mxu1 }
 0x3b8   :  { %9046 = vmatmul.mubr.msk.f32.vlgmr.msra.gmra.mxu1 %vm472_vm2, %v1895_v37  ;;  %9059 = vmatpush3.xpose.msk.msra.mxu0 %vm472_vm2, %v2028_v11  ;;  %v1915_v30 = vadd.f32 %v8994_v0, %v8257_v56  ;;  %v2043_v31 = vadd.f32 %v9017_v40, %v8271_v49 }
 0x3b9   :  { %9049 = vmatpush3.xpose.msk.msra.mxu1 %vm472_vm2, %v2018_v6  ;;  %9050 = vmatprep.mubr.msk.f32.mxu1 %vm9726_vm1, %v11315_v20  ;;  %v1909_v19 = vpop.f32.mrf.mxu0  ;;  %v2037_v1 = vpop.f32.mrf.mxu1 }
 0x3ba   :  { %9053 = vmatprep.subr.mxu1 %v11315_v20  ;;  %v1910_v21 = vadd.f32 %v8257_v56, %v1909_v19  ;;  %v2038_v24 = vadd.f32 %v8271_v49, %v2037_v1  ;;  %9068 = vmatprep.subr.mxu0 %v11315_v20 }
 0x3bb   :  { %v8997_v26 = vpop.f32.mrf.mxu0 }
 0x3bc   :  { %9051 = vmatmul.mubr.msk.f32.vlgmr.msra.gmra.mxu1 %vm472_vm2, %v1900_v58  ;;  %9061 = vmatmul.mubr.msk.f32.vlgmr.msra.gmra.mxu0 %vm472_vm2, %v1910_v21  ;;  %v1925_v33 = vadd.f32 %v8997_v26, %v8257_v56 }
 0x3bd   :  { %9054 = vmatpush3.xpose.msk.msra.mxu1 %vm472_vm2, %v2023_v3  ;;  %9055 = vmatprep.mubr.msk.f32.mxu1 %vm9726_vm1, %v11315_v20  ;;  %v1919_v2 = vpop.f32.mrf.mxu0 }
 0x3be   :  { %9063 = vmatprep.subr.mxu1 %v11315_v20  ;;  %v1920_v53 = vadd.f32 %v8257_v56, %v1919_v2  ;;  %9069 = vmatpush3.xpose.msk.msra.mxu0 %vm472_vm2, %v2038_v24 }
 0x3bf   :  { %9070 = vmatprep.mubr.msk.f32.mxu0 %vm9726_vm1, %v11315_v20  ;;  %9078 = vmatprep.subr.mxu0 %v11315_v20  ;;  %v9028_v35 = vpop.f32.mrf.mxu0 }
 0x3c0   :  { %9056 = vmatmul.mubr.msk.f32.vlgmr.msra.gmra.mxu1 %vm472_vm2, %v1905_v22  ;;  %v2131_v8 = vadd.f32 %v9028_v35, %v10228_v34 }
 0x3c1   :  { %9064 = vmatpush3.xpose.msk.msra.mxu1 %vm472_vm2, %v2033_v28  ;;  %9065 = vmatprep.mubr.msk.f32.mxu1 %vm9726_vm1, %v11315_v20  ;;  %v2125_v10 = vpop.f32.mrf.mxu0 }
 0x3c2   :  { %9071 = vmatmul.mubr.msk.f32.vlgmr.msra.gmra.mxu0 %vm472_vm2, %v1920_v53  ;;  %9073 = vmatprep.subr.mxu1 %v11315_v20  ;;  %v2126_v12 = vadd.f32 %v10228_v34, %v2125_v10 }
 0x3c3   :  { %9080 = vmatprep.mubr.msk.f32.mxu0 %vm9726_vm1, %v11315_v20  ;;  %v9031_v13 = vpop.f32.mrf.mxu0 }
 0x3c4   :  { %9066 = vmatmul.mubr.msk.f32.vlgmr.msra.gmra.mxu1 %vm472_vm2, %v1915_v30  ;;  %v10234_v16 = vadd.f32 %v9031_v13, %v10228_v34  ;;  %9079 = vmatpush3.msra.mxu0 %v2126_v12 }
 0x3c5   :  { %9074 = vmatpush3.xpose.msk.msra.mxu1 %vm472_vm2, %v2043_v31  ;;  %9075 = vmatprep.mubr.msk.f32.mxu1 %vm9726_vm1, %v11315_v20  ;;  %v2135_v41 = vpop.f32.mrf.mxu0 }
 0x3c6   :  { %9083 = vmatprep.subr.mxu1 %v11315_v20  ;;  %9088 = vmatprep.subr.mxu0 %v11315_v20  ;;  %v10238_v43 = vadd.f32 %v10228_v34, %v2135_v41 }
 0x3c7   :  { %v9034_v44 = vpop.f32.mrf.mxu0 }
 0x3c8   :  { %9076 = vmatmul.mubr.msk.f32.vlgmr.msra.gmra.mxu1 %vm472_vm2, %v1925_v33  ;;  %v10241_v46 = vadd.f32 %v9034_v44, %v10228_v34 }
 0x3c9   :  { %9085 = vmatprep.mubr.msk.f32.mxu1 %vm9726_vm1, %v11315_v20  ;;  %9084 = vmatpush3.msra.mxu1 %v2131_v8  ;;  %v2145_v48 = vpop.f32.mrf.mxu0 }
 0x3ca   :  { %9093 = vmatprep.subr.mxu1 %v11315_v20  ;;  %v10244_v49 = vadd.f32 %v10228_v34, %v2145_v48 }
 0x3cb   :  { %v9037_v50 = vpop.f32.mrf.mxu0 }
 0x3cc   :  { %v10247_v52 = vadd.f32 %v9037_v50, %v10228_v34 }
 0x3cd   :  { %v10250_v63 = vpop.f32.mrf.mxu0 }
 0x474   :  { %v2236_v54 = vpop.f32.mrf.mxu1 }
 0x475   :  { %v2772_v55 = vmul.f32 0.35355338, %v2236_v54 }
 0x476   :  { %v9042_v56 = vpop.f32.mrf.mxu1 }
 0x477   :  { %v2780_v57 = vadd.f32 %v2772_v55, %v9992_v32 }
 0x478   :  { %v2312_v60 = vpop.f32.mrf.mxu1 }
 0x479   :  { %v2773_v61 = vmul.f32 0.35355338, %v2312_v60  ;;  %v2788_v4 = vsel %vm472_vm2, %v2780_v57, -inf }
 0x47a   :  { %2789 = vmax.xlane.f32.xlu0 %v2788_v4  ;;  %v9047_v5 = vpop.f32.mrf.mxu1 }
 0x47b   :  { %v2781_v6 = vadd.f32 %v2773_v61, %v9989_v29 }
 0x47c   :  { %v2388_v62 = vpop.f32.mrf.mxu1  ;;  %v2540_v7 = vpop.f32.mrf.mxu0 }
 0x47d   :  { %v2774_v37 = vmul.f32 0.35355338, %v2388_v62  ;;  %v2791_v11 = vsel %vm472_vm2, %v2781_v6, -inf  ;;  %v2776_v0 = vmul.f32 0.35355338, %v2540_v7 }
 0x47e   :  { %2792 = vmax.xlane.f32.xlu1 %v2791_v11  ;;  %v9052_v40 = vpop.f32.mrf.mxu1  ;;  %v9062_v19 = vpop.f32.mrf.mxu0 }
 0x47f   :  { %v2782_v1 = vadd.f32 %v2774_v37, %v10002_v51  ;;  %v2784_v58 = vadd.f32 %v2776_v0, %v10011_v14 }
 0x480   :  { %v2464_v21 = vpop.f32.mrf.mxu1 }
 0x481   :  { %v2775_v24 = vmul.f32 0.35355338, %v2464_v21  ;;  %v2794_v3 = vsel %vm472_vm2, %v2782_v1, -inf  ;;  %v2800_v53 = vsel %vm472_vm2, %v2784_v58, -inf }
 0x482   :  { %2795 = vmax.xlane.f32.xlu0 %v2794_v3  ;;  %v9057_v26 = vpop.f32.mrf.mxu1  ;;  %v2692_v2 = vpop.f32.mrf.mxu0 }
 0x483   :  { %v2778_v22 = vmul.f32 0.35355338, %v2692_v2  ;;  %v2783_v28 = vadd.f32 %v2775_v24, %v9999_v47 }
 0x484   :  { %v2616_v30 = vpop.f32.mrf.mxu1  ;;  %v9072_v31 = vpop.f32.mrf.mxu0 }
 0x485   :  { %v2777_v33 = vmul.f32 0.35355338, %v2616_v30  ;;  %v2797_v35 = vsel %vm472_vm2, %v2783_v28, -inf  ;;  %v2786_v8 = vadd.f32 %v2778_v22, %v10019_v27 }
 0x486   :  { %2801 = vmax.xlane.f32.xlu0 %v2800_v53  ;;  %2798 = vmax.xlane.f32.xlu1 %v2797_v35  ;;  %v9067_v10 = vpop.f32.mrf.mxu1 }
 0x487   :  { %v2806_v12 = vsel %vm472_vm2, %v2786_v8, -inf  ;;  %v2785_v13 = vadd.f32 %v2777_v33, %v10006_v59 }
 0x488   :  { %v2768_v41 = vpop.f32.mrf.mxu1 }
 0x489   :  { %v2779_v44 = vmul.f32 0.35355338, %v2768_v41  ;;  %v2803_v48 = vsel %vm472_vm2, %v2785_v13, -inf }
 0x48a   :  { %2807 = vmax.xlane.f32.xlu0 %v2806_v12  ;;  %2804 = vmax.xlane.f32.xlu1 %v2803_v48  ;;  %v9077_v50 = vpop.f32.mrf.mxu1 }
 0x48b   :  { %v2787_v54 = vadd.f32 %v2779_v44, %v10015_v23 }
 0x48d   :  { %v2809_v55 = vsel %vm472_vm2, %v2787_v54, -inf }
 0x48e   :  { %2810 = vmax.xlane.f32.xlu1 %v2809_v55 }
 0x503   :  { %v2790_v56 = vpop.xlane.xlu0 %2789 }
 0x504   :  { %v2812_v60 = vsub.f32 %v2780_v57, %v2790_v56 }
 0x506   :  { %v2820_v61 = vmul.f32 1.442695, %v2812_v60 }
 0x507   :  { %v2793_v4 = vpop.xlane.xlu1 %2792 }
 0x508   :  { %9538 = vpow2.f32 %v2820_v61  ;;  %v2813_v5 = vsub.f32 %v2781_v6, %v2793_v4 }
 0x50a   :  { %v2822_v62 = vmul.f32 1.442695, %v2813_v5 }
 0x50b   :  { %v2796_v7 = vpop.xlane.xlu0 %2795 }
 0x50c   :  { %9540 = vpow2.f32 %v2822_v62  ;;  %v2814_v37 = vsub.f32 %v2782_v1, %v2796_v7 }
 0x50e   :  { %v2824_v11 = vmul.f32 1.442695, %v2814_v37 }
 0x50f   :  { %v2802_v0 = vpop.xlane.xlu0 %2801  ;;  %v2799_v40 = vpop.xlane.xlu1 %2798 }
 0x510   :  { %9542 = vpow2.f32 %v2824_v11  ;;  %v2816_v19 = vsub.f32 %v2784_v58, %v2802_v0  ;;  %v2815_v21 = vsub.f32 %v2783_v28, %v2799_v40 }
 0x512   :  { %v2828_v24 = vmul.f32 1.442695, %v2816_v19  ;;  %v2826_v3 = vmul.f32 1.442695, %v2815_v21 }
 0x513   :  { %v2808_v26 = vpop.xlane.xlu0 %2807  ;;  %v2805_v2 = vpop.xlane.xlu1 %2804 }
 0x514   :  { %9544 = vpow2.f32 %v2828_v24  ;;  %v2818_v57 = vsub.f32 %v2786_v8, %v2808_v26  ;;  %v2817_v22 = vsub.f32 %v2785_v13, %v2805_v2 }
 0x515   :  { %v9539_v53 = vpop.eup %9538  ;;  %9546 = vpow2.f32 %v2826_v3 }
 0x516   :  { %v2832_v6 = vmul.f32 1.442695, %v2818_v57  ;;  %v2830_v30 = vmul.f32 1.442695, %v2817_v22  ;;  %v2836_v31 = vsel %vm472_vm2, %v9539_v53, 0.0 }
 0x517   :  { %2837 = vadd.xlane.f32.xlu0 %v2836_v31  ;;  %v2811_v1 = vpop.xlane.xlu1 %2810  ;;  %v10368_v31 = vld [vmem:[%s11305_s0 + $0x18] sm:$0xff] }
 0x518   :  { %9548 = vpow2.f32 %v2832_v6  ;;  %v2819_v33 = vsub.f32 %v2787_v54, %v2811_v1  ;;  %v10375_v1 = vld [vmem:[%s11305_s0 + $0x20] sm:$0xff] }
 0x519   :  { %v9541_v35 = vpop.eup %9540  ;;  %9550 = vpow2.f32 %v2830_v30 }
 0x51a   :  { %v2834_v58 = vmul.f32 1.442695, %v2819_v33  ;;  %v2839_v28 = vsel %vm472_vm2, %v9541_v35, 0.0  ;;  %v10382_v33 = vld [vmem:[%s11305_s0 + $0x28] sm:$0xff] }
 0x51b   :  { %2840 = vadd.xlane.f32.xlu1 %v2839_v28 }
 0x51c   :  { %9552 = vpow2.f32 %v2834_v58  ;;  %v10396_v58 = vld [vmem:[%s11305_s0 + $0x38] sm:$0xff] }
 0x51d   :  { %v9543_v10 = vpop.eup %9542 }
 0x51e   :  { %v2842_v8 = vsel %vm472_vm2, %v9543_v10, 0.0 }
 0x51f   :  { %2843 = vadd.xlane.f32.xlu0 %v2842_v8 }
 0x521   :  { %v9545_v12 = vpop.eup %9544 }
 0x522   :  { %v9547_v13 = vpop.eup %9546  ;;  %v2848_v41 = vsel %vm472_vm2, %v9545_v12, 0.0 }
 0x523   :  { %2849 = vadd.xlane.f32.xlu0 %v2848_v41  ;;  %v2845_v44 = vsel %vm472_vm2, %v9547_v13, 0.0  ;;  %v8336_v41 = vld [vmem:[%s11307_s2 + $0x48] sm:$0xff] }
 0x524   :  { %2846 = vadd.xlane.f32.xlu1 %v2845_v44 }
 0x525   :  { %v9549_v48 = vpop.eup %9548 }
 0x526   :  { %v9551_v50 = vpop.eup %9550  ;;  %v2854_v54 = vsel %vm472_vm2, %v9549_v48, 0.0 }
 0x527   :  { %2855 = vadd.xlane.f32.xlu0 %v2854_v54  ;;  %v2851_v55 = vsel %vm472_vm2, %v9551_v50, 0.0 }
 0x528   :  { %2852 = vadd.xlane.f32.xlu1 %v2851_v55 }
 0x529   :  { %v9553_v56 = vpop.eup %9552 }
 0x52a   :  { %v2857_v60 = vsel %vm472_vm2, %v9553_v56, 0.0 }
 0x52c   :  { %2858 = vadd.xlane.f32.xlu1 %v2857_v60 }
 0x5a0   :  { %v2838_v61 = vpop.xlane.xlu0 %2837 }
 0x5a1   :  { %9554 = vrcp.f32 %v2838_v61 }
 0x5a4   :  { %v2841_v4 = vpop.xlane.xlu1 %2840 }
 0x5a5   :  { %9556 = vrcp.f32 %v2841_v4 }
 0x5a8   :  { %v2844_v5 = vpop.xlane.xlu0 %2843 }
 0x5a9   :  { %9558 = vrcp.f32 %v2844_v5 }
 0x5ac   :  { %v2850_v62 = vpop.xlane.xlu0 %2849 }
 0x5ad   :  { %9560 = vrcp.f32 %v2850_v62  ;;  %v2847_v7 = vpop.xlane.xlu1 %2846 }
 0x5ae   :  { %v9555_v37 = vpop.eup %9554  ;;  %9562 = vrcp.f32 %v2847_v7 }
 0x5af   :  { %v2868_v11 = vmul.f32 %v9555_v37, %v9539_v53 }
 0x5b0   :  { %v2856_v0 = vpop.xlane.xlu0 %2855 }
 0x5b1   :  { %9564 = vrcp.f32 %v2856_v0  ;;  %v2853_v40 = vpop.xlane.xlu1 %2852  ;;  %9081 = vmatmul.mubr.msk.f32.vlgmr.msra.gmra.mxu0 %vm472_vm2, %v2868_v11 }
 0x5b2   :  { %v9557_v19 = vpop.eup %9556  ;;  %9566 = vrcp.f32 %v2853_v40  ;;  %9089 = vmatpush3.msra.mxu0 %v10238_v43  ;;  %9090 = vmatprep.mubr.msk.f32.mxu0 %vm9726_vm1, %v11315_v20 }
 0x5b3   :  { %v2869_v21 = vmul.f32 %v9557_v19, %v9541_v35  ;;  %9098 = vmatprep.subr.mxu0 %v11315_v20  ;;  %v10389_v35 = vld [vmem:[%s11305_s0 + $0x30] sm:$0xff] }
 0x5b5   :  { %v2859_v24 = vpop.xlane.xlu1 %2858  ;;  %9086 = vmatmul.mubr.msk.f32.vlgmr.msra.gmra.mxu1 %vm472_vm2, %v2869_v21 }
 0x5b6   :  { %v9559_v3 = vpop.eup %9558  ;;  %9568 = vrcp.f32 %v2859_v24  ;;  %9094 = vmatpush3.msra.mxu1 %v10234_v16  ;;  %9095 = vmatprep.mubr.msk.f32.mxu1 %vm9726_vm1, %v11315_v20  ;;  %v2156_v16 = vadd.f32 %v10228_v34, %v10250_v63  ;;  %v1809_v63 = vld [vmem:[%s11309_s4] sm:$0xff] }
 0x5b7   :  { %v2870_v26 = vmul.f32 %v9559_v3, %v9543_v10  ;;  %9103 = vmatprep.subr.mxu1 %v11315_v20 }
 0x5b9   :  { %9091 = vmatmul.mubr.msk.f32.vlgmr.msra.gmra.mxu0 %vm472_vm2, %v2870_v26  ;;  %v8366_v26 = vld [vmem:[%s11307_s2 + $0x158] sm:$0xff] }
 0x5ba   :  { %v9561_v43 = vpop.eup %9560  ;;  %9099 = vmatpush3.msra.mxu0 %v10244_v49  ;;  %9100 = vmatprep.mubr.msk.f32.mxu0 %vm9726_vm1, %v11315_v20 }
 0x5bb   :  { %v9563_v2 = vpop.eup %9562  ;;  %9108 = vmatprep.subr.mxu0 %v11315_v20  ;;  %v2872_v57 = vmul.f32 %v9561_v43, %v9545_v12  ;;  %v8337_v12 = vld [vmem:[%s11307_s2 + $0x50] sm:$0xff] }
 0x5bc   :  { %v2871_v22 = vmul.f32 %v9563_v2, %v9547_v13  ;;  %v8365_v2 = vld [vmem:[%s11307_s2 + $0x150] sm:$0xff] }
 0x5bd   :  { %9101 = vmatmul.mubr.msk.f32.vlgmr.msra.gmra.mxu0 %vm472_vm2, %v2872_v57  ;;  %v10462_v57 = vld [vmem:[%s11308_s3 + $0x6] ss:$0 sm:$0xff] }
 0x5be   :  { %v9565_v53 = vpop.eup %9564  ;;  %9096 = vmatmul.mubr.msk.f32.vlgmr.msra.gmra.mxu1 %vm472_vm2, %v2871_v22  ;;  %9109 = vmatpush3.msra.mxu0 %v2156_v16  ;;  %v8364_v22 = vld [vmem:[%s11307_s2 + $0x148] sm:$0xff] }
 0x5bf   :  { %v9567_v6 = vpop.eup %9566  ;;  %9104 = vmatpush3.msra.mxu1 %v10241_v46  ;;  %9105 = vmatprep.mubr.msk.f32.mxu1 %vm9726_vm1, %v11315_v20  ;;  %v2874_v49 = vmul.f32 %v9565_v53, %v9549_v48  ;;  %v8335_v48 = vld [vmem:[%s11307_s2 + $0x40] sm:$0xff] }
 0x5c0   :  { %9110 = vmatprep.mubr.msk.f32.mxu0 %vm9726_vm1, %v11315_v20  ;;  %9113 = vmatprep.subr.mxu1 %v11315_v20  ;;  %v2873_v34 = vmul.f32 %v9567_v6, %v9551_v50 }
 0x5c1   :  { %9111 = vmatmul.mubr.msk.f32.vlgmr.msra.gmra.mxu0 %vm472_vm2, %v2874_v49  ;;  %v8363_v49 = vld [vmem:[%s11307_s2 + $0x140] sm:$0xff] }
 0x5c2   :  { %9106 = vmatmul.mubr.msk.f32.vlgmr.msra.gmra.mxu1 %vm472_vm2, %v2873_v34 }
 0x5c3   :  { %v9569_v30 = vpop.eup %9568  ;;  %9114 = vmatpush3.msra.mxu1 %v10247_v52  ;;  %9115 = vmatprep.mubr.msk.f32.mxu1 %vm9726_vm1, %v11315_v20  ;;  %v10361_v52 = vld [vmem:[%s11305_s0 + $0x10] sm:$0xff] }
 0x5c4   :  { %v2875_v46 = vmul.f32 %v9569_v30, %v9553_v56  ;;  %9132 = vmatprep.subr.mxu1 %v1809_v63 }
 0x5c6   :  { %9116 = vmatmul.mubr.msk.f32.vlgmr.msra.gmra.mxu1 %vm472_vm2, %v2875_v46 }
 0x5c7   :  { %9134 = vmatprep.mubr.msk.f32.mxu1 %vm472_vm2, %v10165_v36  ;;  %9133 = vmatpush3.msra.mxu1 %v1809_v63  ;;  %v8318_v36 = vld [vmem:[%s11309_s4 + $0x8] sm:$0xff] }
 0x5c8   :  { %9118 = vmatprep.subr.mxu0 %v8318_v36 }
 0x5c9   :  { %9119 = vmatpush3.msra.mxu0 %v8318_v36 }
 0x5ca   :  { %9135 = vmatmul.mubr.msk.f32.vlgmr.msra.gmra.mxu1 %vm472_vm2, %v10163_v9  ;;  %v10328_v9 = vld [vmem:[%s11305_s0] sm:$0xff] }
 0x5cb   :  { %9137 = vmatprep.mubr.msk.f32.mxu1 %vm472_vm2, %v10169_v39  ;;  %v8351_v39 = vld [vmem:[%s11307_s2 + $0xd0] sm:$0xff] }
 0x5ce   :  { %9138 = vmatmul.mubr.msk.f32.gmra.mxu1 %vm472_vm2, %v10167_v38  ;;  %v8352_v38 = vld [vmem:[%s11307_s2 + $0xd8] sm:$0xff] }
 0x5cf   :  { %9140 = vmatprep.mubr.msk.f32.mxu1 %vm472_vm2, %v10175_v18  ;;  %9166 = vmatprep.subr.mxu1 %v8352_v38  ;;  %v8349_v18 = vld [vmem:[%s11307_s2 + $0xc0] sm:$0xff] }
 0x5d0   :  { %9167 = vmatpush3.msra.mxu1 %v8352_v38 }
 0x5d1   :  { %9168 = vmatprep.subr.mxu1 %v8351_v39 }
 0x5d2   :  { %9141 = vmatmul.mubr.msk.f32.gmra.mxu1 %vm472_vm2, %v10171_v15  ;;  %v8350_v15 = vld [vmem:[%s11307_s2 + $0xc8] sm:$0xff] }
 0x5d3   :  { %9143 = vmatprep.mubr.msk.f32.mxu1 %vm472_vm2, %v10177_v45  ;;  %9169 = vmatpush3.msra.mxu1 %v8351_v39  ;;  %v10353_v45 = vld [vmem:[%s11305_s0 + $0x8] sm:$0xff] }
 0x5d4   :  { %9170 = vmatprep.subr.mxu1 %v8350_v15 }
 0x5d5   :  { %9171 = vmatpush3.msra.mxu1 %v8350_v15 }
 0x5d6   :  { %9144 = vmatmul.mubr.msk.f32.gmra.mxu1 %vm472_vm2, %v10173_v42  ;;  %v8338_v42 = vld [vmem:[%s11307_s2 + $0x58] sm:$0xff]  ;;  %9172 = vmatprep.subr.mxu1 %v8349_v18 }
 0x5d7   :  { %9174 = vmatprep.mubr.msk.f32.mxu1 %vm106_vm0, %v10328_v9  ;;  %9146 = vmatprep.subr.mxu0 %v8338_v42 }
 0x5d8   :  { %9173 = vmatpush3.msra.mxu1 %v8349_v18 }
 0x5d9   :  { %9206 = vmatprep.subr.mxu1 %v11315_v20 }
 0x5da   :  { %9175 = vmatmul.mubr.msk.f32.vlgmr.msra.gmra.mxu1 %vm106_vm0, %v10353_v45 }
 0x5db   :  { %9177 = vmatprep.mubr.msk.f32.mxu1 %vm106_vm0, %v10361_v52 }
 0x5de   :  { %9178 = vmatmul.mubr.msk.f32.gmra.mxu1 %vm106_vm0, %v10368_v31 }
 0x5df   :  { %9180 = vmatprep.mubr.msk.f32.mxu1 %vm106_vm0, %v10375_v1 }
 0x5e2   :  { %9181 = vmatmul.mubr.msk.f32.gmra.mxu1 %vm106_vm0, %v10382_v33 }
 0x5e3   :  { %9183 = vmatprep.mubr.msk.f32.mxu1 %vm106_vm0, %v10389_v35 }
 0x5e6   :  { %9184 = vmatmul.mubr.msk.f32.gmra.mxu1 %vm106_vm0, %v10396_v58 }
 0x5e7   :  { %9208 = vmatprep.mubr.msk.f32.mxu1 %vm9726_vm1, %v11315_v20 }
 0x671   :  { %v2945_v28 = vpop.f32.mrf.mxu0 }
 0x672   :  { %9120 = vmatprep.mubr.msk.f32.mxu0 %vm472_vm2, %v2945_v28 }
 0x673   :  { %v9082_v10 = vpop.f32.mrf.mxu0 }
 0x675   :  { %v3018_v8 = vpop.f32.mrf.mxu1 }
 0x676   :  { %9121 = vmatmul.mubr.msk.f32.vlgmr.msra.gmra.mxu0 %vm472_vm2, %v3018_v8 }
 0x677   :  { %v9087_v13 = vpop.f32.mrf.mxu1  ;;  %9147 = vmatpush3.msra.mxu0 %v8338_v42 }
 0x678   :  { %9148 = vmatprep.subr.mxu0 %v8337_v12 }
 0x679   :  { %v3091_v44 = vpop.f32.mrf.mxu0  ;;  %9149 = vmatpush3.msra.mxu0 %v8337_v12 }
 0x67a   :  { %9123 = vmatprep.mubr.msk.f32.mxu0 %vm472_vm2, %v3091_v44  ;;  %9150 = vmatprep.subr.mxu0 %v8336_v41 }
 0x67b   :  { %v9092_v50 = vpop.f32.mrf.mxu0  ;;  %9151 = vmatpush3.msra.mxu0 %v8336_v41 }
 0x67c   :  { %9152 = vmatprep.subr.mxu0 %v8335_v48  ;;  %v8340_v50 = vld [vmem:[%s11308_s3 + $0x2] ss:$0 sm:$0xff] }
 0x67d   :  { %v3237_v54 = vpop.f32.mrf.mxu0  ;;  %9153 = vmatpush3.msra.mxu0 %v8335_v48 }
 0x67e   :  { %v3164_v55 = vpop.f32.mrf.mxu1  ;;  %9186 = vmatprep.subr.mxu0 %v8366_v26 }
 0x67f   :  { %9124 = vmatmul.mubr.msk.f32.gmra.mxu0 %vm472_vm2, %v3164_v55  ;;  %v9102_v56 = vpop.f32.mrf.mxu0 }
 0x680   :  { %v9097_v60 = vpop.f32.mrf.mxu1  ;;  %9126 = vmatprep.mubr.msk.f32.mxu0 %vm472_vm2, %v3237_v54 }
 0x681   :  { %v3383_v61 = vpop.f32.mrf.mxu0 }
 0x682   :  { %v3310_v4 = vpop.f32.mrf.mxu1 }
 0x683   :  { %9127 = vmatmul.mubr.msk.f32.gmra.mxu0 %vm472_vm2, %v3310_v4  ;;  %v9112_v5 = vpop.f32.mrf.mxu0 }
 0x684   :  { %v9107_v62 = vpop.f32.mrf.mxu1  ;;  %9129 = vmatprep.mubr.msk.f32.mxu0 %vm472_vm2, %v3383_v61 }
 0x686   :  { %v3456_v7 = vpop.f32.mrf.mxu1 }
 0x687   :  { %9130 = vmatmul.mubr.msk.f32.gmra.mxu0 %vm472_vm2, %v3456_v7 }
 0x688   :  { %v9117_v37 = vpop.f32.mrf.mxu1  ;;  %9154 = vmatprep.mubr.msk.f32.mxu0 %vm106_vm0, %v10328_v9 }
 0x68a   :  { %v10437_v11 = vpop.f32.mrf.mxu1 }
 0x68b   :  { %9155 = vmatmul.mubr.msk.f32.vlgmr.msra.gmra.mxu0 %vm106_vm0, %v10353_v45 }
 0x68c   :  { %9157 = vmatprep.mubr.msk.f32.mxu0 %vm106_vm0, %v10361_v52  ;;  %v10439_v0 = vpop.f32.mrf.mxu1  ;;  %9187 = vmatpush3.msra.mxu0 %v8366_v26 }
 0x68d   :  { %9188 = vmatprep.subr.mxu0 %v8365_v2 }
 0x68e   :  { %v10441_v40 = vpop.f32.mrf.mxu1  ;;  %9189 = vmatpush3.msra.mxu0 %v8365_v2 }
 0x68f   :  { %9158 = vmatmul.mubr.msk.f32.gmra.mxu0 %vm106_vm0, %v10368_v31  ;;  %9190 = vmatprep.subr.mxu0 %v8364_v22 }
 0x690   :  { %9160 = vmatprep.mubr.msk.f32.mxu0 %vm106_vm0, %v10375_v1  ;;  %v10443_v19 = vpop.f32.mrf.mxu1  ;;  %9191 = vmatpush3.msra.mxu0 %v8364_v22 }
 0x691   :  { %9192 = vmatprep.subr.mxu0 %v8363_v49 }
 0x692   :  { %v10445_v21 = vpop.f32.mrf.mxu1  ;;  %9193 = vmatpush3.msra.mxu0 %v8363_v49 }
 0x693   :  { %9161 = vmatmul.mubr.msk.f32.gmra.mxu0 %vm106_vm0, %v10382_v33  ;;  %9226 = vmatprep.subr.mxu0 %v11315_v20 }
 0x694   :  { %9163 = vmatprep.mubr.msk.f32.mxu0 %vm106_vm0, %v10389_v35  ;;  %v10447_v24 = vpop.f32.mrf.mxu1 }
 0x696   :  { %v10449_v3 = vpop.f32.mrf.mxu1 }
 0x697   :  { %9164 = vmatmul.mubr.msk.f32.gmra.mxu0 %vm106_vm0, %v10396_v58 }
 0x698   :  { %9194 = vmatprep.mubr.msk.f32.mxu0 %vm106_vm0, %v10328_v9  ;;  %v10454_v43 = vpop.f32.mrf.mxu1 }
 0x69a   :  { %v9176_v16 = vpop.f32.mrf.mxu1 }
 0x69b   :  { %v3923_v53 = vadd.f32 %v9176_v16, %v10462_v57  ;;  %9195 = vmatmul.mubr.msk.f32.vlgmr.msra.gmra.mxu0 %vm106_vm0, %v10353_v45 }
 0x69c   :  { %v3917_v6 = vpop.f32.mrf.mxu1  ;;  %9197 = vmatprep.mubr.msk.f32.mxu0 %vm106_vm0, %v10361_v52 }
 0x69d   :  { %v3918_v34 = vadd.f32 %v10462_v57, %v3917_v6 }
 0x69e   :  { %v9179_v63 = vpop.f32.mrf.mxu1 }
 0x69f   :  { %9207 = vmatpush3.xpose.msk.msra.mxu1 %vm472_vm2, %v3918_v34  ;;  %v3933_v30 = vadd.f32 %v9179_v63, %v10462_v57  ;;  %9198 = vmatmul.mubr.msk.f32.gmra.mxu0 %vm106_vm0, %v10368_v31 }
 0x6a0   :  { %9211 = vmatprep.subr.mxu1 %v11315_v20  ;;  %v3927_v46 = vpop.f32.mrf.mxu1  ;;  %9200 = vmatprep.mubr.msk.f32.mxu0 %vm106_vm0, %v10375_v1 }
 0x6a1   :  { %v3928_v36 = vadd.f32 %v10462_v57, %v3927_v46 }
 0x6a2   :  { %v9182_v38 = vpop.f32.mrf.mxu1 }
 0x6a3   :  { %v3943_v39 = vadd.f32 %v9182_v38, %v10462_v57  ;;  %9201 = vmatmul.mubr.msk.f32.gmra.mxu0 %vm106_vm0, %v10382_v33 }
 0x6a4   :  { %v3937_v15 = vpop.f32.mrf.mxu1  ;;  %9203 = vmatprep.mubr.msk.f32.mxu0 %vm106_vm0, %v10389_v35 }
 0x6a5   :  { %v3938_v42 = vadd.f32 %v10462_v57, %v3937_v15 }
 0x6a6   :  { %v9185_v60 = vpop.f32.mrf.mxu1 }
 0x6a7   :  { %9204 = vmatmul.mubr.msk.f32.gmra.mxu0 %vm106_vm0, %v10396_v58  ;;  %v3953_v34 = vadd.f32 %v9185_v60, %v10462_v57 }
 0x6a8   :  { %9227 = vmatpush3.xpose.msk.msra.mxu0 %vm472_vm2, %v3938_v42  ;;  %9228 = vmatprep.mubr.msk.f32.mxu0 %vm9726_vm1, %v11315_v20  ;;  %v3947_v62 = vpop.f32.mrf.mxu1 }
 0x6a9   :  { %9236 = vmatprep.subr.mxu0 %v11315_v20  ;;  %v3948_v2 = vadd.f32 %v10462_v57, %v3947_v62  ;;  %v10557_v57 = vld [vmem:[%s11308_s3 + $0xa] ss:$0 sm:$0xff] }
 0x736   :  { %v10497_v18 = vpop.f32.mrf.mxu0 }
 0x738   :  { %v10499_v28 = vpop.f32.mrf.mxu0 }
 0x73f   :  { %v10501_v10 = vpop.f32.mrf.mxu0 }
 0x741   :  { %v10503_v8 = vpop.f32.mrf.mxu0 }
 0x743   :  { %v10505_v12 = vpop.f32.mrf.mxu0 }
 0x745   :  { %v10507_v13 = vpop.f32.mrf.mxu0 }
 0x747   :  { %v10509_v41 = vpop.f32.mrf.mxu0 }
 0x749   :  { %v10511_v44 = vpop.f32.mrf.mxu0 }
 0x74b   :  { %v9156_v48 = vpop.f32.mrf.mxu0 }
 0x74c   :  { %v3805_v4 = vadd.f32 %v9156_v48, %v8340_v50 }
 0x74d   :  { %v3799_v54 = vpop.f32.mrf.mxu0 }
 0x74e   :  { %v3800_v55 = vadd.f32 %v8340_v50, %v3799_v54 }
 0x74f   :  { %v9159_v56 = vpop.f32.mrf.mxu0 }
 0x750   :  { %9209 = vmatmul.mubr.msk.f32.vlgmr.msra.gmra.mxu1 %vm472_vm2, %v3800_v55 }
 0x751   :  { %9212 = vmatpush3.xpose.msk.msra.mxu1 %vm472_vm2, %v3923_v53  ;;  %v3809_v61 = vpop.f32.mrf.mxu0  ;;  %9213 = vmatprep.mubr.msk.f32.mxu1 %vm9726_vm1, %v11315_v20  ;;  %v3815_v53 = vadd.f32 %v9159_v56, %v8340_v50 }
 0x752   :  { %9216 = vmatprep.subr.mxu1 %v11315_v20  ;;  %v3810_v37 = vadd.f32 %v8340_v50, %v3809_v61 }
 0x753   :  { %v9162_v5 = vpop.f32.mrf.mxu0 }
 0x754   :  { %9214 = vmatmul.mubr.msk.f32.vlgmr.msra.gmra.mxu1 %vm472_vm2, %v3805_v4  ;;  %v3825_v49 = vadd.f32 %v9162_v5, %v8340_v50 }
 0x755   :  { %9217 = vmatpush3.xpose.msk.msra.mxu1 %vm472_vm2, %v3928_v36  ;;  %9218 = vmatprep.mubr.msk.f32.mxu1 %vm9726_vm1, %v11315_v20  ;;  %v3819_v7 = vpop.f32.mrf.mxu0 }
 0x756   :  { %9221 = vmatprep.subr.mxu1 %v11315_v20  ;;  %v3820_v26 = vadd.f32 %v8340_v50, %v3819_v7 }
 0x757   :  { %v9165_v16 = vpop.f32.mrf.mxu0 }
 0x758   :  { %9219 = vmatmul.mubr.msk.f32.vlgmr.msra.gmra.mxu1 %vm472_vm2, %v3810_v37  ;;  %9229 = vmatmul.mubr.msk.f32.vlgmr.msra.gmra.mxu0 %vm472_vm2, %v3820_v26  ;;  %v3835_v63 = vadd.f32 %v9165_v16, %v8340_v50 }
 0x759   :  { %9222 = vmatpush3.xpose.msk.msra.mxu1 %vm472_vm2, %v3933_v30  ;;  %9223 = vmatprep.mubr.msk.f32.mxu1 %vm9726_vm1, %v11315_v20  ;;  %v3829_v22 = vpop.f32.mrf.mxu0 }
 0x75a   :  { %9231 = vmatprep.subr.mxu1 %v11315_v20  ;;  %v3830_v6 = vadd.f32 %v8340_v50, %v3829_v22  ;;  %9237 = vmatpush3.xpose.msk.msra.mxu0 %vm472_vm2, %v3948_v2 }
 0x75b   :  { %9238 = vmatprep.mubr.msk.f32.mxu0 %vm9726_vm1, %v11315_v20  ;;  %9246 = vmatprep.subr.mxu0 %v11315_v20  ;;  %v9196_v30 = vpop.f32.mrf.mxu0 }
 0x75c   :  { %9224 = vmatmul.mubr.msk.f32.vlgmr.msra.gmra.mxu1 %vm472_vm2, %v3815_v53  ;;  %v4041_v46 = vadd.f32 %v9196_v30, %v10557_v57 }
 0x75d   :  { %9232 = vmatpush3.xpose.msk.msra.mxu1 %vm472_vm2, %v3943_v39  ;;  %9233 = vmatprep.mubr.msk.f32.mxu1 %vm9726_vm1, %v11315_v20  ;;  %v4035_v36 = vpop.f32.mrf.mxu0 }
 0x75e   :  { %9239 = vmatmul.mubr.msk.f32.vlgmr.msra.gmra.mxu0 %vm472_vm2, %v3830_v6  ;;  %9241 = vmatprep.subr.mxu1 %v11315_v20  ;;  %v4036_v38 = vadd.f32 %v10557_v57, %v4035_v36 }
 0x75f   :  { %9248 = vmatprep.mubr.msk.f32.mxu0 %vm9726_vm1, %v11315_v20  ;;  %v9199_v39 = vpop.f32.mrf.mxu0 }
 0x760   :  { %9234 = vmatmul.mubr.msk.f32.vlgmr.msra.gmra.mxu1 %vm472_vm2, %v3825_v49  ;;  %v10563_v15 = vadd.f32 %v9199_v39, %v10557_v57  ;;  %9247 = vmatpush3.msra.mxu0 %v4036_v38 }
 0x761   :  { %9242 = vmatpush3.xpose.msk.msra.mxu1 %vm472_vm2, %v3953_v34  ;;  %9243 = vmatprep.mubr.msk.f32.mxu1 %vm9726_vm1, %v11315_v20  ;;  %v4045_v42 = vpop.f32.mrf.mxu0 }
 0x762   :  { %9251 = vmatprep.subr.mxu1 %v11315_v20  ;;  %9256 = vmatprep.subr.mxu0 %v11315_v20  ;;  %v10567_v48 = vadd.f32 %v10557_v57, %v4045_v42 }
 0x763   :  { %v9202_v50 = vpop.f32.mrf.mxu0 }
 0x764   :  { %9244 = vmatmul.mubr.msk.f32.vlgmr.msra.gmra.mxu1 %vm472_vm2, %v3835_v63  ;;  %v10570_v54 = vadd.f32 %v9202_v50, %v10557_v57 }
 0x765   :  { %9253 = vmatprep.mubr.msk.f32.mxu1 %vm9726_vm1, %v11315_v20  ;;  %9252 = vmatpush3.msra.mxu1 %v4041_v46  ;;  %v4055_v55 = vpop.f32.mrf.mxu0 }
 0x766   :  { %9261 = vmatprep.subr.mxu1 %v11315_v20  ;;  %v10573_v56 = vadd.f32 %v10557_v57, %v4055_v55 }
 0x767   :  { %v9205_v60 = vpop.f32.mrf.mxu0 }
 0x768   :  { %v10576_v61 = vadd.f32 %v9205_v60, %v10557_v57 }
 0x769   :  { %v10579_v26 = vpop.f32.mrf.mxu0 }
 0x810   :  { %v4146_v4 = vpop.f32.mrf.mxu1 }
 0x811   :  { %v4682_v5 = vmul.f32 0.35355338, %v4146_v4 }
 0x812   :  { %v9210_v62 = vpop.f32.mrf.mxu1 }
 0x813   :  { %v4690_v7 = vadd.f32 %v4682_v5, %v9992_v32 }
 0x814   :  { %v4222_v37 = vpop.f32.mrf.mxu1 }
 0x815   :  { %v4683_v2 = vmul.f32 0.35355338, %v4222_v37  ;;  %v4698_v16 = vsel %vm472_vm2, %v4690_v7, -inf }
 0x816   :  { %4699 = vmax.xlane.f32.xlu0 %v4698_v16  ;;  %v9215_v22 = vpop.f32.mrf.mxu1 }
 0x817   :  { %v4691_v53 = vadd.f32 %v4683_v2, %v9989_v29 }
 0x818   :  { %v4298_v6 = vpop.f32.mrf.mxu1  ;;  %v4450_v49 = vpop.f32.mrf.mxu0 }
 0x819   :  { %v4684_v34 = vmul.f32 0.35355338, %v4298_v6  ;;  %v4701_v63 = vsel %vm472_vm2, %v4691_v53, -inf  ;;  %v4686_v30 = vmul.f32 0.35355338, %v4450_v49 }
 0x81a   :  { %4702 = vmax.xlane.f32.xlu1 %v4701_v63  ;;  %v9220_v46 = vpop.f32.mrf.mxu1  ;;  %v9230_v36 = vpop.f32.mrf.mxu0 }
 0x81b   :  { %v4692_v38 = vadd.f32 %v4684_v34, %v10002_v51  ;;  %v4694_v39 = vadd.f32 %v4686_v30, %v10011_v14 }
 0x81c   :  { %v4374_v42 = vpop.f32.mrf.mxu1 }
 0x81d   :  { %v4685_v50 = vmul.f32 0.35355338, %v4374_v42  ;;  %v4704_v55 = vsel %vm472_vm2, %v4692_v38, -inf  ;;  %v4710_v62 = vsel %vm472_vm2, %v4694_v39, -inf }
 0x81e   :  { %4705 = vmax.xlane.f32.xlu0 %v4704_v55  ;;  %v9225_v60 = vpop.f32.mrf.mxu1  ;;  %v4602_v4 = vpop.f32.mrf.mxu0 }
 0x81f   :  { %v4688_v5 = vmul.f32 0.35355338, %v4602_v4  ;;  %v4693_v37 = vadd.f32 %v4685_v50, %v9999_v47 }
 0x820   :  { %v4526_v2 = vpop.f32.mrf.mxu1  ;;  %v9240_v16 = vpop.f32.mrf.mxu0 }
 0x821   :  { %v4687_v22 = vmul.f32 0.35355338, %v4526_v2  ;;  %v4707_v6 = vsel %vm472_vm2, %v4693_v37, -inf  ;;  %v4696_v49 = vadd.f32 %v4688_v5, %v10019_v27 }
 0x822   :  { %4711 = vmax.xlane.f32.xlu0 %v4710_v62  ;;  %4708 = vmax.xlane.f32.xlu1 %v4707_v6  ;;  %v9235_v34 = vpop.f32.mrf.mxu1 }
 0x823   :  { %v4716_v63 = vsel %vm472_vm2, %v4696_v49, -inf  ;;  %v4695_v30 = vadd.f32 %v4687_v22, %v10006_v59 }
 0x824   :  { %v4678_v46 = vpop.f32.mrf.mxu1 }
 0x825   :  { %v4689_v36 = vmul.f32 0.35355338, %v4678_v46  ;;  %v4713_v42 = vsel %vm472_vm2, %v4695_v30, -inf }
 0x826   :  { %4717 = vmax.xlane.f32.xlu0 %v4716_v63  ;;  %4714 = vmax.xlane.f32.xlu1 %v4713_v42  ;;  %v9245_v50 = vpop.f32.mrf.mxu1 }
 0x827   :  { %v4697_v55 = vadd.f32 %v4689_v36, %v10015_v23 }
 0x829   :  { %v4719_v60 = vsel %vm472_vm2, %v4697_v55, -inf }
 0x82a   :  { %4720 = vmax.xlane.f32.xlu1 %v4719_v60 }
 0x89f   :  { %v4700_v4 = vpop.xlane.xlu0 %4699 }
 0x8a0   :  { %v4722_v5 = vsub.f32 %v4690_v7, %v4700_v4 }
 0x8a2   :  { %v4730_v62 = vmul.f32 1.442695, %v4722_v5 }
 0x8a3   :  { %v4703_v2 = vpop.xlane.xlu1 %4702 }
 0x8a4   :  { %9570 = vpow2.f32 %v4730_v62  ;;  %v4723_v16 = vsub.f32 %v4691_v53, %v4703_v2 }
 0x8a6   :  { %v4732_v6 = vmul.f32 1.442695, %v4723_v16 }
 0x8a7   :  { %v4706_v22 = vpop.xlane.xlu0 %4705 }
 0x8a8   :  { %9572 = vpow2.f32 %v4732_v6  ;;  %v4724_v34 = vsub.f32 %v4692_v38, %v4706_v22 }
 0x8aa   :  { %v4734_v46 = vmul.f32 1.442695, %v4724_v34 }
 0x8ab   :  { %v4712_v20 = vpop.xlane.xlu0 %4711  ;;  %v4709_v63 = vpop.xlane.xlu1 %4708 }
 0x8ac   :  { %9574 = vpow2.f32 %v4734_v46  ;;  %v4726_v42 = vsub.f32 %v4694_v39, %v4712_v20  ;;  %v4725_v50 = vsub.f32 %v4693_v37, %v4709_v63 }
 0x8ae   :  { %v4738_v36 = vmul.f32 1.442695, %v4726_v42  ;;  %v4736_v17 = vmul.f32 1.442695, %v4725_v50 }
 0x8af   :  { %v4718_v25 = vpop.xlane.xlu0 %4717  ;;  %v4715_v60 = vpop.xlane.xlu1 %4714 }
 0x8b0   :  { %9576 = vpow2.f32 %v4738_v36  ;;  %v4728_v7 = vsub.f32 %v4696_v49, %v4718_v25  ;;  %v4727_v4 = vsub.f32 %v4695_v30, %v4715_v60 }
 0x8b1   :  { %v9571_v5 = vpop.eup %9570  ;;  %9578 = vpow2.f32 %v4736_v17 }
 0x8b2   :  { %v4742_v53 = vmul.f32 1.442695, %v4728_v7  ;;  %v4740_v62 = vmul.f32 1.442695, %v4727_v4  ;;  %v4746_v2 = vsel %vm472_vm2, %v9571_v5, 0.0 }
 0x8b3   :  { %4747 = vadd.xlane.f32.xlu0 %v4746_v2  ;;  %v4721_v38 = vpop.xlane.xlu1 %4720 }
 0x8b4   :  { %9580 = vpow2.f32 %v4742_v53  ;;  %v4729_v16 = vsub.f32 %v4697_v55, %v4721_v38 }
 0x8b5   :  { %v9573_v6 = vpop.eup %9572  ;;  %9582 = vpow2.f32 %v4740_v62 }
 0x8b6   :  { %v4744_v20 = vmul.f32 1.442695, %v4729_v16  ;;  %v4749_v39 = vsel %vm472_vm2, %v9573_v6, 0.0 }
 0x8b7   :  { %4750 = vadd.xlane.f32.xlu1 %v4749_v39  ;;  %v11323_v39 = vmov 0.0  }
 0x8b8   :  { %9584 = vpow2.f32 %v4744_v20 }
 0x8b9   :  { %v9575_v37 = vpop.eup %9574 }
 0x8ba   :  { %v4752_v25 = vsel %vm472_vm2, %v9575_v37, 0.0 }
 0x8bb   :  { %4753 = vadd.xlane.f32.xlu0 %v4752_v25 }
 0x8bd   :  { %v9577_v17 = vpop.eup %9576 }
 0x8be   :  { %v9579_v49 = vpop.eup %9578  ;;  %v4758_v30 = vsel %vm472_vm2, %v9577_v17, 0.0 }
 0x8bf   :  { %4759 = vadd.xlane.f32.xlu0 %v4758_v30  ;;  %v4755_v22 = vsel %vm472_vm2, %v9579_v49, 0.0 }
 0x8c0   :  { %4756 = vadd.xlane.f32.xlu1 %v4755_v22 }
 0x8c1   :  { %v9581_v55 = vpop.eup %9580 }
 0x8c2   :  { %v9583_v34 = vpop.eup %9582  ;;  %v4764_v46 = vsel %vm472_vm2, %v9581_v55, 0.0 }
 0x8c3   :  { %4765 = vadd.xlane.f32.xlu0 %v4764_v46  ;;  %v4761_v63 = vsel %vm472_vm2, %v9583_v34, 0.0 }
 0x8c4   :  { %4762 = vadd.xlane.f32.xlu1 %v4761_v63 }
 0x8c5   :  { %v9585_v42 = vpop.eup %9584 }
 0x8c6   :  { %v4767_v50 = vsel %vm472_vm2, %v9585_v42, 0.0 }
 0x8c8   :  { %4768 = vadd.xlane.f32.xlu1 %v4767_v50 }
 0x93c   :  { %v4748_v36 = vpop.xlane.xlu0 %4747 }
 0x93d   :  { %9586 = vrcp.f32 %v4748_v36 }
 0x940   :  { %v4751_v60 = vpop.xlane.xlu1 %4750 }
 0x941   :  { %9588 = vrcp.f32 %v4751_v60 }
 0x944   :  { %v4754_v7 = vpop.xlane.xlu0 %4753 }
 0x945   :  { %9590 = vrcp.f32 %v4754_v7 }
 0x948   :  { %v4760_v4 = vpop.xlane.xlu0 %4759 }
 0x949   :  { %9592 = vrcp.f32 %v4760_v4  ;;  %v4757_v53 = vpop.xlane.xlu1 %4756  ;;  %v8426_v4 = vld [vmem:[%s11307_s2 + $0xf0] sm:$0xff] }
 0x94a   :  { %v9587_v62 = vpop.eup %9586  ;;  %9594 = vrcp.f32 %v4757_v53 }
 0x94b   :  { %v4778_v2 = vmul.f32 %v9587_v62, %v9571_v5  ;;  %v8425_v62 = vld [vmem:[%s11307_s2 + $0xe8] sm:$0xff] }
 0x94c   :  { %v4766_v38 = vpop.xlane.xlu0 %4765 }
 0x94d   :  { %9596 = vrcp.f32 %v4766_v38  ;;  %v4763_v16 = vpop.xlane.xlu1 %4762  ;;  %9249 = vmatmul.mubr.msk.f32.vlgmr.msra.gmra.mxu0 %vm472_vm2, %v4778_v2  ;;  %v8424_v38 = vld [vmem:[%s11307_s2 + $0xe0] sm:$0xff] }
 0x94e   :  { %v9589_v20 = vpop.eup %9588  ;;  %9598 = vrcp.f32 %v4763_v16  ;;  %9257 = vmatpush3.msra.mxu0 %v10567_v48  ;;  %9258 = vmatprep.mubr.msk.f32.mxu0 %vm9726_vm1, %v11323_v39 }
 0x94f   :  { %v4779_v25 = vmul.f32 %v9589_v20, %v9573_v6  ;;  %9266 = vmatprep.subr.mxu0 %v11323_v39 }
 0x951   :  { %v4769_v30 = vpop.xlane.xlu1 %4768  ;;  %9254 = vmatmul.mubr.msk.f32.vlgmr.msra.gmra.mxu1 %vm472_vm2, %v4779_v25 }
 0x952   :  { %v9591_v22 = vpop.eup %9590  ;;  %9600 = vrcp.f32 %v4769_v30  ;;  %9262 = vmatpush3.msra.mxu1 %v10563_v15  ;;  %9263 = vmatprep.mubr.msk.f32.mxu1 %vm9726_vm1, %v11323_v39  ;;  %v4066_v15 = vadd.f32 %v10557_v57, %v10579_v26 }
 0x953   :  { %v4780_v5 = vmul.f32 %v9591_v22, %v9575_v37  ;;  %9271 = vmatprep.subr.mxu1 %v11323_v39 }
 0x955   :  { %9259 = vmatmul.mubr.msk.f32.vlgmr.msra.gmra.mxu0 %vm472_vm2, %v4780_v5 }
 0x956   :  { %v9593_v48 = vpop.eup %9592  ;;  %9267 = vmatpush3.msra.mxu0 %v10573_v56  ;;  %9268 = vmatprep.mubr.msk.f32.mxu0 %vm9726_vm1, %v11323_v39 }
 0x957   :  { %v9595_v6 = vpop.eup %9594  ;;  %9276 = vmatprep.subr.mxu0 %v11323_v39  ;;  %v4782_v46 = vmul.f32 %v9593_v48, %v9577_v17  ;;  %v8401_v17 = vld [vmem:[%s11309_s4 + $0x10] sm:$0xff] }
 0x958   :  { %v4781_v63 = vmul.f32 %v9595_v6, %v9579_v49  ;;  %v8427_v49 = vld [vmem:[%s11307_s2 + $0xf8] sm:$0xff] }
 0x959   :  { %9269 = vmatmul.mubr.msk.f32.vlgmr.msra.gmra.mxu0 %vm472_vm2, %v4782_v46 }
 0x95a   :  { %v9597_v37 = vpop.eup %9596  ;;  %9264 = vmatmul.mubr.msk.f32.vlgmr.msra.gmra.mxu1 %vm472_vm2, %v4781_v63  ;;  %9277 = vmatpush3.msra.mxu0 %v4066_v15 }
 0x95b   :  { %v9599_v50 = vpop.eup %9598  ;;  %9272 = vmatpush3.msra.mxu1 %v10570_v54  ;;  %9273 = vmatprep.mubr.msk.f32.mxu1 %vm9726_vm1, %v11323_v39  ;;  %v4784_v56 = vmul.f32 %v9597_v37, %v9581_v55  ;;  %v8412_v55 = vld [vmem:[%s11307_s2 + $0x70] sm:$0xff] }
 0x95c   :  { %9278 = vmatprep.mubr.msk.f32.mxu0 %vm9726_vm1, %v11323_v39  ;;  %9281 = vmatprep.subr.mxu1 %v11323_v39  ;;  %v4783_v57 = vmul.f32 %v9599_v50, %v9583_v34  ;;  %v8411_v34 = vld [vmem:[%s11307_s2 + $0x68] sm:$0xff]  ;;  %v8440_v37 = vld [vmem:[%s11307_s2 + $0x170] sm:$0xff] }
 0x95d   :  { %9279 = vmatmul.mubr.msk.f32.vlgmr.msra.gmra.mxu0 %vm472_vm2, %v4784_v56  ;;  %9286 = vmatprep.subr.mxu0 %v8401_v17  ;;  %v8439_v50 = vld [vmem:[%s11307_s2 + $0x168] sm:$0xff]  ;;  %v8438_v56 = vld [vmem:[%s11307_s2 + $0x160] sm:$0xff] }
 0x95e   :  { %9274 = vmatmul.mubr.msk.f32.vlgmr.msra.gmra.mxu1 %vm472_vm2, %v4783_v57  ;;  %9287 = vmatpush3.msra.mxu0 %v8401_v17 }
 0x95f   :  { %v9601_v26 = vpop.eup %9600  ;;  %9282 = vmatpush3.msra.mxu1 %v10576_v61  ;;  %9283 = vmatprep.mubr.msk.f32.mxu1 %vm9726_vm1, %v11323_v39  ;;  %v8413_v61 = vld [vmem:[%s11307_s2 + $0x78] sm:$0xff] }
 0x960   :  { %v4785_v54 = vmul.f32 %v9601_v26, %v9585_v42  ;;  %9320 = vmatprep.subr.mxu0 %v8427_v49  ;;  %9300 = vmatprep.subr.mxu1 %v8413_v61  ;;  %v8410_v42 = vld [vmem:[%s11307_s2 + $0x60] sm:$0xff] }
 0x962   :  { %9284 = vmatmul.mubr.msk.f32.vlgmr.msra.gmra.mxu1 %vm472_vm2, %v4785_v54  ;;  %v3692_v54 = vadd.f32 %v10443_v19, %v10503_v8  ;;  %v3717_v19 = vadd.f32 %v10449_v3, %v10509_v41  ;;  %v8415_v41 = vld [vmem:[%s11308_s3 + $0x3] ss:$0 sm:$0xff] }
 0x963   :  { %9308 = vmatprep.mubr.msk.f32.mxu1 %vm106_vm0, %v10328_v9  ;;  %9301 = vmatpush3.msra.mxu1 %v8413_v61  ;;  %v3702_v61 = vadd.f32 %v10447_v24, %v10507_v13 }
 0x964   :  { %9302 = vmatprep.subr.mxu1 %v8412_v55 }
 0x965   :  { %9303 = vmatpush3.msra.mxu1 %v8412_v55 }
 0x966   :  { %9304 = vmatprep.subr.mxu1 %v8411_v34 }
 0x967   :  { %9305 = vmatpush3.msra.mxu1 %v8411_v34 }
 0x968   :  { %9306 = vmatprep.subr.mxu1 %v8410_v42 }
 0x969   :  { %9307 = vmatpush3.msra.mxu1 %v8410_v42 }
 0x96a   :  { %9309 = vmatmul.mubr.msk.f32.vlgmr.msra.gmra.mxu1 %vm106_vm0, %v10353_v45 }
 0x96b   :  { %9311 = vmatprep.mubr.msk.f32.mxu1 %vm106_vm0, %v10361_v52 }
 0x96e   :  { %9312 = vmatmul.mubr.msk.f32.gmra.mxu1 %vm106_vm0, %v10368_v31 }
 0x96f   :  { %9314 = vmatprep.mubr.msk.f32.mxu1 %vm106_vm0, %v10375_v1 }
 0x972   :  { %9315 = vmatmul.mubr.msk.f32.gmra.mxu1 %vm106_vm0, %v10382_v33 }
 0x973   :  { %9317 = vmatprep.mubr.msk.f32.mxu1 %vm106_vm0, %v10389_v35 }
 0x976   :  { %9318 = vmatmul.mubr.msk.f32.gmra.mxu1 %vm106_vm0, %v10396_v58 }
 0x977   :  { %9348 = vmatprep.mubr.msk.f32.mxu1 %vm106_vm0, %v10328_v9 }
 0xa0d   :  { %v4855_v36 = vpop.f32.mrf.mxu0 }
 0xa0e   :  { %9288 = vmatprep.mubr.msk.f32.mxu0 %vm472_vm2, %v4855_v36 }
 0xa0f   :  { %v9250_v60 = vpop.f32.mrf.mxu0 }
 0xa11   :  { %v4928_v7 = vpop.f32.mrf.mxu1 }
 0xa12   :  { %9289 = vmatmul.mubr.msk.f32.vlgmr.msra.gmra.mxu0 %vm472_vm2, %v4928_v7  ;;  %v8429_v7 = vld [vmem:[%s11308_s3 + $0x7] ss:$0 sm:$0xff] }
 0xa13   :  { %v9255_v53 = vpop.f32.mrf.mxu1  ;;  %9321 = vmatpush3.msra.mxu0 %v8427_v49 }
 0xa14   :  { %9322 = vmatprep.subr.mxu0 %v8426_v4 }
 0xa15   :  { %v5001_v2 = vpop.f32.mrf.mxu0  ;;  %9323 = vmatpush3.msra.mxu0 %v8426_v4 }
 0xa16   :  { %9291 = vmatprep.mubr.msk.f32.mxu0 %vm472_vm2, %v5001_v2  ;;  %9324 = vmatprep.subr.mxu0 %v8425_v62 }
 0xa17   :  { %v9260_v16 = vpop.f32.mrf.mxu0  ;;  %9325 = vmatpush3.msra.mxu0 %v8425_v62 }
 0xa18   :  { %9326 = vmatprep.subr.mxu0 %v8424_v38 }
 0xa19   :  { %v5147_v20 = vpop.f32.mrf.mxu0  ;;  %9327 = vmatpush3.msra.mxu0 %v8424_v38 }
 0xa1a   :  { %v5074_v25 = vpop.f32.mrf.mxu1  ;;  %9360 = vmatprep.subr.mxu0 %v11323_v39 }
 0xa1b   :  { %9292 = vmatmul.mubr.msk.f32.gmra.mxu0 %vm472_vm2, %v5074_v25  ;;  %v9270_v30 = vpop.f32.mrf.mxu0 }
 0xa1c   :  { %v9265_v22 = vpop.f32.mrf.mxu1  ;;  %9294 = vmatprep.mubr.msk.f32.mxu0 %vm472_vm2, %v5147_v20 }
 0xa1d   :  { %v5293_v5 = vpop.f32.mrf.mxu0 }
 0xa1e   :  { %v5220_v48 = vpop.f32.mrf.mxu1 }
 0xa1f   :  { %9295 = vmatmul.mubr.msk.f32.gmra.mxu0 %vm472_vm2, %v5220_v48  ;;  %v9280_v6 = vpop.f32.mrf.mxu0 }
 0xa20   :  { %v9275_v46 = vpop.f32.mrf.mxu1  ;;  %9297 = vmatprep.mubr.msk.f32.mxu0 %vm472_vm2, %v5293_v5 }
 0xa22   :  { %v5366_v15 = vpop.f32.mrf.mxu1 }
 0xa23   :  { %9298 = vmatmul.mubr.msk.f32.gmra.mxu0 %vm472_vm2, %v5366_v15 }
 0xa24   :  { %v9285_v63 = vpop.f32.mrf.mxu1  ;;  %9328 = vmatprep.mubr.msk.f32.mxu0 %vm106_vm0, %v10328_v9  ;;  %v8441_v9 = vld [vmem:[%s11307_s2 + $0x178] sm:$0xff] }
 0xa25   :  { %9340 = vmatprep.subr.mxu1 %v8441_v9 }
 0xa26   :  { %9341 = vmatpush3.msra.mxu1 %v8441_v9 }
 0xa27   :  { %9329 = vmatmul.mubr.msk.f32.vlgmr.msra.gmra.mxu0 %vm106_vm0, %v10353_v45  ;;  %9342 = vmatprep.subr.mxu1 %v8440_v37 }
 0xa28   :  { %9331 = vmatprep.mubr.msk.f32.mxu0 %vm106_vm0, %v10361_v52  ;;  %9343 = vmatpush3.msra.mxu1 %v8440_v37 }
 0xa29   :  { %9344 = vmatprep.subr.mxu1 %v8439_v50 }
 0xa2a   :  { %9345 = vmatpush3.msra.mxu1 %v8439_v50  ;;  %v9310_v26 = vpop.f32.mrf.mxu1 }
 0xa2b   :  { %9332 = vmatmul.mubr.msk.f32.gmra.mxu0 %vm106_vm0, %v10368_v31  ;;  %9346 = vmatprep.subr.mxu1 %v8438_v56  ;;  %v5594_v30 = vadd.f32 %v9310_v26, %v8415_v41 }
 0xa2c   :  { %9334 = vmatprep.mubr.msk.f32.mxu0 %vm106_vm0, %v10375_v1  ;;  %9347 = vmatpush3.msra.mxu1 %v8438_v56 }
 0xa2d   :  { %9349 = vmatmul.mubr.msk.f32.vlgmr.msra.gmra.mxu1 %vm106_vm0, %v10353_v45  ;;  %9370 = vmatprep.subr.mxu1 %v11323_v39  ;;  %v3687_v45 = vadd.f32 %v10437_v11, %v10497_v18  ;;  %v3707_v18 = vadd.f32 %v10445_v21, %v10505_v12  ;;  %v3712_v21 = vadd.f32 %v10454_v43, %v10511_v44 }
 0xa2e   :  { %9351 = vmatprep.mubr.msk.f32.mxu1 %vm106_vm0, %v10361_v52 }
 0xa2f   :  { %9335 = vmatmul.mubr.msk.f32.gmra.mxu0 %vm106_vm0, %v10382_v33 }
 0xa30   :  { %9337 = vmatprep.mubr.msk.f32.mxu0 %vm106_vm0, %v10389_v35 }
 0xa31   :  { %9352 = vmatmul.mubr.msk.f32.gmra.mxu1 %vm106_vm0, %v10368_v31  ;;  %v3682_v31 = vadd.f32 %v10439_v0, %v10499_v28  ;;  %v5588_v28 = vpop.f32.mrf.mxu1 }
 0xa32   :  { %9354 = vmatprep.mubr.msk.f32.mxu1 %vm106_vm0, %v10375_v1  ;;  %v5589_v44 = vadd.f32 %v8415_v41, %v5588_v28 }
 0xa33   :  { %9338 = vmatmul.mubr.msk.f32.gmra.mxu0 %vm106_vm0, %v10396_v58 }
 0xa34   :  { %9362 = vmatprep.mubr.msk.f32.mxu0 %vm9726_vm1, %v11323_v39 }
 0xa35   :  { %9355 = vmatmul.mubr.msk.f32.gmra.mxu1 %vm106_vm0, %v10382_v33 }
 0xa36   :  { %9357 = vmatprep.mubr.msk.f32.mxu1 %vm106_vm0, %v10389_v35  ;;  %v3697_v35 = vadd.f32 %v10441_v40, %v10501_v10  ;;  %v9313_v40 = vpop.f32.mrf.mxu1 }
 0xa37   :  { %v5604_v63 = vadd.f32 %v9313_v40, %v8415_v41 }
 0xa38   :  { %v5598_v42 = vpop.f32.mrf.mxu1 }
 0xa39   :  { %9358 = vmatmul.mubr.msk.f32.gmra.mxu1 %vm106_vm0, %v10396_v58  ;;  %v5599_v20 = vadd.f32 %v8415_v41, %v5598_v42 }
 0xa3a   :  { %9372 = vmatprep.mubr.msk.f32.mxu1 %vm9726_vm1, %v11323_v39  ;;  %v9316_v13 = vpop.f32.mrf.mxu1 }
 0xa3c   :  { %v5608_v43 = vpop.f32.mrf.mxu1 }
 0xa3d   :  { %v5609_v46 = vadd.f32 %v8415_v41, %v5608_v43 }
 0xa3e   :  { %v9319_v25 = vpop.f32.mrf.mxu1 }
 0xa40   :  { %v5618_v15 = vpop.f32.mrf.mxu1 }
 0xa41   :  { %v5619_v56 = vadd.f32 %v8415_v41, %v5618_v15 }
 0xad2   :  { %v9290_v52 = vpop.f32.mrf.mxu0 }
 0xad3   :  { %v10740_v1 = vadd.f32 %v9290_v52, %v3687_v45  ;;  %v5614_v45 = vadd.f32 %v9316_v13, %v8415_v41 }
 0xad4   :  { %v5462_v57 = vpop.f32.mrf.mxu0 }
 0xad5   :  { %v10742_v33 = vadd.f32 %v5462_v57, %v3682_v31  ;;  %v5624_v31 = vadd.f32 %v9319_v25, %v8415_v41  ;;  %v10817_v57 = vld [vmem:[%s11308_s3 + $0xb] ss:$0 sm:$0xff] }
 0xadb   :  { %v9293_v58 = vpop.f32.mrf.mxu0 }
 0xadc   :  { %v10748_v17 = vadd.f32 %v9293_v58, %v3697_v35 }
 0xadd   :  { %v5472_v11 = vpop.f32.mrf.mxu0 }
 0xade   :  { %v10752_v0 = vadd.f32 %v5472_v11, %v3692_v54 }
 0xadf   :  { %v9296_v49 = vpop.f32.mrf.mxu0 }
 0xae0   :  { %v10756_v55 = vadd.f32 %v9296_v49, %v3707_v18 }
 0xae1   :  { %v5482_v10 = vpop.f32.mrf.mxu0 }
 0xae2   :  { %v10760_v8 = vadd.f32 %v5482_v10, %v3702_v61 }
 0xae3   :  { %v9299_v34 = vpop.f32.mrf.mxu0 }
 0xae4   :  { %v10764_v12 = vadd.f32 %v9299_v34, %v3717_v19 }
 0xae5   :  { %v5492_v36 = vpop.f32.mrf.mxu0 }
 0xae6   :  { %v10766_v60 = vadd.f32 %v5492_v36, %v3712_v21 }
 0xae7   :  { %v9330_v24 = vpop.f32.mrf.mxu0 }
 0xae8   :  { %v5712_v2 = vadd.f32 %v9330_v24, %v8429_v7 }
 0xae9   :  { %v5706_v4 = vpop.f32.mrf.mxu0 }
 0xaea   :  { %v5707_v3 = vadd.f32 %v8429_v7, %v5706_v4 }
 0xaeb   :  { %v9333_v53 = vpop.f32.mrf.mxu0 }
 0xaec   :  { %9361 = vmatpush3.xpose.msk.msra.mxu0 %vm472_vm2, %v5707_v3  ;;  %v5722_v5 = vadd.f32 %v9333_v53, %v8429_v7 }
 0xaed   :  { %v5716_v62 = vpop.f32.mrf.mxu0  ;;  %9365 = vmatprep.subr.mxu0 %v11323_v39  ;;  %v9350_v35 = vpop.f32.mrf.mxu1 }
 0xaee   :  { %v5717_v38 = vadd.f32 %v8429_v7, %v5716_v62  ;;  %v5830_v26 = vadd.f32 %v9350_v35, %v10817_v57 }
 0xaef   :  { %v9336_v16 = vpop.f32.mrf.mxu0  ;;  %9363 = vmatmul.mubr.msk.f32.vlgmr.msra.gmra.mxu0 %vm472_vm2, %v5589_v44  ;;  %v5824_v58 = vpop.f32.mrf.mxu1 }
 0xaf0   :  { %9366 = vmatpush3.xpose.msk.msra.mxu0 %vm472_vm2, %v5712_v2  ;;  %9371 = vmatpush3.xpose.msk.msra.mxu1 %vm472_vm2, %v5717_v38  ;;  %v5732_v37 = vadd.f32 %v9336_v16, %v8429_v7  ;;  %v5825_v54 = vadd.f32 %v10817_v57, %v5824_v58 }
 0xaf1   :  { %v5726_v22 = vpop.f32.mrf.mxu0  ;;  %9367 = vmatprep.mubr.msk.f32.mxu0 %vm9726_vm1, %v11323_v39  ;;  %9375 = vmatprep.subr.mxu0 %v11323_v39  ;;  %v9353_v11 = vpop.f32.mrf.mxu1 }
 0xaf2   :  { %v5727_v48 = vadd.f32 %v8429_v7, %v5726_v22  ;;  %9380 = vmatprep.subr.mxu1 %v11323_v39  ;;  %v10823_v18 = vadd.f32 %v9353_v11, %v10817_v57 }
 0xaf3   :  { %v9339_v6 = vpop.f32.mrf.mxu0  ;;  %9368 = vmatmul.mubr.msk.f32.vlgmr.msra.gmra.mxu0 %vm472_vm2, %v5594_v30  ;;  %9373 = vmatmul.mubr.msk.f32.vlgmr.msra.gmra.mxu1 %vm472_vm2, %v5599_v20  ;;  %v5834_v28 = vpop.f32.mrf.mxu1 }
 0xaf4   :  { %9376 = vmatpush3.xpose.msk.msra.mxu0 %vm472_vm2, %v5722_v5  ;;  %9381 = vmatpush3.xpose.msk.msra.mxu1 %vm472_vm2, %v5727_v48  ;;  %v5742_v52 = vadd.f32 %v9339_v6, %v8429_v7  ;;  %v10827_v49 = vadd.f32 %v10817_v57, %v5834_v28 }
 0xaf5   :  { %v5736_v9 = vpop.f32.mrf.mxu0  ;;  %9377 = vmatprep.mubr.msk.f32.mxu0 %vm9726_vm1, %v11323_v39  ;;  %9382 = vmatprep.mubr.msk.f32.mxu1 %vm9726_vm1, %v11323_v39  ;;  %v9356_v61 = vpop.f32.mrf.mxu1 }
 0xaf6   :  { %v5737_v50 = vadd.f32 %v8429_v7, %v5736_v9  ;;  %9385 = vmatprep.subr.mxu0 %v11323_v39  ;;  %9390 = vmatprep.subr.mxu1 %v11323_v39  ;;  %v10830_v40 = vadd.f32 %v9356_v61, %v10817_v57 }
 0xaf7   :  { %9378 = vmatmul.mubr.msk.f32.vlgmr.msra.gmra.mxu0 %vm472_vm2, %v5604_v63  ;;  %9383 = vmatmul.mubr.msk.f32.vlgmr.msra.gmra.mxu1 %vm472_vm2, %v5609_v46  ;;  %v5844_v10 = vpop.f32.mrf.mxu1 }
 0xaf8   :  { %9386 = vmatpush3.xpose.msk.msra.mxu0 %vm472_vm2, %v5732_v37  ;;  %9391 = vmatpush3.xpose.msk.msra.mxu1 %vm472_vm2, %v5737_v50  ;;  %v10833_v19 = vadd.f32 %v10817_v57, %v5844_v10 }
 0xaf9   :  { %9387 = vmatprep.mubr.msk.f32.mxu0 %vm9726_vm1, %v11323_v39  ;;  %9392 = vmatprep.mubr.msk.f32.mxu1 %vm9726_vm1, %v11323_v39  ;;  %v9359_v34 = vpop.f32.mrf.mxu1 }
 0xafa   :  { %9395 = vmatprep.subr.mxu0 %v11323_v39  ;;  %9400 = vmatprep.subr.mxu1 %v11323_v39  ;;  %v10836_v21 = vadd.f32 %v9359_v34, %v10817_v57 }
 0xafb   :  { %9388 = vmatmul.mubr.msk.f32.vlgmr.msra.gmra.mxu0 %vm472_vm2, %v5614_v45  ;;  %9393 = vmatmul.mubr.msk.f32.vlgmr.msra.gmra.mxu1 %vm472_vm2, %v5619_v56  ;;  %v10838_v36 = vpop.f32.mrf.mxu1 }
 0xafc   :  { %9396 = vmatpush3.xpose.msk.msra.mxu0 %vm472_vm2, %v5742_v52  ;;  %9397 = vmatprep.mubr.msk.f32.mxu0 %vm9726_vm1, %v11323_v39 }
 0xafd   :  { %9405 = vmatprep.subr.mxu0 %v11323_v39  ;;  %9402 = vmatprep.mubr.msk.f32.mxu1 %vm9726_vm1, %v11323_v39 }
 0xafe   :  { %9401 = vmatpush3.msra.mxu1 %v5825_v54 }
 0xaff   :  { %9398 = vmatmul.mubr.msk.f32.vlgmr.msra.gmra.mxu0 %vm472_vm2, %v5624_v31  ;;  %9410 = vmatprep.subr.mxu1 %v11323_v39 }
 0xb00   :  { %9407 = vmatprep.mubr.msk.f32.mxu0 %vm9726_vm1, %v11323_v39  ;;  %9406 = vmatpush3.msra.mxu0 %v5830_v26 }
 0xb01   :  { %9415 = vmatprep.subr.mxu0 %v11323_v39 }
 0xbaf   :  { %v5935_v42 = vpop.f32.mrf.mxu0 }
 0xbb0   :  { %v6471_v24 = vmul.f32 0.35355338, %v5935_v42 }
 0xbb1   :  { %v9364_v13 = vpop.f32.mrf.mxu0 }
 0xbb2   :  { %v6479_v7 = vadd.f32 %v6471_v24, %v9992_v32 }
 0xbb3   :  { %v6011_v4 = vpop.f32.mrf.mxu0  ;;  %v6087_v3 = vpop.f32.mrf.mxu1 }
 0xbb4   :  { %v6472_v41 = vmul.f32 0.35355338, %v6011_v4  ;;  %v6473_v53 = vmul.f32 0.35355338, %v6087_v3  ;;  %v6487_v43 = vsel %vm472_vm2, %v6479_v7, -inf }
 0xbb5   :  { %v9374_v44 = vpop.f32.mrf.mxu1  ;;  %6488 = vmax.xlane.f32.xlu0 %v6487_v43  ;;  %v9369_v62 = vpop.f32.mrf.mxu0 }
 0xbb6   :  { %v6481_v2 = vadd.f32 %v6473_v53, %v10002_v51  ;;  %v6480_v38 = vadd.f32 %v6472_v41, %v9989_v29 }
 0xbb7   :  { %v6163_v16 = vpop.f32.mrf.mxu0  ;;  %v6239_v20 = vpop.f32.mrf.mxu1 }
 0xbb8   :  { %v6474_v25 = vmul.f32 0.35355338, %v6163_v16  ;;  %v6475_v30 = vmul.f32 0.35355338, %v6239_v20  ;;  %v6493_v22 = vsel %vm472_vm2, %v6481_v2, -inf  ;;  %v6490_v32 = vsel %vm472_vm2, %v6480_v38, -inf }
 0xbb9   :  { %v9384_v5 = vpop.f32.mrf.mxu1  ;;  %6494 = vmax.xlane.f32.xlu0 %v6493_v22  ;;  %6491 = vmax.xlane.f32.xlu1 %v6490_v32  ;;  %v9379_v48 = vpop.f32.mrf.mxu0 }
 0xbba   :  { %v6483_v6 = vadd.f32 %v6475_v30, %v10011_v14  ;;  %v6482_v46 = vadd.f32 %v6474_v25, %v9999_v47 }
 0xbbb   :  { %v6315_v15 = vpop.f32.mrf.mxu0  ;;  %v6391_v51 = vpop.f32.mrf.mxu1 }
 0xbbc   :  { %v6476_v63 = vmul.f32 0.35355338, %v6315_v15  ;;  %v6477_v29 = vmul.f32 0.35355338, %v6391_v51  ;;  %v6499_v9 = vsel %vm472_vm2, %v6483_v6, -inf  ;;  %v6496_v37 = vsel %vm472_vm2, %v6482_v46, -inf }
 0xbbd   :  { %6500 = vmax.xlane.f32.xlu0 %v6499_v9  ;;  %6497 = vmax.xlane.f32.xlu1 %v6496_v37  ;;  %v9389_v50 = vpop.f32.mrf.mxu0  ;;  %v9394_v56 = vpop.f32.mrf.mxu1 }
 0xbbe   :  { %v6485_v45 = vadd.f32 %v6477_v29, %v10019_v27  ;;  %v6484_v52 = vadd.f32 %v6476_v63, %v10006_v59 }
 0xbbf   :  { %v6467_v31 = vpop.f32.mrf.mxu0 }
 0xbc0   :  { %v6478_v14 = vmul.f32 0.35355338, %v6467_v31  ;;  %v6505_v47 = vsel %vm472_vm2, %v6485_v45, -inf  ;;  %v6502_v35 = vsel %vm472_vm2, %v6484_v52, -inf }
 0xbc1   :  { %6506 = vmax.xlane.f32.xlu0 %v6505_v47  ;;  %6503 = vmax.xlane.f32.xlu1 %v6502_v35  ;;  %v9399_v26 = vpop.f32.mrf.mxu0 }
 0xbc2   :  { %v6486_v58 = vadd.f32 %v6478_v14, %v10015_v23 }
 0xbc4   :  { %v6508_v54 = vsel %vm472_vm2, %v6486_v58, -inf }
 0xbc5   :  { %6509 = vmax.xlane.f32.xlu1 %v6508_v54 }
 0xc3e   :  { %v6489_v11 = vpop.xlane.xlu0 %6488 }
 0xc3f   :  { %v6511_v28 = vsub.f32 %v6479_v7, %v6489_v11 }
 0xc41   :  { %v6519_v61 = vmul.f32 1.442695, %v6511_v28 }
 0xc42   :  { %v6495_v27 = vpop.xlane.xlu0 %6494  ;;  %v6492_v10 = vpop.xlane.xlu1 %6491 }
 0xc43   :  { %9602 = vpow2.f32 %v6519_v61  ;;  %v6513_v59 = vsub.f32 %v6481_v2, %v6495_v27  ;;  %v6512_v34 = vsub.f32 %v6480_v38, %v6492_v10 }
 0xc45   :  { %v6523_v42 = vmul.f32 1.442695, %v6513_v59  ;;  %v6521_v24 = vmul.f32 1.442695, %v6512_v34 }
 0xc46   :  { %v6501_v13 = vpop.xlane.xlu0 %6500  ;;  %v6498_v4 = vpop.xlane.xlu1 %6497 }
 0xc47   :  { %9604 = vpow2.f32 %v6523_v42  ;;  %v6515_v3 = vsub.f32 %v6483_v6, %v6501_v13  ;;  %v6514_v41 = vsub.f32 %v6482_v46, %v6498_v4 }
 0xc48   :  { %9606 = vpow2.f32 %v6521_v24 }
 0xc49   :  { %v6527_v23 = vmul.f32 1.442695, %v6515_v3  ;;  %v6525_v53 = vmul.f32 1.442695, %v6514_v41  ;;  %v8476_v3 = vld [vmem:[%s11309_s4 + $0x18] sm:$0xff] }
 0xc4a   :  { %v6507_v43 = vpop.xlane.xlu0 %6506  ;;  %v6504_v44 = vpop.xlane.xlu1 %6503 }
 0xc4b   :  { %9608 = vpow2.f32 %v6527_v23  ;;  %v6517_v7 = vsub.f32 %v6485_v45, %v6507_v43  ;;  %v6516_v62 = vsub.f32 %v6484_v52, %v6504_v44 }
 0xc4c   :  { %9610 = vpow2.f32 %v6525_v53 }
 0xc4d   :  { %v6531_v16 = vmul.f32 1.442695, %v6517_v7  ;;  %v6529_v20 = vmul.f32 1.442695, %v6516_v62 }
 0xc4e   :  { %v6510_v2 = vpop.xlane.xlu1 %6509 }
 0xc4f   :  { %9612 = vpow2.f32 %v6531_v16  ;;  %v6518_v38 = vsub.f32 %v6486_v58, %v6510_v2 }
 0xc50   :  { %v9603_v25 = vpop.eup %9602  ;;  %9614 = vpow2.f32 %v6529_v20 }
 0xc51   :  { %v6533_v30 = vmul.f32 1.442695, %v6518_v38  ;;  %v6535_v22 = vsel %vm472_vm2, %v9603_v25, 0.0 }
 0xc52   :  { %6536 = vadd.xlane.f32.xlu0 %v6535_v22 }
 0xc53   :  { %9616 = vpow2.f32 %v6533_v30 }
 0xc54   :  { %v9605_v32 = vpop.eup %9604 }
 0xc55   :  { %v9607_v5 = vpop.eup %9606  ;;  %v6541_v48 = vsel %vm472_vm2, %v9605_v32, 0.0 }
 0xc56   :  { %6542 = vadd.xlane.f32.xlu0 %v6541_v48  ;;  %v6538_v6 = vsel %vm472_vm2, %v9607_v5, 0.0 }
 0xc57   :  { %6539 = vadd.xlane.f32.xlu1 %v6538_v6 }
 0xc58   :  { %v9609_v46 = vpop.eup %9608 }
 0xc59   :  { %v9611_v15 = vpop.eup %9610  ;;  %v6547_v51 = vsel %vm472_vm2, %v9609_v46, 0.0 }
 0xc5a   :  { %6548 = vadd.xlane.f32.xlu0 %v6547_v51  ;;  %v6544_v63 = vsel %vm472_vm2, %v9611_v15, 0.0 }
 0xc5b   :  { %6545 = vadd.xlane.f32.xlu1 %v6544_v63 }
 0xc5c   :  { %v9613_v29 = vpop.eup %9612 }
 0xc5d   :  { %v9615_v9 = vpop.eup %9614  ;;  %v6553_v37 = vsel %vm472_vm2, %v9613_v29, 0.0 }
 0xc5e   :  { %6554 = vadd.xlane.f32.xlu0 %v6553_v37  ;;  %v6550_v50 = vsel %vm472_vm2, %v9615_v9, 0.0 }
 0xc5f   :  { %6551 = vadd.xlane.f32.xlu1 %v6550_v50  ;;  %v9694_v50 = vld [vmem:[%s11305_s0 + $0x8] sm:$0xff] }
 0xc60   :  { %v9617_v56 = vpop.eup %9616 }
 0xc61   :  { %v6556_v45 = vsel %vm472_vm2, %v9617_v56, 0.0 }
 0xc63   :  { %6557 = vadd.xlane.f32.xlu1 %v6556_v45 }
 0xcdb   :  { %v6537_v52 = vpop.xlane.xlu0 %6536 }
 0xcdc   :  { %9618 = vrcp.f32 %v6537_v52 }
 0xcdf   :  { %v6543_v31 = vpop.xlane.xlu0 %6542 }
 0xce0   :  { %9620 = vrcp.f32 %v6543_v31  ;;  %v6540_v14 = vpop.xlane.xlu1 %6539 }
 0xce1   :  { %9622 = vrcp.f32 %v6540_v14 }
 0xce3   :  { %v6549_v47 = vpop.xlane.xlu0 %6548 }
 0xce4   :  { %9624 = vrcp.f32 %v6549_v47  ;;  %v6546_v35 = vpop.xlane.xlu1 %6545 }
 0xce5   :  { %9626 = vrcp.f32 %v6546_v35 }
 0xce7   :  { %v6555_v26 = vpop.xlane.xlu0 %6554 }
 0xce8   :  { %9628 = vrcp.f32 %v6555_v26  ;;  %v6552_v58 = vpop.xlane.xlu1 %6551 }
 0xce9   :  { %v9619_v54 = vpop.eup %9618  ;;  %9630 = vrcp.f32 %v6552_v58  ;;  %v9696_v58 = vld [vmem:[%s11305_s0 + $0x18] sm:$0xff] }
 0xcea   :  { %v6567_v11 = vmul.f32 %v9619_v54, %v9603_v25 }
 0xcec   :  { %v6558_v28 = vpop.xlane.xlu1 %6557  ;;  %9403 = vmatmul.mubr.msk.f32.vlgmr.msra.gmra.mxu1 %vm472_vm2, %v6567_v11 }
 0xced   :  { %v9621_v61 = vpop.eup %9620  ;;  %9632 = vrcp.f32 %v6558_v28  ;;  %9411 = vmatpush3.msra.mxu1 %v10827_v49  ;;  %9412 = vmatprep.mubr.msk.f32.mxu1 %vm9726_vm1, %v11323_v39  ;;  %v5855_v49 = vadd.f32 %v10817_v57, %v10838_v36 }
 0xcee   :  { %v9623_v27 = vpop.eup %9622  ;;  %v6569_v10 = vmul.f32 %v9621_v61, %v9605_v32  ;;  %9420 = vmatprep.subr.mxu1 %v11323_v39  ;;  %v10909_v32 = vld [vmem:[%s11312_s7] sm:$0x3f] }
 0xcef   :  { %v6568_v59 = vmul.f32 %v9623_v27, %v9607_v5  ;;  %v11324_v5 = vld [vmem:[#allocation6_spill] sm:$0xff] }
 0xcf0   :  { %9413 = vmatmul.mubr.msk.f32.vlgmr.msra.gmra.mxu1 %vm472_vm2, %v6569_v10  ;;  %v7301_v48 = vrot.slane %v10909_v32, %v11324_v5  ;;  %v9697_v27 = vld [vmem:[%s11305_s0 + $0x10] sm:$0xff] }
 0xcf1   :  { %v9625_v34 = vpop.eup %9624  ;;  %9408 = vmatmul.mubr.msk.f32.vlgmr.msra.gmra.mxu0 %vm472_vm2, %v6568_v59  ;;  %9421 = vmatpush3.msra.mxu1 %v10833_v19 }
 0xcf2   :  { %v9627_v42 = vpop.eup %9626  ;;  %v6571_v24 = vmul.f32 %v9625_v34, %v9609_v46  ;;  %9416 = vmatpush3.msra.mxu0 %v10823_v18  ;;  %9417 = vmatprep.mubr.msk.f32.mxu0 %vm9726_vm1, %v11323_v39 }
 0xcf3   :  { %v6570_v13 = vmul.f32 %v9627_v42, %v9611_v15  ;;  %9422 = vmatprep.mubr.msk.f32.mxu1 %vm9726_vm1, %v11323_v39  ;;  %9425 = vmatprep.subr.mxu0 %v11323_v39 }
 0xcf4   :  { %9430 = vmatprep.subr.mxu1 %v11323_v39  ;;  %9423 = vmatmul.mubr.msk.f32.vlgmr.msra.gmra.mxu1 %vm472_vm2, %v6571_v24  ;;  %v9698_v24 = vld [vmem:[%s11305_s0 + $0x28] sm:$0xff] }
 0xcf5   :  { %v9629_v19 = vpop.eup %9628  ;;  %9418 = vmatmul.mubr.msk.f32.vlgmr.msra.gmra.mxu0 %vm472_vm2, %v6570_v13  ;;  %9431 = vmatpush3.msra.mxu1 %v5855_v49 }
 0xcf6   :  { %v9631_v18 = vpop.eup %9630  ;;  %v6573_v4 = vmul.f32 %v9629_v19, %v9613_v29  ;;  %9426 = vmatpush3.msra.mxu0 %v10830_v40  ;;  %9427 = vmatprep.mubr.msk.f32.mxu0 %vm9726_vm1, %v11323_v39 }
 0xcf7   :  { %v6572_v57 = vmul.f32 %v9631_v18, %v9615_v9  ;;  %9432 = vmatprep.mubr.msk.f32.mxu1 %vm9726_vm1, %v11323_v39  ;;  %9435 = vmatprep.subr.mxu0 %v11323_v39 }
 0xcf8   :  { %9433 = vmatmul.mubr.msk.f32.vlgmr.msra.gmra.mxu1 %vm472_vm2, %v6573_v4  ;;  %9440 = vmatprep.subr.mxu1 %v8476_v3  ;;  %v9699_v4 = vld [vmem:[%s11305_s0 + $0x20] sm:$0xff] }
 0xcf9   :  { %9428 = vmatmul.mubr.msk.f32.vlgmr.msra.gmra.mxu0 %vm472_vm2, %v6572_v57  ;;  %9441 = vmatpush3.msra.mxu1 %v8476_v3 }
 0xcfa   :  { %v9633_v36 = vpop.eup %9632  ;;  %9436 = vmatpush3.msra.mxu0 %v10836_v21  ;;  %9437 = vmatprep.mubr.msk.f32.mxu0 %vm9726_vm1, %v11323_v39 }
 0xcfb   :  { %v6574_v40 = vmul.f32 %v9633_v36, %v9617_v56 }
 0xcfd   :  { %9438 = vmatmul.mubr.msk.f32.vlgmr.msra.gmra.mxu0 %vm472_vm2, %v6574_v40  ;;  %v9700_v40 = vld [vmem:[%s11305_s0 + $0x38] sm:$0xff] }
 0xdac   :  { %v6644_v41 = vpop.f32.mrf.mxu1 }
 0xdad   :  { %9442 = vmatprep.mubr.msk.f32.mxu1 %vm472_vm2, %v6644_v41 }
 0xdae   :  { %v9404_v23 = vpop.f32.mrf.mxu1 }
 0xdb0   :  { %v6790_v53 = vpop.f32.mrf.mxu1 }
 0xdb1   :  { %v6717_v43 = vpop.f32.mrf.mxu0 }
 0xdb2   :  { %9443 = vmatmul.mubr.msk.f32.vlgmr.msra.gmra.mxu1 %vm472_vm2, %v6717_v43  ;;  %v9414_v21 = vpop.f32.mrf.mxu1 }
 0xdb3   :  { %v9409_v44 = vpop.f32.mrf.mxu0  ;;  %9445 = vmatprep.mubr.msk.f32.mxu1 %vm472_vm2, %v6790_v53 }
 0xdb4   :  { %v6936_v39 = vpop.f32.mrf.mxu1 }
 0xdb5   :  { %v6863_v7 = vpop.f32.mrf.mxu0 }
 0xdb6   :  { %9446 = vmatmul.mubr.msk.f32.gmra.mxu1 %vm472_vm2, %v6863_v7  ;;  %v9424_v62 = vpop.f32.mrf.mxu1 }
 0xdb7   :  { %v9419_v16 = vpop.f32.mrf.mxu0  ;;  %9448 = vmatprep.mubr.msk.f32.mxu1 %vm472_vm2, %v6936_v39 }
 0xdb8   :  { %v7082_v20 = vpop.f32.mrf.mxu1 }
 0xdb9   :  { %v7009_v2 = vpop.f32.mrf.mxu0 }
 0xdba   :  { %9449 = vmatmul.mubr.msk.f32.gmra.mxu1 %vm472_vm2, %v7009_v2  ;;  %v9434_v38 = vpop.f32.mrf.mxu1 }
 0xdbb   :  { %v9429_v25 = vpop.f32.mrf.mxu0  ;;  %9451 = vmatprep.mubr.msk.f32.mxu1 %vm472_vm2, %v7082_v20 }
 0xdbd   :  { %v7155_v30 = vpop.f32.mrf.mxu0 }
 0xdbe   :  { %9452 = vmatmul.mubr.msk.f32.gmra.mxu1 %vm472_vm2, %v7155_v30 }
 0xdbf   :  { %v9439_v22 = vpop.f32.mrf.mxu0 }
 0xe72   :  { %v9444_v6 = vpop.f32.mrf.mxu1 }
 0xe73   :  { %v7291_v46 = vadd.f32 %v9444_v6, %v10740_v1  ;;  %v9695_v1 = vld [vmem:[%s11305_s0] sm:$0xff] }
 0xe74   :  { %v7251_v15 = vpop.f32.mrf.mxu1 }
 0xe75   :  { %v7303_v51 = vadd.f32 %v7301_v48, %v7291_v46  ;;  %v7290_v63 = vadd.f32 %v7251_v15, %v10742_v33 }
 0xe76   :  { %v9447_v29 = vpop.f32.mrf.mxu1 }
 0xe77   :  { %v7302_v9 = vadd.f32 %v7301_v48, %v7290_v63  ;;  %v7293_v37 = vadd.f32 %v9447_v29, %v10748_v17  ;;  %v7311_v56 = vadd.f32 %v9694_v50, %v7303_v51 }
 0xe78   :  { %v7261_v45 = vpop.f32.mrf.mxu1 }
 0xe79   :  { %v7305_v52 = vadd.f32 %v7301_v48, %v7293_v37  ;;  %v7292_v31 = vadd.f32 %v7261_v45, %v10752_v0  ;;  %v7321_v14 = vsel %vm106_vm0, %v7311_v56, 0.0  ;;  %v7310_v33 = vadd.f32 %v9695_v1, %v7302_v9 }
 0xe7a   :  { %7322 = vadd.xlane.f32.xlu1 %v7321_v14  ;;  %v9450_v47 = vpop.f32.mrf.mxu1 }
 0xe7b   :  { %v7304_v35 = vadd.f32 %v7301_v48, %v7292_v31  ;;  %v7295_v17 = vadd.f32 %v9450_v47, %v10756_v55  ;;  %v7318_v26 = vsel %vm106_vm0, %v7310_v33, 0.0  ;;  %v7313_v54 = vadd.f32 %v9696_v58, %v7305_v52 }
 0xe7c   :  { %v7271_v0 = vpop.f32.mrf.mxu1  ;;  %7319 = vadd.xlane.f32.xlu0 %v7318_v26 }
 0xe7d   :  { %v7307_v11 = vadd.f32 %v7301_v48, %v7295_v17  ;;  %v7294_v28 = vadd.f32 %v7271_v0, %v10760_v8  ;;  %v7327_v61 = vsel %vm106_vm0, %v7313_v54, 0.0  ;;  %v7312_v10 = vadd.f32 %v9697_v27, %v7304_v35  ;;  %v7450_v27 = vld [vmem:[%s11310_s5 + $0x18] sm:$0xff] }
 0xe7e   :  { %7328 = vadd.xlane.f32.xlu1 %v7327_v61  ;;  %v9453_v55 = vpop.f32.mrf.mxu1  ;;  %9454 = vmatprep.subr.mxu0 %v7450_v27 }
 0xe7f   :  { %v7306_v59 = vadd.f32 %v7301_v48, %v7294_v28  ;;  %v7297_v34 = vadd.f32 %v9453_v55, %v10764_v12  ;;  %v7324_v42 = vsel %vm106_vm0, %v7312_v10, 0.0  ;;  %v7315_v49 = vadd.f32 %v9698_v24, %v7307_v11  ;;  %9455 = vmatpush3.msra.mxu0 %v7450_v27  ;;  %v7448_v55 = vld [vmem:[%s11310_s5 + $0x8] sm:$0xff] }
 0xe80   :  { %v7281_v8 = vpop.f32.mrf.mxu1  ;;  %7325 = vadd.xlane.f32.xlu0 %v7324_v42 }
 0xe81   :  { %v7309_v13 = vadd.f32 %v7301_v48, %v7297_v34  ;;  %v7296_v19 = vadd.f32 %v7281_v8, %v10766_v60  ;;  %v7333_v18 = vsel %vm106_vm0, %v7315_v49, 0.0  ;;  %v7314_v57 = vadd.f32 %v9699_v4, %v7306_v59  ;;  %v9701_v60 = vld [vmem:[%s11305_s0 + $0x30] sm:$0xff]  ;;  %v7447_v59 = vld [vmem:[%s11310_s5] sm:$0xff] }
 0xe82   :  { %7334 = vadd.xlane.f32.xlu1 %v7333_v18 }
 0xe83   :  { %v7308_v12 = vadd.f32 %v7301_v48, %v7296_v19  ;;  %v7330_v36 = vsel %vm106_vm0, %v7314_v57, 0.0  ;;  %v7317_v3 = vadd.f32 %v9700_v40, %v7309_v13 }
 0xe84   :  { %7331 = vadd.xlane.f32.xlu0 %v7330_v36 }
 0xe85   :  { %v7339_v41 = vsel %vm106_vm0, %v7317_v3, 0.0  ;;  %v7316_v23 = vadd.f32 %v9701_v60, %v7308_v12 }
 0xe86   :  { %7340 = vadd.xlane.f32.xlu1 %v7339_v41 }
 0xe87   :  { %v7336_v53 = vsel %vm106_vm0, %v7316_v23, 0.0 }
 0xe88   :  { %7337 = vadd.xlane.f32.xlu0 %v7336_v53 }
 0xf03   :  { %v7323_v43 = vpop.xlane.xlu1 %7322 }
 0xf04   :  { %v7344_v21 = vmul.f32 0.03125, %v7323_v43 }
 0xf05   :  { %v7320_v44 = vpop.xlane.xlu0 %7319 }
 0xf06   :  { %v10953_v39 = vsub.f32 %v7311_v56, %v7344_v21  ;;  %v7343_v7 = vmul.f32 0.03125, %v7320_v44  ;;  %v11325_v44 = vld [vmem:[#allocation5_spill] sm:$0xff] }
 0xf07   :  { %v7329_v62 = vpop.xlane.xlu1 %7328 }
 0xf08   :  { %v10955_v16 = vsub.f32 %v7310_v33, %v7343_v7  ;;  %v7346_v20 = vmul.f32 0.03125, %v7329_v62  ;;  %v7360_v2 = vmul.f32 %v10953_v39, %v10953_v39  ;;  %v7425_v7 = vsub.s32 1, %v11325_v44 }
 0xf09   :  { %v7326_v38 = vpop.xlane.xlu0 %7325 }
 0xf0a   :  { %v10959_v25 = vsub.f32 %v7313_v54, %v7346_v20  ;;  %v7345_v30 = vmul.f32 0.03125, %v7326_v38  ;;  %v7370_v22 = vsel %vm106_vm0, %v7360_v2, 0.0  ;;  %v7359_v48 = vmul.f32 %v10955_v16, %v10955_v16 }
 0xf0b   :  { %v7335_v6 = vpop.xlane.xlu1 %7334  ;;  %7371 = vadd.xlane.f32.xlu1 %v7370_v22  ;;  %v7426_v22 = vrot.slane %v10909_v32, %v7425_v7 }
 0xf0c   :  { %v10964_v46 = vsub.f32 %v7312_v10, %v7345_v30  ;;  %v7348_v15 = vmul.f32 0.03125, %v7335_v6  ;;  %v7367_v51 = vsel %vm106_vm0, %v7359_v48, 0.0  ;;  %v7362_v63 = vmul.f32 %v10959_v25, %v10959_v25  ;;  %v7449_v10 = vld [vmem:[%s11310_s5 + $0x10] sm:$0xff] }
 0xf0d   :  { %7368 = vadd.xlane.f32.xlu0 %v7367_v51  ;;  %v7332_v29 = vpop.xlane.xlu0 %7331  ;;  %9456 = vmatprep.subr.mxu0 %v7449_v10  ;;  %v7437_v48 = vsub.s32 2, %v11325_v44 }
 0xf0e   :  { %v10969_v9 = vsub.f32 %v7315_v49, %v7348_v15  ;;  %v7347_v37 = vmul.f32 0.03125, %v7332_v29  ;;  %v7376_v50 = vsel %vm106_vm0, %v7362_v63, 0.0  ;;  %v7361_v56 = vmul.f32 %v10964_v46, %v10964_v46  ;;  %9457 = vmatpush3.msra.mxu0 %v7449_v10 }
 0xf0f   :  { %7377 = vadd.xlane.f32.xlu1 %v7376_v50  ;;  %v7341_v45 = vpop.xlane.xlu1 %7340  ;;  %9458 = vmatprep.subr.mxu0 %v7448_v55 }
 0xf10   :  { %v10974_v52 = vsub.f32 %v7314_v57, %v7347_v37  ;;  %v7350_v31 = vmul.f32 0.03125, %v7341_v45  ;;  %v7373_v14 = vsel %vm106_vm0, %v7361_v56, 0.0  ;;  %v7364_v1 = vmul.f32 %v10969_v9, %v10969_v9  ;;  %9459 = vmatpush3.msra.mxu0 %v7448_v55 }
 0xf11   :  { %7374 = vadd.xlane.f32.xlu0 %v7373_v14  ;;  %v7338_v33 = vpop.xlane.xlu0 %7337  ;;  %9460 = vmatprep.subr.mxu0 %v7447_v59  ;;  %v7438_v37 = vrot.slane %v10909_v32, %v7437_v48 }
 0xf12   :  { %v10979_v47 = vsub.f32 %v7317_v3, %v7350_v31  ;;  %v7349_v35 = vmul.f32 0.03125, %v7338_v33  ;;  %v7382_v17 = vsel %vm106_vm0, %v7364_v1, 0.0  ;;  %v7363_v26 = vmul.f32 %v10974_v52, %v10974_v52  ;;  %9461 = vmatpush3.msra.mxu0 %v7447_v59 }
 0xf13   :  { %7383 = vadd.xlane.f32.xlu1 %v7382_v17 }
 0xf14   :  { %v10984_v58 = vsub.f32 %v7316_v23, %v7349_v35  ;;  %v7379_v54 = vsel %vm106_vm0, %v7363_v26, 0.0  ;;  %v7366_v0 = vmul.f32 %v10979_v47, %v10979_v47 }
 0xf15   :  { %7380 = vadd.xlane.f32.xlu0 %v7379_v54 }
 0xf16   :  { %v7388_v11 = vsel %vm106_vm0, %v7366_v0, 0.0  ;;  %v7365_v28 = vmul.f32 %v10984_v58, %v10984_v58 }
 0xf17   :  { %7389 = vadd.xlane.f32.xlu1 %v7388_v11 }
 0xf18   :  { %v7385_v61 = vsel %vm106_vm0, %v7365_v28, 0.0 }
 0xf19   :  { %7386 = vadd.xlane.f32.xlu0 %v7385_v61 }
 0xf94   :  { %v7372_v34 = vpop.xlane.xlu1 %7371 }
 0xf95   :  { %v7392_v42 = vmul.f32 0.03125, %v7372_v34  ;;  %v7665_v34 = vld [vmem:[%s11311_s6 + $0x30] sm:$0xff] }
 0xf96   :  { %v7369_v24 = vpop.xlane.xlu0 %7368 }
 0xf97   :  { %v7400_v49 = vadd.f32 1e-12, %v7392_v42  ;;  %v7391_v8 = vmul.f32 0.03125, %v7369_v24  ;;  %v7664_v42 = vld [vmem:[%s11311_s6 + $0x28] sm:$0xff]  ;;  %v7663_v24 = vld [vmem:[%s11311_s6 + $0x20] sm:$0xff] }
 0xf98   :  { %v7378_v13 = vpop.xlane.xlu1 %7377 }
 0xf99   :  { %9634 = vrsqrt.f32 %v7400_v49  ;;  %v7399_v19 = vadd.f32 1e-12, %v7391_v8  ;;  %v7394_v18 = vmul.f32 0.03125, %v7378_v13  ;;  %v7662_v49 = vld [vmem:[%s11311_s6 + $0x18] sm:$0xff]  ;;  %v7661_v8 = vld [vmem:[%s11311_s6 + $0x10] sm:$0xff]  ;;  %v7660_v13 = vld [vmem:[%s11311_s6 + $0x8] sm:$0xff] }
 0xf9a   :  { %v7375_v4 = vpop.xlane.xlu0 %7374 }
 0xf9b   :  { %9636 = vrsqrt.f32 %v7399_v19  ;;  %v7402_v57 = vadd.f32 1e-12, %v7394_v18  ;;  %v7393_v12 = vmul.f32 0.03125, %v7375_v4  ;;  %v7659_v19 = vld [vmem:[%s11311_s6] sm:$0xff] }
 0xf9c   :  { %v7384_v36 = vpop.xlane.xlu1 %7383  ;;  %v8485_v18 = vld [vmem:[%s11313_s8] ss:$0 sm:$0xff] }
 0xf9d   :  { %9638 = vrsqrt.f32 %v7402_v57  ;;  %v7401_v40 = vadd.f32 1e-12, %v7393_v12  ;;  %v7396_v3 = vmul.f32 0.03125, %v7384_v36 }
 0xf9e   :  { %v7381_v41 = vpop.xlane.xlu0 %7380 }
 0xf9f   :  { %9640 = vrsqrt.f32 %v7401_v40  ;;  %v7404_v60 = vadd.f32 1e-12, %v7396_v3  ;;  %v7395_v23 = vmul.f32 0.03125, %v7381_v41 }
 0xfa0   :  { %v7390_v53 = vpop.xlane.xlu1 %7389 }
 0xfa1   :  { %9642 = vrsqrt.f32 %v7404_v60  ;;  %v7403_v43 = vadd.f32 1e-12, %v7395_v23  ;;  %v7398_v21 = vmul.f32 0.03125, %v7390_v53 }
 0xfa2   :  { %v7387_v62 = vpop.xlane.xlu0 %7386 }
 0xfa3   :  { %9644 = vrsqrt.f32 %v7403_v43  ;;  %v7406_v20 = vadd.f32 1e-12, %v7398_v21  ;;  %v7397_v2 = vmul.f32 0.03125, %v7387_v62 }
 0xfa5   :  { %9646 = vrsqrt.f32 %v7406_v20  ;;  %v7405_v38 = vadd.f32 1e-12, %v7397_v2 }
 0xfa6   :  { %v9635_v30 = vpop.eup %9634 }
 0xfa7   :  { %v7416_v6 = vmul.f32 %v9635_v30, %v10953_v39  ;;  %9648 = vrsqrt.f32 %v7405_v38 }
 0xfa8   :  { %v9637_v15 = vpop.eup %9636 }
 0xfa9   :  { %v7415_v51 = vmul.f32 %v9637_v15, %v10955_v16  ;;  %v7428_v29 = vmul.f32 %v7426_v22, %v7416_v6 }
 0xfaa   :  { %v9639_v63 = vpop.eup %9638 }
 0xfab   :  { %v7418_v50 = vmul.f32 %v9639_v63, %v10959_v25  ;;  %v7427_v56 = vmul.f32 %v7426_v22, %v7415_v51  ;;  %v11019_v39 = vadd.f32 %v7438_v37, %v7428_v29 }
 0xfac   :  { %v9641_v45 = vpop.eup %9640 }
 0xfad   :  { %v11016_v31 = vadd.f32 %v7438_v37, %v7427_v56  ;;  %v7417_v14 = vmul.f32 %v9641_v45, %v10964_v46  ;;  %v7430_v33 = vmul.f32 %v7426_v22, %v7418_v50 }
 0xfae   :  { %v9643_v1 = vpop.eup %9642 }
 0xfaf   :  { %v7420_v16 = vmul.f32 %v9643_v1, %v10969_v9  ;;  %9462 = vmatprep.mubr.msk.f32.mxu0 %vm106_vm0, %v11016_v31  ;;  %v7429_v35 = vmul.f32 %v7426_v22, %v7417_v14  ;;  %v11029_v46 = vadd.f32 %v7438_v37, %v7430_v33 }
 0xfb0   :  { %v9645_v17 = vpop.eup %9644  ;;  %9463 = vmatmul.mubr.msk.f32.vlgmr.msra.gmra.mxu0 %vm106_vm0, %v11019_v39 }
 0xfb1   :  { %v11026_v25 = vadd.f32 %v7438_v37, %v7429_v35  ;;  %v7419_v26 = vmul.f32 %v9645_v17, %v10974_v52  ;;  %v7432_v0 = vmul.f32 %v7426_v22, %v7420_v16 }
 0xfb2   :  { %v9647_v54 = vpop.eup %9646 }
 0xfb3   :  { %v7422_v11 = vmul.f32 %v9647_v54, %v10979_v47  ;;  %9465 = vmatprep.mubr.msk.f32.mxu0 %vm106_vm0, %v11026_v25  ;;  %v7431_v9 = vmul.f32 %v7426_v22, %v7419_v26  ;;  %v11039_v10 = vadd.f32 %v7438_v37, %v7432_v0 }
 0xfb4   :  { %v9649_v28 = vpop.eup %9648  ;;  %9466 = vmatmul.mubr.msk.f32.gmra.mxu0 %vm106_vm0, %v11029_v46 }
 0xfb5   :  { %v11036_v61 = vadd.f32 %v7438_v37, %v7431_v9  ;;  %v7421_v27 = vmul.f32 %v9649_v28, %v10984_v58  ;;  %v7434_v52 = vmul.f32 %v7426_v22, %v7422_v11  ;;  %v7666_v58 = vld [vmem:[%s11311_s6 + $0x38] sm:$0xff] }
 0xfb6   :  { %9474 = vmatprep.subr.mxu1 %v7666_v58 }
 0xfb7   :  { %9468 = vmatprep.mubr.msk.f32.mxu0 %vm106_vm0, %v11036_v61  ;;  %v7433_v55 = vmul.f32 %v7426_v22, %v7421_v27  ;;  %v11047_v59 = vadd.f32 %v7438_v37, %v7434_v52  ;;  %9475 = vmatpush3.msra.mxu1 %v7666_v58 }
 0xfb8   :  { %9469 = vmatmul.mubr.msk.f32.gmra.mxu0 %vm106_vm0, %v11039_v10  ;;  %9476 = vmatprep.subr.mxu1 %v7665_v34 }
 0xfb9   :  { %v11045_v47 = vadd.f32 %v7438_v37, %v7433_v55  ;;  %9477 = vmatpush3.msra.mxu1 %v7665_v34 }
 0xfba   :  { %9478 = vmatprep.subr.mxu1 %v7664_v42 }
 0xfbb   :  { %9471 = vmatprep.mubr.msk.f32.mxu0 %vm106_vm0, %v11045_v47  ;;  %9479 = vmatpush3.msra.mxu1 %v7664_v42 }
 0xfbc   :  { %9472 = vmatmul.mubr.msk.f32.gmra.mxu0 %vm106_vm0, %v11047_v59  ;;  %9480 = vmatprep.subr.mxu1 %v7663_v24 }
 0xfbd   :  { %9481 = vmatpush3.msra.mxu1 %v7663_v24 }
 0xfbe   :  { %9482 = vmatprep.subr.mxu1 %v7662_v49 }
 0xfbf   :  { %9483 = vmatpush3.msra.mxu1 %v7662_v49 }
 0xfc0   :  { %9484 = vmatprep.subr.mxu1 %v7661_v8 }
 0xfc1   :  { %9485 = vmatpush3.msra.mxu1 %v7661_v8 }
 0xfc2   :  { %9486 = vmatprep.subr.mxu1 %v7660_v13 }
 0xfc3   :  { %9487 = vmatpush3.msra.mxu1 %v7660_v13 }
 0xfc4   :  { %9488 = vmatprep.subr.mxu1 %v7659_v19 }
 0xfc5   :  { %9489 = vmatpush3.msra.mxu1 %v7659_v19 }
0x1070   :  { %v9464_v4 = vpop.f32.mrf.mxu0 }
0x1071   :  { %v11080_v57 = vadd.f32 %v9464_v4, %v8485_v18 }
0x1072   :  { %v7548_v12 = vpop.f32.mrf.mxu0 }
0x1073   :  { %v7588_v36 = vmul.f32 %v11080_v57, %v11080_v57  ;;  %v11084_v40 = vadd.f32 %v8485_v18, %v7548_v12 }
0x1074   :  { %v9467_v3 = vpop.f32.mrf.mxu0 }
0x1075   :  { %v7596_v41 = vmul.f32 %v7588_v36, %v11080_v57  ;;  %v7587_v60 = vmul.f32 %v11084_v40, %v11084_v40  ;;  %v11089_v23 = vadd.f32 %v9467_v3, %v8485_v18 }
0x1076   :  { %v7558_v53 = vpop.f32.mrf.mxu0 }
0x1077   :  { %v7604_v43 = vmul.f32 0.044715, %v7596_v41  ;;  %v7595_v21 = vmul.f32 %v7587_v60, %v11084_v40  ;;  %v7590_v62 = vmul.f32 %v11089_v23, %v11089_v23  ;;  %v11094_v20 = vadd.f32 %v8485_v18, %v7558_v53 }
0x1078   :  { %v9470_v2 = vpop.f32.mrf.mxu0 }
0x1079   :  { %v7612_v38 = vadd.f32 %v7604_v43, %v11080_v57  ;;  %v7603_v30 = vmul.f32 0.044715, %v7595_v21  ;;  %v7598_v22 = vmul.f32 %v7590_v62, %v11089_v23  ;;  %v7589_v6 = vmul.f32 %v11094_v20, %v11094_v20 }
0x107a   :  { %v11100_v15 = vadd.f32 %v9470_v2, %v8485_v18  ;;  %v7568_v51 = vpop.f32.mrf.mxu0 }
0x107b   :  { %v7620_v63 = vmul.f32 0.7978846, %v7612_v38  ;;  %v7611_v29 = vadd.f32 %v7603_v30, %v11084_v40  ;;  %v7606_v37 = vmul.f32 0.044715, %v7598_v22  ;;  %v7597_v50 = vmul.f32 %v7589_v6, %v11094_v20 }
0x107c   :  { %v7592_v56 = vmul.f32 %v11100_v15, %v11100_v15  ;;  %v11106_v45 = vadd.f32 %v8485_v18, %v7568_v51  ;;  %v9473_v14 = vpop.f32.mrf.mxu0 }
0x107d   :  { %9650 = vtanh.f32 %v7620_v63  ;;  %v7619_v1 = vmul.f32 0.7978846, %v7611_v29  ;;  %v7614_v33 = vadd.f32 %v7606_v37, %v11089_v23  ;;  %v7605_v16 = vmul.f32 0.044715, %v7597_v50 }
0x107e   :  { %v7600_v35 = vmul.f32 %v7592_v56, %v11100_v15  ;;  %v7591_v17 = vmul.f32 %v11106_v45, %v11106_v45  ;;  %v11112_v26 = vadd.f32 %v9473_v14, %v8485_v18  ;;  %v7578_v54 = vpop.f32.mrf.mxu0 }
0x107f   :  { %9652 = vtanh.f32 %v7619_v1  ;;  %v7622_v0 = vmul.f32 0.7978846, %v7614_v33  ;;  %v7613_v11 = vadd.f32 %v7605_v16, %v11094_v20  ;;  %v7579_v9 = vadd.f32 %v8485_v18, %v7578_v54 }
0x1080   :  { %v7608_v28 = vmul.f32 0.044715, %v7600_v35  ;;  %v7599_v27 = vmul.f32 %v7591_v17, %v11106_v45  ;;  %v7594_v52 = vmul.f32 %v11112_v26, %v11112_v26 }
0x1081   :  { %9654 = vtanh.f32 %v7622_v0  ;;  %v7621_v55 = vmul.f32 0.7978846, %v7613_v11  ;;  %v7593_v58 = vmul.f32 %v7579_v9, %v7579_v9 }
0x1082   :  { %v7616_v34 = vadd.f32 %v7608_v28, %v11100_v15  ;;  %v7607_v42 = vmul.f32 0.044715, %v7599_v27  ;;  %v7602_v24 = vmul.f32 %v7594_v52, %v11112_v26 }
0x1083   :  { %9656 = vtanh.f32 %v7621_v55  ;;  %v7601_v49 = vmul.f32 %v7593_v58, %v7579_v9  ;;  %v7669_v55 = vsub.s32 3, %v11325_v44 }
0x1084   :  { %v7624_v8 = vmul.f32 0.7978846, %v7616_v34  ;;  %v7615_v13 = vadd.f32 %v7607_v42, %v11106_v45  ;;  %v7610_v19 = vmul.f32 0.044715, %v7602_v24 }
0x1085   :  { %v7609_v18 = vmul.f32 0.044715, %v7601_v49 }
0x1086   :  { %9658 = vtanh.f32 %v7624_v8  ;;  %v7623_v4 = vmul.f32 0.7978846, %v7615_v13  ;;  %v7618_v12 = vadd.f32 %v7610_v19, %v11112_v26 }
0x1087   :  { %v7617_v36 = vadd.f32 %v7609_v18, %v7579_v9 }
0x1088   :  { %9660 = vtanh.f32 %v7623_v4  ;;  %v7626_v3 = vmul.f32 0.7978846, %v7618_v12 }
0x1089   :  { %v7625_v41 = vmul.f32 0.7978846, %v7617_v36 }
0x108a   :  { %v9651_v60 = vpop.eup %9650  ;;  %9662 = vtanh.f32 %v7626_v3 }
0x108b   :  { %v7636_v53 = vadd.f32 1.0, %v9651_v60  ;;  %9664 = vtanh.f32 %v7625_v41 }
0x108c   :  { %v9653_v43 = vpop.eup %9652 }
0x108d   :  { %v7635_v21 = vadd.f32 1.0, %v9653_v43  ;;  %v7644_v2 = vmul.f32 0.5, %v7636_v53 }
0x108e   :  { %v9655_v62 = vpop.eup %9654 }
0x108f   :  { %v7638_v38 = vadd.f32 1.0, %v9655_v62  ;;  %v7643_v30 = vmul.f32 0.5, %v7635_v21  ;;  %v7652_v63 = vmul.f32 %v7644_v2, %v11080_v57 }
0x1090   :  { %v9657_v22 = vpop.eup %9656 }
0x1091   :  { %v7651_v6 = vmul.f32 %v7643_v30, %v11084_v40  ;;  %v7637_v51 = vadd.f32 1.0, %v9657_v22  ;;  %v7646_v29 = vmul.f32 0.5, %v7638_v38 }
0x1093   :  { %v9659_v37 = vpop.eup %9658  ;;  %9490 = vmatprep.mubr.msk.f32.mxu1 %vm7671_vm3, %v7651_v6  ;;  %v7645_v50 = vmul.f32 0.5, %v7637_v51  ;;  %v7654_v33 = vmul.f32 %v7646_v29, %v11089_v23 }
0x1094   :  { %v7640_v56 = vadd.f32 1.0, %v9659_v37  ;;  %9491 = vmatmul.mubr.msk.f32.vlgmr.msra.gmra.mxu1 %vm7671_vm3, %v7652_v63 }
0x1095   :  { %v9661_v14 = vpop.eup %9660  ;;  %v7653_v1 = vmul.f32 %v7645_v50, %v11094_v20 }
0x1096   :  { %v7639_v16 = vadd.f32 1.0, %v9661_v14  ;;  %v7648_v17 = vmul.f32 0.5, %v7640_v56 }
0x1097   :  { %v9663_v35 = vpop.eup %9662  ;;  %9493 = vmatprep.mubr.msk.f32.mxu1 %vm7671_vm3, %v7653_v1 }
0x1098   :  { %v9665_v40 = vpop.eup %9664  ;;  %v7642_v57 = vadd.f32 1.0, %v9663_v35  ;;  %9494 = vmatmul.mubr.msk.f32.gmra.mxu1 %vm7671_vm3, %v7654_v33  ;;  %v7647_v54 = vmul.f32 0.5, %v7639_v16  ;;  %v7656_v28 = vmul.f32 %v7648_v17, %v11100_v15 }
0x1099   :  { %v7641_v0 = vadd.f32 1.0, %v9665_v40 }
0x109a   :  { %v7655_v11 = vmul.f32 %v7647_v54, %v11106_v45  ;;  %v7650_v27 = vmul.f32 0.5, %v7642_v57  ;;  %v7670_v45 = vrot.slane %v10909_v32, %v7669_v55 }
0x109b   :  { %v7649_v52 = vmul.f32 0.5, %v7641_v0 }
0x109c   :  { %9496 = vmatprep.mubr.msk.f32.mxu1 %vm7671_vm3, %v7655_v11  ;;  %v7658_v20 = vmul.f32 %v7650_v27, %v11112_v26 }
0x109d   :  { %9497 = vmatmul.mubr.msk.f32.gmra.mxu1 %vm7671_vm3, %v7656_v28  ;;  %v7657_v23 = vmul.f32 %v7649_v52, %v7579_v9 }
0x109f   :  { %9499 = vmatprep.mubr.msk.f32.mxu1 %vm7671_vm3, %v7657_v23 }
0x10a1   :  { %9500 = vmatmul.mubr.msk.f32.gmra.mxu1 %vm7671_vm3, %v7658_v20 }
0x1154   :  { %v9492_v15 = vpop.f32.mrf.mxu1 }
0x1155   :  { %v7768_v58 = vadd.f32 %v9492_v15, %v7670_v45 }
0x1156   :  { %v7762_v34 = vpop.f32.mrf.mxu1 }
0x1157   :  { %v7763_v42 = vadd.f32 %v7762_v34, %v7670_v45  ;;  %v7802_v24 = vadd.f32 %v7768_v58, %v11019_v39 }
0x1158   :  { %v9495_v49 = vpop.f32.mrf.mxu1 }
0x1159   :  { %v7778_v9 = vadd.f32 %v9495_v49, %v7670_v45  ;;  %v7812_v26 = vsel %vm106_vm0, %v7802_v24, 0.0  ;;  %v7801_v8 = vadd.f32 %v7763_v42, %v11016_v31 }
0x115a   :  { %7813 = vadd.xlane.f32.xlu0 %v7812_v26  ;;  %v7772_v13 = vpop.f32.mrf.mxu1 }
0x115b   :  { %v7773_v19 = vadd.f32 %v7772_v13, %v7670_v45  ;;  %v7804_v18 = vadd.f32 %v7778_v9, %v11029_v46  ;;  %v7809_v12 = vsel %vm106_vm0, %v7801_v8, 0.0 }
0x115d   :  { %v9498_v4 = vpop.f32.mrf.mxu1  ;;  %v7818_v36 = vsel %vm106_vm0, %v7804_v18, 0.0  ;;  %v7803_v3 = vadd.f32 %v7773_v19, %v11026_v25 }
0x115e   :  { %v7788_v41 = vadd.f32 %v9498_v4, %v7670_v45  ;;  %7810 = vadd.xlane.f32.xlu0 %v7809_v12  ;;  %7819 = vadd.xlane.f32.xlu1 %v7818_v36 }
0x115f   :  { %v7782_v39 = vpop.f32.mrf.mxu1  ;;  %v7815_v31 = vsel %vm106_vm0, %v7803_v3, 0.0 }
0x1160   :  { %v7783_v60 = vadd.f32 %v7782_v39, %v7670_v45  ;;  %v7806_v43 = vadd.f32 %v7788_v41, %v11039_v10 }
0x1161   :  { %v9501_v53 = vpop.f32.mrf.mxu1 }
0x1162   :  { %v7798_v21 = vadd.f32 %v9501_v53, %v7670_v45  ;;  %7816 = vadd.xlane.f32.xlu1 %v7815_v31  ;;  %v7805_v46 = vadd.f32 %v7783_v60, %v11036_v61  ;;  %v7824_v25 = vsel %vm106_vm0, %v7806_v43, 0.0  ;;  %v11160_v61 = vld [vmem:[%s11306_s1] sm:$0xff]  ;;  %v7915_v53 = vsub.s32 4, %v11325_v44  ;;  %s9728_s1 = smov [#allocation2]  }
0x1163   :  { %v7792_v62 = vpop.f32.mrf.mxu1  ;;  %v8057_v51 = vsel %vm472_vm2, %v11160_v61, 0.0  ;;  %v7940_v41 = vrot.slane %v11160_v61, %v11324_v5  ;;  %v7961_v39 = vrot.slane %v11160_v61, %v7669_v55  ;;  %v7954_v60 = vrot.slane %v11160_v61, %v7437_v48  ;;  %s8183_s2 = sshll.u32 %s9728_s1, 4  ;;  %s8184_s2 = int_to_ptr.vmem [resolvable:$true] %s8183_s2 }
0x1164   :  { %v7793_v2 = vadd.f32 %v7792_v62, %v7670_v45  ;;  %v7821_v38 = vsel %vm106_vm0, %v7805_v46, 0.0  ;;  %v7808_v30 = vadd.f32 %v7798_v21, %v11047_v59  ;;  %v7947_v59 = vrot.slane %v11160_v61, %v7425_v7  ;;  %s9703_s0 = scalar_lea.vmem %s8184_s2, 128  ;;  %p9708_p1 = scmp.lt.s32.totalorder %s8184_s2, %s8184_s2 }
0x1165   :  { %7822 = vadd.xlane.f32.xlu0 %v7821_v38  ;;  %v7927_v31 = vsub.s32 5, %v11325_v44  ;;  %v7981_v5 = vsub.s32 6, %v11325_v44  ;;  %p9704_p0 = scmp.ne.s32.totalorder %s8184_s2, %s9703_s0  ;;  %p9709_p2 = scmp.lt.s32.totalorder %s9703_s0, %s9703_s0 }
0x1166   :  { %7825 = vadd.xlane.f32.xlu1 %v7824_v25  ;;  %v7807_v22 = vadd.f32 %v7793_v2, %v11045_v47  ;;  %v7830_v10 = vsel %vm106_vm0, %v7808_v30, 0.0 }
0x1167   :  { %v7975_v21 = vrot.slane %v11160_v61, %v7927_v31  ;;  %v7982_v55 = vrot.slane %v11160_v61, %v7981_v5  ;;  %p9710_p3 = por %p9709_p2, %p9708_p1 }
0x1168   :  { %v7827_v6 = vsel %vm106_vm0, %v7807_v22, 0.0 }
0x1169   :  { %7828 = vadd.xlane.f32.xlu0 %v7827_v6  ;;  %p9711_p4 = pnand %p9710_p3, %p9704_p0 }
0x116a   :  { %7831 = vadd.xlane.f32.xlu1 %v7830_v10 }
0x116d   :  { %8058 = vadd.xlane.f32.xlu0 %v8057_v51 }
0x117b   :  { %7949 = vbcast.lane.b32.xlu1 %v7947_v59, 256 }
0x11e3   :  { %v7814_v47 = vpop.xlane.xlu0 %7813 }
0x11e4   :  { %v7834_v63 = vmul.f32 0.03125, %v7814_v47 }
0x11e6   :  { %v11167_v29 = vsub.f32 %v7802_v24, %v7834_v63 }
0x11e7   :  { %v7820_v37 = vpop.xlane.xlu1 %7819  ;;  %v7811_v50 = vpop.xlane.xlu0 %7810 }
0x11e8   :  { %v7836_v56 = vmul.f32 0.03125, %v7820_v37  ;;  %v7833_v14 = vmul.f32 0.03125, %v7811_v50  ;;  %v7850_v1 = vmul.f32 %v11167_v29, %v11167_v29 }
0x11ea   :  { %v11171_v33 = vsub.f32 %v7804_v18, %v7836_v56  ;;  %v11173_v16 = vsub.f32 %v7801_v8, %v7833_v14  ;;  %v7860_v35 = vsel %vm106_vm0, %v7850_v1, 0.0 }
0x11eb   :  { %v7817_v17 = vpop.xlane.xlu1 %7816  ;;  %7861 = vadd.xlane.f32.xlu0 %v7860_v35 }
0x11ec   :  { %v7835_v7 = vmul.f32 0.03125, %v7817_v17  ;;  %v7852_v40 = vmul.f32 %v11171_v33, %v11171_v33  ;;  %v7849_v57 = vmul.f32 %v11173_v16, %v11173_v16 }
0x11ee   :  { %v11180_v54 = vsub.f32 %v7803_v3, %v7835_v7  ;;  %v7823_v0 = vpop.xlane.xlu0 %7822  ;;  %v7866_v11 = vsel %vm106_vm0, %v7852_v40, 0.0  ;;  %v7857_v28 = vsel %vm106_vm0, %v7849_v57, 0.0 }
0x11ef   :  { %v7837_v27 = vmul.f32 0.03125, %v7823_v0  ;;  %v7826_v52 = vpop.xlane.xlu1 %7825  ;;  %7867 = vadd.xlane.f32.xlu1 %v7866_v11  ;;  %7858 = vadd.xlane.f32.xlu0 %v7857_v28  ;;  %v11224_v0 = vrot.slane %v10909_v32, %v7915_v53 }
0x11f0   :  { %v7838_v23 = vmul.f32 0.03125, %v7826_v52  ;;  %v7851_v20 = vmul.f32 %v11180_v54, %v11180_v54  ;;  %v11227_v52 = vrot.slane %v10909_v32, %v7927_v31 }
0x11f1   :  { %v11186_v45 = vsub.f32 %v7805_v46, %v7837_v27  ;;  %v7988_v46 = vsub.s32 7, %v11325_v44 }
0x11f2   :  { %v11188_v15 = vsub.f32 %v7806_v43, %v7838_v23  ;;  %v7829_v58 = vpop.xlane.xlu0 %7828  ;;  %v7863_v34 = vsel %vm106_vm0, %v7851_v20, 0.0  ;;  %v7968_v43 = vrot.slane %v11160_v61, %v7915_v53 }
0x11f3   :  { %v7839_v42 = vmul.f32 0.03125, %v7829_v58  ;;  %7864 = vadd.xlane.f32.xlu1 %v7863_v34  ;;  %v7832_v24 = vpop.xlane.xlu1 %7831  ;;  %v7853_v49 = vmul.f32 %v11186_v45, %v11186_v45  ;;  %v7989_v48 = vrot.slane %v11160_v61, %v7988_v46 }
0x11f4   :  { %v7840_v9 = vmul.f32 0.03125, %v7832_v24  ;;  %v7854_v26 = vmul.f32 %v11188_v15, %v11188_v15 }
0x11f5   :  { %v11195_v8 = vsub.f32 %v7807_v22, %v7839_v42  ;;  %v7869_v13 = vsel %vm106_vm0, %v7853_v49, 0.0 }
0x11f6   :  { %v11198_v19 = vsub.f32 %v7808_v30, %v7840_v9  ;;  %7870 = vadd.xlane.f32.xlu0 %v7869_v13  ;;  %v7872_v18 = vsel %vm106_vm0, %v7854_v26, 0.0  ;;  %v8059_v62 = vpop.xlane.xlu0 %8058 }
0x11f7   :  { %7873 = vadd.xlane.f32.xlu1 %v7872_v18  ;;  %v7855_v4 = vmul.f32 %v11195_v8, %v11195_v8  ;;  %v7950_v2 = vpop.permute.xlu1 %7949  ;;  %v8060_v37 = vmax.f32 %v8059_v62, 1e-09 }
0x11f8   :  { %v7856_v12 = vmul.f32 %v11198_v19, %v11198_v19 }
0x11f9   :  { %v7875_v36 = vsel %vm106_vm0, %v7855_v4, 0.0 }
0x11fa   :  { %7876 = vadd.xlane.f32.xlu0 %v7875_v36  ;;  %v7878_v3 = vsel %vm106_vm0, %v7856_v12, 0.0 }
0x11fb   :  { %7879 = vadd.xlane.f32.xlu1 %v7878_v3 }
0x120c   :  { %7942 = vbcast.lane.b32.xlu1 %v7940_v41, 256 }
0x1210   :  { %7963 = vbcast.lane.b32.xlu1 %v7961_v39, 256  ;;  %7956 = vbcast.lane.b32.xlu0 %v7954_v60, 256 }
0x1214   :  { %7970 = vbcast.lane.b32.xlu1 %v7968_v43, 256  ;;  %7977 = vbcast.lane.b32.xlu0 %v7975_v21, 256 }
0x1218   :  { %7984 = vbcast.lane.b32.xlu1 %v7982_v55, 256  ;;  %7991 = vbcast.lane.b32.xlu0 %v7989_v48, 256 }
0x1274   :  { %v7862_v38 = vpop.xlane.xlu0 %7861 }
0x1275   :  { %v7882_v25 = vmul.f32 0.03125, %v7862_v38 }
0x1277   :  { %v7890_v30 = vadd.f32 1e-12, %v7882_v25 }
0x1278   :  { %v7868_v22 = vpop.xlane.xlu1 %7867  ;;  %v7859_v6 = vpop.xlane.xlu0 %7858 }
0x1279   :  { %9666 = vrsqrt.f32 %v7890_v30  ;;  %v7884_v10 = vmul.f32 0.03125, %v7868_v22  ;;  %v7881_v51 = vmul.f32 0.03125, %v7859_v6 }
0x127b   :  { %v7892_v59 = vadd.f32 1e-12, %v7884_v10  ;;  %v7889_v44 = vadd.f32 1e-12, %v7881_v51 }
0x127c   :  { %v7865_v47 = vpop.xlane.xlu1 %7864 }
0x127d   :  { %9668 = vrsqrt.f32 %v7892_v59  ;;  %v7883_v63 = vmul.f32 0.03125, %v7865_v47 }
0x127e   :  { %9670 = vrsqrt.f32 %v7889_v44 }
0x127f   :  { %v7891_v61 = vadd.f32 1e-12, %v7883_v63  ;;  %v7871_v50 = vpop.xlane.xlu0 %7870 }
0x1280   :  { %v7885_v56 = vmul.f32 0.03125, %v7871_v50  ;;  %v7874_v14 = vpop.xlane.xlu1 %7873 }
0x1281   :  { %9672 = vrsqrt.f32 %v7891_v61  ;;  %v7886_v1 = vmul.f32 0.03125, %v7874_v14 }
0x1282   :  { %v7893_v35 = vadd.f32 1e-12, %v7885_v56  ;;  %9674 = vrcp.f32 %v8060_v37 }
0x1283   :  { %v7894_v17 = vadd.f32 1e-12, %v7886_v1  ;;  %v7877_v7 = vpop.xlane.xlu0 %7876 }
0x1284   :  { %9676 = vrsqrt.f32 %v7893_v35  ;;  %v7887_v40 = vmul.f32 0.03125, %v7877_v7  ;;  %v7880_v57 = vpop.xlane.xlu1 %7879 }
0x1285   :  { %9678 = vrsqrt.f32 %v7894_v17  ;;  %v7888_v11 = vmul.f32 0.03125, %v7880_v57 }
0x1286   :  { %v9667_v28 = vpop.eup %9666  ;;  %v7895_v27 = vadd.f32 1e-12, %v7887_v40 }
0x1287   :  { %v7906_v23 = vmul.f32 %v9667_v28, %v11167_v29  ;;  %v7896_v20 = vadd.f32 1e-12, %v7888_v11  ;;  %v7957_v60 = vpop.permute.xlu0 %7956 }
0x1288   :  { %9680 = vrsqrt.f32 %v7895_v27  ;;  %v7943_v58 = vpop.permute.xlu1 %7942 }
0x1289   :  { %v7918_v34 = vmul.f32 %v11224_v0, %v7906_v23  ;;  %9682 = vrsqrt.f32 %v7896_v20 }
0x128a   :  { %v9669_v42 = vpop.eup %9668 }
0x128b   :  { %v9671_v24 = vpop.eup %9670  ;;  %v7930_v49 = vadd.f32 %v11227_v52, %v7918_v34  ;;  %v7908_v9 = vmul.f32 %v9669_v42, %v11171_v33 }
0x128c   :  { %v7905_v26 = vmul.f32 %v9671_v24, %v11173_v16  ;;  %v7964_v4 = vpop.permute.xlu1 %7963 }
0x128d   :  { %v7994_v13 = vmul.f32 %v7950_v2, %v7930_v49  ;;  %v7920_v32 = vmul.f32 %v11224_v0, %v7908_v9 }
0x128e   :  { %v9673_v18 = vpop.eup %9672  ;;  %v7917_v29 = vmul.f32 %v11224_v0, %v7905_v26 }
0x128f   :  { %v8008_v12 = vsel %vm106_vm0, %v7994_v13, 0.0  ;;  %v7932_v36 = vadd.f32 %v11227_v52, %v7920_v32  ;;  %v7907_v3 = vmul.f32 %v9673_v18, %v11180_v54  ;;  %v11239_v41 = vpop.eup %9674 }
0x1290   :  { %v8009_v39 = vrot.slane %v8008_v12, 4  ;;  %v7929_v33 = vadd.f32 %v11227_v52, %v7917_v29  ;;  %v7971_v25 = vpop.permute.xlu1 %7970  ;;  %v8063_v10 = vrot.slane %v11239_v41, 1  ;;  %v8065_v9 = vrot.slane %v11239_v41, 3 }
0x1291   :  { %v9677_v16 = vpop.eup %9676  ;;  %v7996_v53 = vmul.f32 %v7964_v4, %v7932_v36  ;;  %v7919_v31 = vmul.f32 %v11224_v0, %v7907_v3 }
0x1292   :  { %v9679_v43 = vpop.eup %9678  ;;  %v8010_v21 = vadd.f32 %v8009_v39, %v8008_v12  ;;  %v7993_v5 = vmul.f32 %v7943_v58, %v7929_v33  ;;  %v7909_v46 = vmul.f32 %v9677_v16, %v11186_v45 }
0x1293   :  { %v8022_v55 = vsel %vm106_vm0, %v7996_v53, 0.0  ;;  %v7931_v48 = vadd.f32 %v11227_v52, %v7919_v31  ;;  %v7910_v54 = vmul.f32 %v9679_v43, %v11188_v15  ;;  %v7978_v15 = vpop.permute.xlu0 %7977 }
0x1294   :  { %v8011_v62 = vrot.slane %v8010_v21, 2  ;;  %v8001_v2 = vsel %vm106_vm0, %v7993_v5, 0.0  ;;  %v8023_v38 = vrot.slane %v8022_v55, 4  ;;  %v7921_v30 = vmul.f32 %v11224_v0, %v7909_v46  ;;  %v7985_v58 = vpop.permute.xlu1 %7984 }
0x1295   :  { %v9681_v22 = vpop.eup %9680  ;;  %v8002_v6 = vrot.slane %v8001_v2, 4  ;;  %v7995_v51 = vmul.f32 %v7957_v60, %v7931_v48  ;;  %v7922_v45 = vmul.f32 %v11224_v0, %v7910_v54  ;;  %v8064_v48 = vrot.slane %v11239_v41, 2 }
0x1296   :  { %v9683_v59 = vpop.eup %9682  ;;  %v8012_v44 = vadd.f32 %v8011_v62, %v8010_v21  ;;  %v8024_v47 = vadd.f32 %v8023_v38, %v8022_v55  ;;  %v7933_v63 = vadd.f32 %v11227_v52, %v7921_v30  ;;  %v7911_v37 = vmul.f32 %v9681_v22, %v11195_v8 }
0x1297   :  { %v8003_v61 = vadd.f32 %v8002_v6, %v8001_v2  ;;  %v8015_v50 = vsel %vm106_vm0, %v7995_v51, 0.0  ;;  %v7934_v56 = vadd.f32 %v11227_v52, %v7922_v45  ;;  %v7912_v14 = vmul.f32 %v9683_v59, %v11198_v19  ;;  %v7992_v32 = vpop.permute.xlu0 %7991 }
0x1298   :  { %v8013_v1 = vrot.slane %v8012_v44, 1  ;;  %v8025_v35 = vrot.slane %v8024_v47, 2  ;;  %v8016_v17 = vrot.slane %v8015_v50, 4  ;;  %v7997_v7 = vmul.f32 %v7971_v25, %v7933_v63 }
0x1299   :  { %v8004_v40 = vrot.slane %v8003_v61, 2  ;;  %v7998_v57 = vmul.f32 %v7978_v15, %v7934_v56  ;;  %v7923_v11 = vmul.f32 %v11224_v0, %v7911_v37  ;;  %v7924_v28 = vmul.f32 %v11224_v0, %v7912_v14 }
0x129a   :  { %v8014_v27 = vadd.f32 %v8013_v1, %v8012_v44  ;;  %v8026_v23 = vadd.f32 %v8025_v35, %v8024_v47  ;;  %v8017_v8 = vadd.f32 %v8016_v17, %v8015_v50  ;;  %v8029_v20 = vsel %vm106_vm0, %v7997_v7, 0.0 }
0x129b   :  { %v8005_v34 = vadd.f32 %v8004_v40, %v8003_v61  ;;  %v8030_v42 = vrot.slane %v8029_v20, 4  ;;  %v8036_v19 = vsel %vm106_vm0, %v7998_v57, 0.0  ;;  %v7935_v24 = vadd.f32 %v11227_v52, %v7923_v11 }
0x129c   :  { %v8027_v49 = vrot.slane %v8026_v23, 1  ;;  %v8018_v26 = vrot.slane %v8017_v8, 2  ;;  %v8037_v13 = vrot.slane %v8036_v19, 4  ;;  %v7936_v4 = vadd.f32 %v11227_v52, %v7924_v28 }
0x129d   :  { %v8006_v18 = vrot.slane %v8005_v34, 1  ;;  %v8031_v0 = vadd.f32 %v8030_v42, %v8029_v20  ;;  %v7999_v29 = vmul.f32 %v7985_v58, %v7935_v24  ;;  %v11263_v12 = vmul.f32 %v8063_v10, %v8014_v27 }
0x129e   :  { %v8028_v36 = vadd.f32 %v8027_v49, %v8026_v23  ;;  %v8019_v3 = vadd.f32 %v8018_v26, %v8017_v8  ;;  %v8038_v39 = vadd.f32 %v8037_v13, %v8036_v19  ;;  %v8000_v53 = vmul.f32 %v7992_v32, %v7936_v4 }
0x129f   :  { %v8007_v33 = vadd.f32 %v8006_v18, %v8005_v34  ;;  %v8032_v60 = vrot.slane %v8031_v0, 2  ;;  %v8043_v16 = vsel %vm106_vm0, %v7999_v29, 0.0  ;;  %v8087_v38 = vmul.f32 %v11263_v12, %v11263_v12 }
0x12a0   :  { %v11266_v31 = vmul.f32 %v8065_v9, %v8028_v36  ;;  %v8020_v43 = vrot.slane %v8019_v3, 1  ;;  %v8039_v21 = vrot.slane %v8038_v39, 2  ;;  %v8044_v55 = vrot.slane %v8043_v16, 4 }
0x12a1   :  { %v11269_v5 = vmul.f32 %v11239_v41, %v8007_v33  ;;  %v8033_v46 = vadd.f32 %v8032_v60, %v8031_v0  ;;  %v8050_v52 = vsel %vm106_vm0, %v8000_v53, 0.0  ;;  %v8066_v30 = vrot.slane %v11239_v41, 4 }
0x12a2   :  { %v8021_v54 = vadd.f32 %v8020_v43, %v8019_v3  ;;  %v8040_v62 = vadd.f32 %v8039_v21, %v8038_v39  ;;  %v8051_v2 = vrot.slane %v8050_v52, 4  ;;  %v8045_v22 = vadd.f32 %v8044_v55, %v8043_v16 }
0x12a3   :  { %v8034_v25 = vrot.slane %v8033_v46, 1  ;;  %v8067_v10 = vrot.slane %v11239_v41, 5  ;;  %v8086_v59 = vmul.f32 %v11269_v5, %v11269_v5  ;;  %v8089_v44 = vmul.f32 %v11266_v31, %v11266_v31 }
0x12a4   :  { %v8080_v6 = vmul.f32 %v8064_v48, %v8021_v54  ;;  %v8041_v51 = vrot.slane %v8040_v62, 1  ;;  %v8052_v45 = vadd.f32 %v8051_v2, %v8050_v52  ;;  %v8046_v63 = vrot.slane %v8045_v22, 2 }
0x12a5   :  { %v8035_v47 = vadd.f32 %v8034_v25, %v8033_v46  ;;  %v8102_v50 = vrot.slane %v8087_v38, 7  ;;  %v8108_v40 = vrot.slane %v8089_v44, 5  ;;  %v8068_v58 = vrot.slane %v11239_v41, 6 }
0x12a6   :  { %v8088_v15 = vmul.f32 %v8080_v6, %v8080_v6  ;;  %v8042_v37 = vadd.f32 %v8041_v51, %v8040_v62  ;;  %v8053_v61 = vrot.slane %v8052_v45, 2  ;;  %v8047_v14 = vadd.f32 %v8046_v63, %v8045_v22 }
0x12a7   :  { %v8082_v56 = vmul.f32 %v8066_v30, %v8035_v47  ;;  %v8104_v7 = vsel %vm8103_vm4, %v8102_v50, %v8086_v59  ;;  %v8069_v42 = vrot.slane %v11239_v41, 7 }
0x12a8   :  { %v8105_v1 = vrot.slane %v8088_v15, 6  ;;  %v8083_v35 = vmul.f32 %v8067_v10, %v8042_v37  ;;  %v8054_v17 = vadd.f32 %v8053_v61, %v8052_v45  ;;  %v8048_v11 = vrot.slane %v8047_v14, 1 }
0x12a9   :  { %v8090_v57 = vmul.f32 %v8082_v56, %v8082_v56 }
0x12aa   :  { %v8091_v28 = vmul.f32 %v8083_v35, %v8083_v35  ;;  %v8055_v27 = vrot.slane %v8054_v17, 1  ;;  %v8107_v23 = vsel %vm8106_vm5, %v8105_v1, %v8104_v7  ;;  %v8049_v20 = vadd.f32 %v8048_v11, %v8047_v14 }
0x12ab   :  { %v8111_v8 = vrot.slane %v8090_v57, 4  ;;  %v8110_v34 = vsel %vm8109_vm6, %v8108_v40, %v8107_v23 }
0x12ac   :  { %v8056_v19 = vadd.f32 %v8055_v27, %v8054_v17  ;;  %v8114_v24 = vrot.slane %v8091_v28, 3  ;;  %v8084_v49 = vmul.f32 %v8068_v58, %v8049_v20 }
0x12ad   :  { %v8113_v9 = vsel %vm8112_vm7, %v8111_v8, %v8110_v34 }
0x12ae   :  { %v8085_v26 = vmul.f32 %v8069_v42, %v8056_v19  ;;  %v8092_v13 = vmul.f32 %v8084_v49, %v8084_v49  ;;  %v8116_v18 = vsel %vm8115_vm8, %v8114_v24, %v8113_v9 }
0x12b0   :  { %v8093_v32 = vmul.f32 %v8085_v26, %v8085_v26  ;;  %v8117_v0 = vrot.slane %v8092_v13, 2 }
0x12b2   :  { %v8120_v29 = vrot.slane %v8093_v32, 1  ;;  %v8119_v4 = vsel %vm8118_vm9, %v8117_v0, %v8116_v18 }
0x12b4   :  { %v8122_v36 = vsel %vm8121_vm10, %v8120_v29, %v8119_v4 }
0x12b5   :  { %v8124_v41 = vsel %vm106_vm0, %v8122_v36, 0.0 }
0x12b6   :  { %8125 = vadd.xlane.f32.xlu1 %v8124_v41 }
0x133f   :  { %v8126_v3 = vpop.xlane.xlu1 %8125 }
0x1340   :  { %v8127_v39 = vmax.f32 %v8126_v3, 1e-12 }
0x1342   :  { %9684 = vrsqrt.f32 %v8127_v39 }
0x134f   :  { %v9685_v33 = vpop.eup %9684 }
0x1350   :  { %v8130_v60 = vrot.slane %v9685_v33, 1  ;;  %v8131_v16 = vrot.slane %v9685_v33, 2  ;;  %v8132_v53 = vrot.slane %v9685_v33, 3  ;;  %v8133_v43 = vrot.slane %v9685_v33, 4 }
0x1351   :  { %v8134_v21 = vrot.slane %v9685_v33, 5  ;;  %v8135_v46 = vrot.slane %v9685_v33, 6  ;;  %v8136_v55 = vrot.slane %v9685_v33, 7  ;;  %v8145_v2 = vmul.f32 %v9685_v33, %v11269_v5 }
0x1352   :  { %v8146_v52 = vmul.f32 %v8130_v60, %v11263_v12  ;;  %v8147_v48 = vmul.f32 %v8131_v16, %v8080_v6  ;;  %v8148_v54 = vmul.f32 %v8132_v53, %v11266_v31  ;;  %v8149_v62 = vmul.f32 %v8133_v43, %v8082_v56 }
0x1353   :  { %v8150_v38 = vmul.f32 %v8134_v21, %v8083_v35  ;;  %v8151_v22 = vmul.f32 %v8135_v46, %v8084_v49  ;;  %v8152_v10 = vmul.f32 %v8136_v55, %v8085_v26 }
0x1354   :  { %v8161_v25 = vrot.slane %v8146_v52, 7  ;;  %v8163_v30 = vrot.slane %v8147_v48, 6  ;;  %v8165_v45 = vrot.slane %v8148_v54, 5  ;;  %v8167_v44 = vrot.slane %v8149_v62, 4 }
0x1355   :  { %v8169_v12 = vrot.slane %v8150_v38, 3  ;;  %v8171_v6 = vrot.slane %v8151_v22, 2  ;;  %v8173_v63 = vrot.slane %v8152_v10, 1 }
0x1356   :  { %v8162_v51 = vsel %vm8103_vm4, %v8161_v25, %v8145_v2 }
0x1357   :  { %v8164_v59 = vsel %vm8106_vm5, %v8163_v30, %v8162_v51 }
0x1358   :  { %v8166_v47 = vsel %vm8109_vm6, %v8165_v45, %v8164_v59 }
0x1359   :  { %v8168_v31 = vsel %vm8112_vm7, %v8167_v44, %v8166_v47 }
0x135a   :  { %v8170_v5 = vsel %vm8115_vm8, %v8169_v12, %v8168_v31 }
0x135b   :  { %v8172_v15 = vsel %vm8118_vm9, %v8171_v6, %v8170_v5 }
0x135c   :  { %v8174_v37 = vsel %vm8121_vm10, %v8173_v63, %v8172_v15 }
0x135d   :  { %8176 = vst.msk [vmem:[#allocation2] sm:$0xff] %vm106_vm0, %v8174_v37 }
0x135e   :  { %9714 = shalt.err (!%p9711_p4)
}
0x135f   :  { %8186 = dma.vmem_to_hbm [thread:$0]  %s8184_s2, 128, %s11314_s9, [#allocation3]  }
0x1360   :  { %9723 = dma.done.wait [#allocation3], 128  }
0x1361   :  { %9724 = vsyncadd [#allocation3], 4294967168 }
0x1362   :  { %8190 = vsyncpa [#allocation3], 1 }

</bundles_post_ra>
